<compile_context>
chip_gen: v6e
topology: v6e:2x2x1
jax: 0.10.0
libtpu: 0.0.40
codegen_flags: <defaults>
</compile_context>

<pallas_src>
import math
from functools import partial

import numpy as np
import jax
import jax.numpy as jnp
from jax.experimental import pallas as pl
from jax.experimental.pallas import tpu as pltpu


# ----------------------------------------------------------------------------- Pallas kernels

def _epilogue(acc, activation):
    if activation == "relu":
        return jnp.maximum(acc, 0.0)
    if activation == "sigmoid":
        return jax.nn.sigmoid(acc)
    return acc


def _mm_kernel(x_ref, w_ref, b_ref, o_ref, *, activation):
    # bf16 MXU inputs, f32 accumulation; epilogue stays in f32 (v5e-friendly).
    acc = jnp.dot(x_ref[...].astype(jnp.bfloat16), w_ref[...],
                  preferred_element_type=jnp.float32)
    acc = acc + b_ref[...]
    o_ref[...] = _epilogue(acc, activation).astype(o_ref.dtype)


def _ln_mm_kernel(x_ref, g_ref, bt_ref, w_ref, b_ref, o_ref, *, activation, eps):
    # Fused LayerNorm (f32) -> bf16 matmul -> bias -> activation.
    x = x_ref[...]
    mu = jnp.mean(x, axis=-1, keepdims=True)
    var = jnp.mean(jnp.square(x - mu), axis=-1, keepdims=True)
    xn = (x - mu) * jax.lax.rsqrt(var + eps) * g_ref[...] + bt_ref[...]
    acc = jnp.dot(xn.astype(jnp.bfloat16), w_ref[...],
                  preferred_element_type=jnp.float32)
    acc = acc + b_ref[...]
    o_ref[...] = _epilogue(acc, activation).astype(o_ref.dtype)


def _res_front_kernel(x_ref, w1_ref, b1_ref, wa_ref, ba_ref, h_ref, a_ref):
    # ResBlock front: both 1x1 convs on the same input tile in one kernel.
    x = x_ref[...].astype(jnp.bfloat16)
    h = jnp.dot(x, w1_ref[...], preferred_element_type=jnp.float32) + b1_ref[...]
    h_ref[...] = jnp.maximum(h, 0.0)
    a = jnp.dot(x, wa_ref[...], preferred_element_type=jnp.float32) + ba_ref[...]
    a_ref[...] = jax.nn.sigmoid(a)


def _res_back_kernel(p_ref, w2_ref, b2_ref, x_ref, a_ref, o_ref):
    # ResBlock back: im2col matmul (conv2) + gated residual, fused.
    acc = jnp.dot(p_ref[...].astype(jnp.bfloat16), w2_ref[...],
                  preferred_element_type=jnp.float32) + b2_ref[...]
    o_ref[...] = x_ref[...] * a_ref[...] + jnp.maximum(acc, 0.0)


def _attn_kernel(q_ref, k_ref, v_ref, o_ref, *, scale):
    # One grid step = one batch element, all heads (batched over the head axis).
    q = q_ref[0].astype(jnp.bfloat16)          # [H, S, Dh]
    k = k_ref[0].astype(jnp.bfloat16)
    v = v_ref[0].astype(jnp.bfloat16)
    s = jnp.einsum("hqd,hkd->hqk", q, k, preferred_element_type=jnp.float32) * scale
    s = s - jnp.max(s, axis=-1, keepdims=True)
    p = jnp.exp(s)
    p = p * pl.reciprocal(jnp.sum(p, axis=-1, keepdims=True), approx=True)
    o_ref[0] = jnp.einsum("hqk,hkd->hqd", p.astype(jnp.bfloat16), v,
                          preferred_element_type=jnp.float32).astype(o_ref.dtype)


# ----------------------------------------------------------------------------- wrappers

def _m_tiling(M, cap=256):
    """Single full-M block when small, cap-row tiles (padded) otherwise."""
    if M <= cap:
        return M, M
    Mp = ((M + cap - 1) // cap) * cap
    return cap, Mp


def matmul_bias(x, p, activation=None, ln=None, eps=1e-5):
    """y = act(LN?(x) @ W + b).  x: [M, K] f32; p: dict(w=[K, Np] bf16, b=[1, Np] f32, n=N)."""
    M, K = x.shape
    wp, bp, N = p["w"], p["b"], p["n"]
    Np = wp.shape[1]

    TM, Mp = _m_tiling(M)
    if Mp != M:
        x = jnp.pad(x, ((0, Mp - M), (0, 0)))

    # N tiling: one lane-dense full-N block when small; 256/128-wide tiles otherwise.
    if Np <= 512:
        TN = Np
    elif Np % 256 == 0:
        TN = 256
    else:
        TN = 128

    grid = (Mp // TM, Np // TN)
    if ln is None:
        kernel = partial(_mm_kernel, activation=activation)
        in_specs = [
            pl.BlockSpec((TM, K), lambda i, j: (i, 0)),
            pl.BlockSpec((K, TN), lambda i, j: (0, j)),
            pl.BlockSpec((1, TN), lambda i, j: (0, j)),
        ]
        args = (x, wp, bp)
    else:
        gamma, beta = ln
        kernel = partial(_ln_mm_kernel, activation=activation, eps=eps)
        in_specs = [
            pl.BlockSpec((TM, K), lambda i, j: (i, 0)),
            pl.BlockSpec((1, K), lambda i, j: (0, 0)),
            pl.BlockSpec((1, K), lambda i, j: (0, 0)),
            pl.BlockSpec((K, TN), lambda i, j: (0, j)),
            pl.BlockSpec((1, TN), lambda i, j: (0, j)),
        ]
        args = (x, gamma.reshape(1, K), beta.reshape(1, K), wp, bp)

    out = pl.pallas_call(
        kernel,
        out_shape=jax.ShapeDtypeStruct((Mp, Np), jnp.float32),
        grid=grid,
        in_specs=in_specs,
        out_specs=pl.BlockSpec((TM, TN), lambda i, j: (i, j)),
        compiler_params=pltpu.CompilerParams(
            dimension_semantics=("parallel", "parallel")),
    )(*args)
    if Mp != M or Np != N:
        out = out[:M, :N]
    return out


def linear(x, p, activation=None, ln=None):
    """x: [..., K] -> [..., N] via the Pallas matmul kernel."""
    shp = x.shape
    y = matmul_bias(x.reshape(-1, shp[-1]), p, activation=activation, ln=ln)
    return y.reshape(*shp[:-1], p["n"])


def res_front(x2, lyr):
    """x2: [M, C] -> (relu(x@W1+b1) [M, C//2], sigmoid(x@Wa+ba) [M, C]) in one call."""
    M, C = x2.shape
    C1 = lyr["w1"].shape[1]
    TM, Mp = _m_tiling(M)
    if Mp != M:
        x2 = jnp.pad(x2, ((0, Mp - M), (0, 0)))
    h, a = pl.pallas_call(
        _res_front_kernel,
        out_shape=(jax.ShapeDtypeStruct((Mp, C1), jnp.float32),
                   jax.ShapeDtypeStruct((Mp, C), jnp.float32)),
        grid=(Mp // TM,),
        in_specs=[
            pl.BlockSpec((TM, C), lambda i: (i, 0)),
            pl.BlockSpec((C, C1), lambda i: (0, 0)),
            pl.BlockSpec((1, C1), lambda i: (0, 0)),
            pl.BlockSpec((C, C), lambda i: (0, 0)),
            pl.BlockSpec((1, C), lambda i: (0, 0)),
        ],
        out_specs=(pl.BlockSpec((TM, C1), lambda i: (i, 0)),
                   pl.BlockSpec((TM, C), lambda i: (i, 0))),
        compiler_params=pltpu.CompilerParams(dimension_semantics=("parallel",)),
    )(x2, lyr["w1"], lyr["b1"], lyr["wa"], lyr["ba"])
    if Mp != M:
        h, a = h[:M], a[:M]
    return h, a


def res_back(patches, x2, a, lyr):
    """out = x*a + relu(patches @ W2 + b2).  All [M, *]."""
    M, K2 = patches.shape
    C = x2.shape[1]
    TM, Mp = _m_tiling(M)
    if Mp != M:
        patches = jnp.pad(patches, ((0, Mp - M), (0, 0)))
        x2 = jnp.pad(x2, ((0, Mp - M), (0, 0)))
        a = jnp.pad(a, ((0, Mp - M), (0, 0)))
    out = pl.pallas_call(
        _res_back_kernel,
        out_shape=jax.ShapeDtypeStruct((Mp, C), jnp.float32),
        grid=(Mp // TM,),
        in_specs=[
            pl.BlockSpec((TM, K2), lambda i: (i, 0)),
            pl.BlockSpec((K2, C), lambda i: (0, 0)),
            pl.BlockSpec((1, C), lambda i: (0, 0)),
            pl.BlockSpec((TM, C), lambda i: (i, 0)),
            pl.BlockSpec((TM, C), lambda i: (i, 0)),
        ],
        out_specs=pl.BlockSpec((TM, C), lambda i: (i, 0)),
        compiler_params=pltpu.CompilerParams(dimension_semantics=("parallel",)),
    )(patches, lyr["w2"], lyr["b2"], x2, a)
    return out[:M] if Mp != M else out


def _im2col(x, k, stride, pad, dilation):
    """x: [B, L, C] channels-last -> patches [B*L_out, k*C], L_out."""
    B, L, C = x.shape
    xp = jnp.pad(x, ((0, 0), (pad, pad), (0, 0)))
    L_out = (L + 2 * pad - dilation * (k - 1) - 1) // stride + 1
    idx = jnp.arange(L_out)[:, None] * stride + jnp.arange(k)[None, :] * dilation
    return xp[:, idx, :].reshape(B * L_out, k * C), L_out


def res_block_forward(x, lyr):
    """ResBlock_1d_with_Attention (eval): x*sigmoid(atten(x)) + relu(conv2(relu(conv1(x))))."""
    B, L, C = x.shape
    x2 = x.reshape(B * L, C)
    h1, a = res_front(x2, lyr)                                     # [M, C//2], [M, C]
    patches, L_out = _im2col(h1.reshape(B, L, C // 2),
                             lyr["k"], lyr["s"], lyr["pad"], lyr["d"])
    assert L_out == L, "res block conv2 must preserve the spatial length"
    out = res_back(patches, x2, a, lyr)                            # [M, C]
    return out.reshape(B, L, C)


def conv1d_cl(x, p, stride=1, padding=0, dilation=1, activation=None):
    """Channels-last Conv1d.  x: [B, L, C_in]; p from make_conv_mm.  -> [B, L_out, C_out]."""
    B, L, C_in = x.shape
    Kk = p["ksize"]
    if Kk == 1 and stride == 1 and padding == 0:
        y = matmul_bias(x.reshape(B * L, C_in), p, activation=activation)
        return y.reshape(B, L, p["n"])
    patches, L_out = _im2col(x, Kk, stride, padding, dilation)
    y = matmul_bias(patches, p, activation=activation)
    return y.reshape(B, L_out, p["n"])


def reduce_dim_conv_fwd(x, p):
    """Conv2d(seq, seq, kernel=(2,1)) + squeeze(-2).  x: [B, seq, 2, T] -> channels-last [B, T, seq]."""
    B, C, H, T = x.shape
    x2 = x.transpose(0, 3, 1, 2).reshape(B * T, C * H)
    y = matmul_bias(x2, p)
    return y.reshape(B, T, C)


def fused_attention(q, k, v):
    """q,k,v: [B, H, S, Dh] -> softmax(q k^T / sqrt(Dh)) v, one grid step per batch."""
    B, H, S, Dh = q.shape
    scale = 1.0 / math.sqrt(Dh)
    return pl.pallas_call(
        partial(_attn_kernel, scale=scale),
        out_shape=jax.ShapeDtypeStruct((B, H, S, Dh), jnp.float32),
        grid=(B,),
        in_specs=[pl.BlockSpec((1, H, S, Dh), lambda b: (b, 0, 0, 0))] * 3,
        out_specs=pl.BlockSpec((1, H, S, Dh), lambda b: (b, 0, 0, 0)),
        compiler_params=pltpu.CompilerParams(dimension_semantics=("parallel",)),
    )(q, k, v)


# ----------------------------------------------------------------------------- param init

def calculate_conv1d_padding(stride, kernel_size, d_in, d_out, dilation=1):
    padding = math.ceil((stride * (d_out - 1) - d_in + dilation * (kernel_size - 1) + 1) / 2)
    assert padding >= 0, "Padding value must be greater than or equal to 0."
    return padding


class KeyGen:
    def __init__(self, key):
        self.key = key

    def __call__(self):
        self.key, k = jax.random.split(self.key)
        return k


def xavier_normal(key, shape, fan_in, fan_out):
    std = math.sqrt(2.0 / (fan_in + fan_out))
    return std * jax.random.normal(key, shape, dtype=jnp.float32)


def init_linear(kg, d_in, d_out):
    w = xavier_normal(kg(), (d_in, d_out), d_in, d_out)            # stored as [in, out]
    b = 0.01 * jax.random.normal(kg(), (d_out,), dtype=jnp.float32)
    return w, b


def init_conv1d(kg, c_out, c_in, k):
    w = xavier_normal(kg(), (c_out, c_in, k), c_in * k, c_out * k)
    b = 0.01 * jax.random.normal(kg(), (c_out,), dtype=jnp.float32)
    return w, b


def fold_bn(w, b, eps=1e-5):
    # Fresh BatchNorm1d, eval mode: gamma=1, beta=0, running_mean=0, running_var=1.
    scale = 1.0 / math.sqrt(1.0 + eps)
    return w * scale, b * scale


def make_mm(w, b):
    """[K, N] f32 weight + [N] bias -> bf16 weight / f32 bias, pre-built once.
    N is padded to a lane multiple only when it is large and needs N-tiling."""
    K, N = w.shape
    if N % 128 == 0 or N <= 512:
        Np = N
    else:
        Np = ((N + 127) // 128) * 128
    wp = (jnp.pad(w, ((0, 0), (0, Np - N))) if Np != N else w).astype(jnp.bfloat16)
    bp = (jnp.pad(b, (0, Np - N)) if Np != N else b).reshape(1, Np).astype(jnp.float32)
    return dict(w=wp, b=bp, n=N)


def conv_weight_to_mat(w):
    """PyTorch conv weight [C_out, C_in, K] -> channels-last im2col matrix [K*C_in, C_out]."""
    C_out, C_in, Kk = w.shape
    return jnp.transpose(w, (2, 1, 0)).reshape(Kk * C_in, C_out)


def make_conv_mm(w, b):
    p = make_mm(conv_weight_to_mat(w), b)
    p["ksize"] = w.shape[2]
    return p


def make_res_block(kg, channel, k, s, pad, d):
    w1, b1 = fold_bn(*init_conv1d(kg, channel // 2, channel, 1))
    w2, b2 = fold_bn(*init_conv1d(kg, channel, channel // 2, k))
    wa, ba = init_conv1d(kg, channel, channel, 1)
    return dict(
        kind="res",
        w1=conv_weight_to_mat(w1).astype(jnp.bfloat16), b1=b1.reshape(1, -1),
        w2=conv_weight_to_mat(w2).astype(jnp.bfloat16), b2=b2.reshape(1, -1),
        wa=conv_weight_to_mat(wa).astype(jnp.bfloat16), ba=ba.reshape(1, -1),
        k=k, s=s, pad=pad, d=d)


RES_PARAMS = list(zip([4, 4, 8, 8, 6], [5, 7, 9, 9, 11], [3, 3, 5, 3, 3], [1, 3, 5, 3, 3]))
CUM_BLOCKS = (np.cumsum([4, 4, 8, 8, 6]) + np.arange(5)).tolist()


def build_conv1d_encoder_params(kg, cfg):
    channel = cfg["T2F_encoder_sequence_length"]
    temp = cfg["T2F_encoder_embed_dim"]
    embed = cfg["T2F_encoder_embed_dim"]
    feat = cfg["feature_dim"]
    steps = cfg["diffusion_num_steps"]
    layers, step_tables = [], []
    ctx_ws, ctx_bs, ctx_sizes = [], [], []
    for i, (nb, k, s, d) in enumerate(RES_PARAMS):
        pad = calculate_conv1d_padding(s, k, temp, temp, d)
        for _ in range(nb):
            layers.append(make_res_block(kg, channel, k, s, pad, d))
        step_tables.append(xavier_normal(kg(), (steps, temp), steps, temp))
        cw, cb = init_linear(kg, feat, temp)
        ctx_ws.append(cw); ctx_bs.append(cb); ctx_sizes.append(temp)
        if i != len(RES_PARAMS) - 1:
            pad2 = calculate_conv1d_padding(s, k, temp, temp // 2, d)
            layers.append(dict(
                kind="down",
                dw=make_conv_mm(*fold_bn(*init_conv1d(kg, channel * 2, channel, k))),
                s=s, pad=pad2, d=d))
            channel *= 2
            temp //= 2
    back = make_conv_mm(*init_conv1d(kg, cfg["T2F_encoder_sequence_length"], channel, 1))
    # Five per-stage context projections fused into one lane-dense matmul.
    ctx_cat = make_mm(jnp.concatenate(ctx_ws, axis=1), jnp.concatenate(ctx_bs))
    # ConcatSquashLinear: gate + hyper_bias fused along N (share ctx input, hyper_bias has no bias).
    lw, lb = init_linear(kg, temp, embed)
    gw, gb = init_linear(kg, feat + 3, embed)
    hw = xavier_normal(kg(), (feat + 3, embed), feat + 3, embed)
    gate_hb = make_mm(jnp.concatenate([gw, hw], axis=1),
                      jnp.concatenate([gb, jnp.zeros((embed,), jnp.float32)]))
    csl = dict(layer=make_mm(lw, lb), gate_hb=gate_hb, embed_dim=embed)
    return dict(layers=layers, step=step_tables, ctx_cat=ctx_cat, ctx_sizes=ctx_sizes,
                back=back, csl=csl)


def build_transformer_params(kg, num_layers, d_model, nhead, dff):
    layers = []
    for _ in range(num_layers):
        layers.append(dict(
            norm1=(jnp.ones((d_model,), jnp.float32), jnp.zeros((d_model,), jnp.float32)),
            qkv=make_mm(*init_linear(kg, d_model, 3 * d_model)),
            out=make_mm(*init_linear(kg, d_model, d_model)),
            norm2=(jnp.ones((d_model,), jnp.float32), jnp.zeros((d_model,), jnp.float32)),
            ff1=make_mm(*init_linear(kg, d_model, dff)),
            ff2=make_mm(*init_linear(kg, dff, d_model)),
        ))
    final = (jnp.ones((d_model,), jnp.float32), jnp.zeros((d_model,), jnp.float32))
    return dict(layers=layers, final=final, nhead=nhead)


def build_transformer_linear_params(kg, cfg, point_dim, context_dim, tf_layer, seq_len, d_up, dff):
    rw = xavier_normal(kg(), (seq_len, seq_len, 2, 1), seq_len * 2, seq_len * 2)
    rb = 0.01 * jax.random.normal(kg(), (seq_len,), dtype=jnp.float32)
    rmat = jnp.transpose(rw[:, :, :, 0], (1, 2, 0)).reshape(seq_len * 2, seq_len)
    return dict(
        reduce=make_mm(rmat, rb),
        enc=build_conv1d_encoder_params(kg, cfg),
        y_up=make_mm(*init_linear(kg, point_dim, d_up)),
        ctx_up=make_mm(*init_linear(kg, context_dim + 3, d_up)),
        tf=build_transformer_params(kg, tf_layer, d_up, 8, dff),
        lin=make_mm(*init_linear(kg, d_up, point_dim)),
    )


# ----------------------------------------------------------------------------- forward passes

def conv1d_encoder_forward(params, x, context, t, beta):
    """x: channels-last [B, T(embed), C(seq)].  Returns [B, seq, embed]."""
    # TODO(synk): int(t) keeps t a static Python value (retrace per timestep), matching the
    # original's torch.tensor(t) embedding lookup semantics.
    t_idx = int(t) - 1
    step_embeds = [tbl[t_idx] for tbl in params["step"]]
    ctx_all = linear(context, params["ctx_cat"])                   # one fused matmul, 5 outputs
    offs = np.cumsum(params["ctx_sizes"])[:-1].tolist()
    ctx_embeds = jnp.split(ctx_all, offs, axis=-1)
    idx = 0
    for i, lyr in enumerate(params["layers"]):
        e = step_embeds[idx][None, :] + ctx_embeds[idx]            # [B, temp_i]
        x = x + e[:, :, None]                                      # broadcast over channels
        if lyr["kind"] == "res":
            x = res_block_forward(x, lyr)                          # DropPath: identity (eval)
        else:
            x = conv1d_cl(x, lyr["dw"], lyr["s"], lyr["pad"], lyr["d"], activation="relu")
        if i == CUM_BLOCKS[idx]:
            idx += 1
    x = conv1d_cl(x, params["back"])                               # [B, temp_final, seq]
    x = x.transpose(0, 2, 1)                                       # [B, seq, temp_final]
    csl = params["csl"]
    time_emb = jnp.stack([beta, jnp.sin(beta), jnp.cos(beta)], axis=1)       # [B, 3]
    ctx_vec = jnp.concatenate([time_emb, context], axis=-1)                  # [B, feat+3]
    gh = linear(ctx_vec, csl["gate_hb"])                                     # [B, 2*embed]
    E = csl["embed_dim"]
    gate = jax.nn.sigmoid(gh[:, :E])[:, None, :]
    hbias = gh[:, E:][:, None, :]
    y = linear(x, csl["layer"])                                              # [B, seq, embed]
    return y * gate + hbias


def position_embedding_sine(S, num_pos_feats, temperature=10000.0, normalize=True):
    # TODO(synk): PositionEmbeddingSine source not provided; standard 1-D DETR-style sine
    # embedding with 2*num_pos_feats channels assumed (matches the required broadcast dim).
    pos = jnp.arange(1, S + 1, dtype=jnp.float32)
    if normalize:
        pos = pos / (pos[-1] + 1e-6) * (2.0 * math.pi)
    i = jnp.arange(num_pos_feats, dtype=jnp.float32)
    dim_t = temperature ** (2.0 * jnp.floor(i / 2.0) / num_pos_feats)
    ang = pos[:, None] / dim_t[None, :]
    return jnp.concatenate([jnp.sin(ang), jnp.cos(ang)], axis=-1)[None]      # [1, S, 2*npf]


def transformer_encoder_forward(params, x):
    """Pre-norm transformer encoder on [B, S, D]; the final LN is fused into the following
    output linear by the caller.  (Transformer_Encoder source not provided; standard
    normalize_before=True encoder with per-layer self-attention + MLP assumed.)"""
    B, S, D = x.shape
    H = params["nhead"]
    Dh = D // H
    src = x
    for lyr in params["layers"]:
        qkv = linear(src, lyr["qkv"], ln=lyr["norm1"])             # fused LN -> qkv
        qkv = qkv.reshape(B, S, 3, H, Dh)
        q = qkv[:, :, 0].transpose(0, 2, 1, 3)                     # [B, H, S, Dh]
        k = qkv[:, :, 1].transpose(0, 2, 1, 3)
        v = qkv[:, :, 2].transpose(0, 2, 1, 3)
        attn = fused_attention(q, k, v)                            # [B, H, S, Dh]
        attn = attn.transpose(0, 2, 1, 3).reshape(B, S, D)
        src = src + linear(attn, lyr["out"])                       # dropout: identity (eval)
        ff = linear(src, lyr["ff1"], activation="relu", ln=lyr["norm2"])   # fused LN -> ff1
        src = src + linear(ff, lyr["ff2"])
    return src


def transformer_linear_forward(params, x, beta, context, t, context_dim):
    B = x.shape[0]
    h = reduce_dim_conv_fwd(x, params["reduce"])                   # [B, point_dim, seq] (cl)
    # TODO(synk): reference calls conv_1d_encoder(x, context, t) without beta (would raise
    # TypeError in PyTorch); beta is passed through since Conv1d_encoder.forward requires it.
    h = conv1d_encoder_forward(params["enc"], h, context, t, beta)           # [B, seq, point_dim]
    beta_r = beta.reshape(B, 1, 1)
    ctx_r = context.reshape(B, 1, -1)
    time_emb = jnp.concatenate([beta_r, jnp.sin(beta_r), jnp.cos(beta_r)], axis=-1)
    ctx_emb = jnp.concatenate([time_emb, ctx_r], axis=-1)          # [B, 1, feat+3]
    ctx_emb = linear(ctx_emb, params["ctx_up"])                    # [B, 1, D_UP]
    emb = linear(h, params["y_up"])                                # [B, seq, D_UP]
    final_emb = jnp.concatenate([ctx_emb, emb], axis=1)            # [B, 1+seq, D_UP]
    final_emb = final_emb + position_embedding_sine(final_emb.shape[1], context_dim)
    src = transformer_encoder_forward(params["tf"], final_emb)     # [B, 1+seq, D_UP]
    body = src[:, 1:, :]                                           # drop the ctx token (trans[1:])
    out = linear(body, params["lin"], ln=params["tf"]["final"])    # fused final LN -> linear
    return out.transpose(1, 0, 2)                                  # [seq, B, point_dim]


# ----------------------------------------------------------------------------- main

if __name__ == "__main__":
    B = 2
    seq_len = 4                    # == cfg['T2F_encoder_sequence_length']
    point_dim = 32                 # == cfg['T2F_encoder_embed_dim'] (divisible by 16)
    context_dim = 64               # == cfg['feature_dim']; d_model = 2*context_dim
    d_up = 2 * context_dim         # scaled-down stand-in for the hard-coded 2048
    dff = 256                      # scaled-down dim_feedforward
    tf_layer = 4
    t = 3
    cfg = dict(T2F_encoder_sequence_length=seq_len,
               T2F_encoder_embed_dim=point_dim,
               diffusion_num_steps=10,
               feature_dim=context_dim)

    kg = KeyGen(jax.random.PRNGKey(0))
    params = build_transformer_linear_params(kg, cfg, point_dim, context_dim, tf_layer,
                                             seq_len, d_up, dff)

    kx, kb, kc = jax.random.split(jax.random.PRNGKey(0), 3)
    x = jax.random.normal(kx, (B, seq_len, 2, point_dim), dtype=jnp.float32)
    beta = jax.random.uniform(kb, (B,), dtype=jnp.float32, minval=0.01, maxval=1.0)
    context = jax.random.normal(kc, (B, context_dim), dtype=jnp.float32)

    fwd = jax.jit(lambda xx, bb, cc: transformer_linear_forward(params, xx, bb, cc, t, context_dim))
    out = jax.block_until_ready(fwd(x, beta, context))
    assert out.shape == (seq_len, B, point_dim), out.shape
    assert bool(jnp.all(jnp.isfinite(out)))
    print("KERNEL_OK")
</pallas_src>

<mosaic_0001>
module attributes {stable_mosaic.version = 11 : i64} {
  func.func @_mm_kernel(%arg0: i32, %arg1: i32, %arg2: memref<2x64xf32, #tpu.memory_space<vmem>>, %arg3: memref<64x62xbf16, #tpu.memory_space<vmem>>, %arg4: memref<1x62xf32, #tpu.memory_space<vmem>>, %arg5: memref<2x62xf32, #tpu.memory_space<vmem>>) attributes {dimension_semantics = [#tpu.dimension_semantics<parallel>, #tpu.dimension_semantics<parallel>], iteration_bounds = array<i64: 1, 1>, scalar_prefetch = 0 : i64, scratch_operands = 0 : i64, tpu.core_type = #tpu.core_type<tc>, window_params = [{transform_indices = @transform_0, window_bounds = array<i64: 2, 64>}, {transform_indices = @transform_1, window_bounds = array<i64: 64, 62>}, {transform_indices = @transform_2, window_bounds = array<i64: 1, 62>}, {transform_indices = @transform_3, window_bounds = array<i64: 2, 62>}]} {
    %c0 = arith.constant 0 : index
    %c0_0 = arith.constant 0 : index
    %0 = vector.load %arg2[%c0, %c0_0] : memref<2x64xf32, #tpu.memory_space<vmem>>, vector<2x64xf32>
    %1 = arith.truncf %0 : vector<2x64xf32> to vector<2x64xbf16>
    %c0_1 = arith.constant 0 : index
    %c0_2 = arith.constant 0 : index
    %2 = vector.load %arg3[%c0_1, %c0_2] : memref<64x62xbf16, #tpu.memory_space<vmem>>, vector<64x62xbf16>
    %cst = arith.constant dense<0.000000e+00> : vector<2x62xf32>
    %3 = tpu.matmul %1, %2, %cst {dimension_numbers = #tpu.dot_dimension_numbers<[1], [0], [0], [1], [0, 0, 1, 1], [], []>} : vector<2x64xbf16>, vector<64x62xbf16>, vector<2x62xf32> -> vector<2x62xf32>
    %c0_3 = arith.constant 0 : index
    %c0_4 = arith.constant 0 : index
    %4 = vector.load %arg4[%c0_3, %c0_4] : memref<1x62xf32, #tpu.memory_space<vmem>>, vector<1x62xf32>
    %5 = vector.broadcast %4 : vector<1x62xf32> to vector<2x62xf32>
    %6 = arith.addf %3, %5 : vector<2x62xf32>
    %c0_5 = arith.constant 0 : index
    %c0_6 = arith.constant 0 : index
    %7 = vector.load %arg5[%c0_5, %c0_6] : memref<2x62xf32, #tpu.memory_space<vmem>>, vector<2x62xf32>
    tpu.vector_store %arg5[%c0_5, %c0_6], %6 {strides = array<i32>} : memref<2x62xf32, #tpu.memory_space<vmem>>, vector<2x62xf32>,
    return
  }
  func.func @transform_0(%arg0: i32, %arg1: i32) -> (i32, i32) {
    %c0_i32 = arith.constant 0 : i32
    %c0_i32_0 = arith.constant 0 : i32
    return %arg0, %c0_i32 : i32, i32
  }
  func.func @transform_1(%arg0: i32, %arg1: i32) -> (i32, i32) {
    %c0_i32 = arith.constant 0 : i32
    %c0_i32_0 = arith.constant 0 : i32
    return %c0_i32, %arg1 : i32, i32
  }
  func.func @transform_2(%arg0: i32, %arg1: i32) -> (i32, i32) {
    %c0_i32 = arith.constant 0 : i32
    %c0_i32_0 = arith.constant 0 : i32
    return %c0_i32, %arg1 : i32, i32
  }
  func.func @transform_3(%arg0: i32, %arg1: i32) -> (i32, i32) {
    %c0_i32 = arith.constant 0 : i32
    return %arg0, %arg1 : i32, i32
  }
}

module attributes {stable_mosaic.version = 11 : i64} {
  func.func @_mm_kernel(%arg0: i32, %arg1: i32, %arg2: memref<64x8xf32, #tpu.memory_space<vmem>>, %arg3: memref<8x4xbf16, #tpu.memory_space<vmem>>, %arg4: memref<1x4xf32, #tpu.memory_space<vmem>>, %arg5: memref<64x4xf32, #tpu.memory_space<vmem>>) attributes {dimension_semantics = [#tpu.dimension_semantics<parallel>, #tpu.dimension_semantics<parallel>], iteration_bounds = array<i64: 1, 1>, scalar_prefetch = 0 : i64, scratch_operands = 0 : i64, tpu.core_type = #tpu.core_type<tc>, window_params = [{transform_indices = @transform_0, window_bounds = array<i64: 64, 8>}, {transform_indices = @transform_1, window_bounds = array<i64: 8, 4>}, {transform_indices = @transform_2, window_bounds = array<i64: 1, 4>}, {transform_indices = @transform_3, window_bounds = array<i64: 64, 4>}]} {
    %c0 = arith.constant 0 : index
    %c0_0 = arith.constant 0 : index
    %0 = vector.load %arg2[%c0, %c0_0] : memref<64x8xf32, #tpu.memory_space<vmem>>, vector<64x8xf32>
    %1 = arith.truncf %0 : vector<64x8xf32> to vector<64x8xbf16>
    %c0_1 = arith.constant 0 : index
    %c0_2 = arith.constant 0 : index
    %2 = vector.load %arg3[%c0_1, %c0_2] : memref<8x4xbf16, #tpu.memory_space<vmem>>, vector<8x4xbf16>
    %cst = arith.constant dense<0.000000e+00> : vector<64x4xf32>
    %3 = tpu.matmul %1, %2, %cst {dimension_numbers = #tpu.dot_dimension_numbers<[1], [0], [0], [1], [0, 0, 1, 1], [], []>} : vector<64x8xbf16>, vector<8x4xbf16>, vector<64x4xf32> -> vector<64x4xf32>
    %c0_3 = arith.constant 0 : index
    %c0_4 = arith.constant 0 : index
    %4 = vector.load %arg4[%c0_3, %c0_4] : memref<1x4xf32, #tpu.memory_space<vmem>>, vector<1x4xf32>
    %5 = vector.broadcast %4 : vector<1x4xf32> to vector<64x4xf32>
    %6 = arith.addf %3, %5 : vector<64x4xf32>
    %c0_5 = arith.constant 0 : index
    %c0_6 = arith.constant 0 : index
    %7 = vector.load %arg5[%c0_5, %c0_6] : memref<64x4xf32, #tpu.memory_space<vmem>>, vector<64x4xf32>
    tpu.vector_store %arg5[%c0_5, %c0_6], %6 {strides = array<i32>} : memref<64x4xf32, #tpu.memory_space<vmem>>, vector<64x4xf32>,
    return
  }
  func.func @transform_0(%arg0: i32, %arg1: i32) -> (i32, i32) {
    %c0_i32 = arith.constant 0 : i32
    %c0_i32_0 = arith.constant 0 : i32
    return %arg0, %c0_i32 : i32, i32
  }
  func.func @transform_1(%arg0: i32, %arg1: i32) -> (i32, i32) {
    %c0_i32 = arith.constant 0 : i32
    %c0_i32_0 = arith.constant 0 : i32
    return %c0_i32, %arg1 : i32, i32
  }
  func.func @transform_2(%arg0: i32, %arg1: i32) -> (i32, i32) {
    %c0_i32 = arith.constant 0 : i32
    %c0_i32_0 = arith.constant 0 : i32
    return %c0_i32, %arg1 : i32, i32
  }
  func.func @transform_3(%arg0: i32, %arg1: i32) -> (i32, i32) {
    %c0_i32 = arith.constant 0 : i32
    return %arg0, %arg1 : i32, i32
  }
}

module attributes {stable_mosaic.version = 11 : i64} {
  func.func @_res_front_kernel(%arg0: i32, %arg1: memref<64x4xf32, #tpu.memory_space<vmem>>, %arg2: memref<4x2xbf16, #tpu.memory_space<vmem>>, %arg3: memref<1x2xf32, #tpu.memory_space<vmem>>, %arg4: memref<4x4xbf16, #tpu.memory_space<vmem>>, %arg5: memref<1x4xf32, #tpu.memory_space<vmem>>, %arg6: memref<64x2xf32, #tpu.memory_space<vmem>>, %arg7: memref<64x4xf32, #tpu.memory_space<vmem>>) attributes {dimension_semantics = [#tpu.dimension_semantics<parallel>], iteration_bounds = array<i64: 1>, scalar_prefetch = 0 : i64, scratch_operands = 0 : i64, tpu.core_type = #tpu.core_type<tc>, window_params = [{transform_indices = @transform_0, window_bounds = array<i64: 64, 4>}, {pipeline_mode = #tpu.pipeline_mode<synchronous>, transform_indices = @transform_1, window_bounds = array<i64: 4, 2>}, {pipeline_mode = #tpu.pipeline_mode<synchronous>, transform_indices = @transform_2, window_bounds = array<i64: 1, 2>}, {pipeline_mode = #tpu.pipeline_mode<synchronous>, transform_indices = @transform_3, window_bounds = array<i64: 4, 4>}, {pipeline_mode = #tpu.pipeline_mode<synchronous>, transform_indices = @transform_4, window_bounds = array<i64: 1, 4>}, {transform_indices = @transform_5, window_bounds = array<i64: 64, 2>}, {transform_indices = @transform_6, window_bounds = array<i64: 64, 4>}]} {
    %c0 = arith.constant 0 : index
    %c0_0 = arith.constant 0 : index
    %0 = vector.load %arg1[%c0, %c0_0] : memref<64x4xf32, #tpu.memory_space<vmem>>, vector<64x4xf32>
    %1 = arith.truncf %0 : vector<64x4xf32> to vector<64x4xbf16>
    %c0_1 = arith.constant 0 : index
    %c0_2 = arith.constant 0 : index
    %2 = vector.load %arg2[%c0_1, %c0_2] : memref<4x2xbf16, #tpu.memory_space<vmem>>, vector<4x2xbf16>
    %cst = arith.constant dense<0.000000e+00> : vector<64x2xf32>
    %3 = tpu.matmul %1, %2, %cst {dimension_numbers = #tpu.dot_dimension_numbers<[1], [0], [0], [1], [0, 0, 1, 1], [], []>} : vector<64x4xbf16>, vector<4x2xbf16>, vector<64x2xf32> -> vector<64x2xf32>
    %c0_3 = arith.constant 0 : index
    %c0_4 = arith.constant 0 : index
    %4 = vector.load %arg3[%c0_3, %c0_4] : memref<1x2xf32, #tpu.memory_space<vmem>>, vector<1x2xf32>
    %5 = vector.broadcast %4 : vector<1x2xf32> to vector<64x2xf32>
    %6 = arith.addf %3, %5 : vector<64x2xf32>
    %cst_5 = arith.constant 0.000000e+00 : f32
    %7 = vector.broadcast %cst_5 : f32 to vector<64x2xf32>
    %8 = arith.maximumf %6, %7 : vector<64x2xf32>
    %c0_6 = arith.constant 0 : index
    %c0_7 = arith.constant 0 : index
    %9 = vector.load %arg6[%c0_6, %c0_7] : memref<64x2xf32, #tpu.memory_space<vmem>>, vector<64x2xf32>
    tpu.vector_store %arg6[%c0_6, %c0_7], %8 {strides = array<i32>} : memref<64x2xf32, #tpu.memory_space<vmem>>, vector<64x2xf32>,
    %c0_8 = arith.constant 0 : index
    %c0_9 = arith.constant 0 : index
    %10 = vector.load %arg4[%c0_8, %c0_9] : memref<4x4xbf16, #tpu.memory_space<vmem>>, vector<4x4xbf16>
    %cst_10 = arith.constant dense<0.000000e+00> : vector<64x4xf32>
    %11 = tpu.matmul %1, %10, %cst_10 {dimension_numbers = #tpu.dot_dimension_numbers<[1], [0], [0], [1], [0, 0, 1, 1], [], []>} : vector<64x4xbf16>, vector<4x4xbf16>, vector<64x4xf32> -> vector<64x4xf32>
    %c0_11 = arith.constant 0 : index
    %c0_12 = arith.constant 0 : index
    %12 = vector.load %arg5[%c0_11, %c0_12] : memref<1x4xf32, #tpu.memory_space<vmem>>, vector<1x4xf32>
    %13 = vector.broadcast %12 : vector<1x4xf32> to vector<64x4xf32>
    %14 = arith.addf %11, %13 : vector<64x4xf32>
    %15 = arith.negf %14 : vector<64x4xf32>
    %16 = math.exp %15 : vector<64x4xf32>
    %cst_13 = arith.constant 1.000000e+00 : f32
    %17 = vector.broadcast %cst_13 : f32 to vector<64x4xf32>
    %18 = arith.addf %17, %16 : vector<64x4xf32>
    %19 = arith.divf %17, %18 : vector<64x4xf32>
    %c0_14 = arith.constant 0 : index
    %c0_15 = arith.constant 0 : index
    %20 = vector.load %arg7[%c0_14, %c0_15] : memref<64x4xf32, #tpu.memory_space<vmem>>, vector<64x4xf32>
    tpu.vector_store %arg7[%c0_14, %c0_15], %19 {strides = array<i32>} : memref<64x4xf32, #tpu.memory_space<vmem>>, vector<64x4xf32>,
    return
  }
  func.func @transform_0(%arg0: i32) -> (i32, i32) {
    %c0_i32 = arith.constant 0 : i32
    %c0_i32_0 = arith.constant 0 : i32
    return %arg0, %c0_i32 : i32, i32
  }
  func.func @transform_1(%arg0: i32) -> (i32, i32) {
    %c0_i32 = arith.constant 0 : i32
    %c0_i32_0 = arith.constant 0 : i32
    %c0_i32_1 = arith.constant 0 : i32
    return %c0_i32, %c0_i32_0 : i32, i32
  }
  func.func @transform_2(%arg0: i32) -> (i32, i32) {
    %c0_i32 = arith.constant 0 : i32
    %c0_i32_0 = arith.constant 0 : i32
    %c0_i32_1 = arith.constant 0 : i32
    return %c0_i32, %c0_i32_0 : i32, i32
  }
  func.func @transform_3(%arg0: i32) -> (i32, i32) {
    %c0_i32 = arith.constant 0 : i32
    %c0_i32_0 = arith.constant 0 : i32
    %c0_i32_1 = arith.constant 0 : i32
    return %c0_i32, %c0_i32_0 : i32, i32
  }
  func.func @transform_4(%arg0: i32) -> (i32, i32) {
    %c0_i32 = arith.constant 0 : i32
    %c0_i32_0 = arith.constant 0 : i32
    %c0_i32_1 = arith.constant 0 : i32
    return %c0_i32, %c0_i32_0 : i32, i32
  }
  func.func @transform_5(%arg0: i32) -> (i32, i32) {
    %c0_i32 = arith.constant 0 : i32
    %c0_i32_0 = arith.constant 0 : i32
    return %arg0, %c0_i32 : i32, i32
  }
  func.func @transform_6(%arg0: i32) -> (i32, i32) {
    %c0_i32 = arith.constant 0 : i32
    %c0_i32_0 = arith.constant 0 : i32
    return %arg0, %c0_i32 : i32, i32
  }
}

module attributes {stable_mosaic.version = 11 : i64} {
  func.func @_res_back_kernel(%arg0: i32, %arg1: memref<64x10xf32, #tpu.memory_space<vmem>>, %arg2: memref<10x4xbf16, #tpu.memory_space<vmem>>, %arg3: memref<1x4xf32, #tpu.memory_space<vmem>>, %arg4: memref<64x4xf32, #tpu.memory_space<vmem>>, %arg5: memref<64x4xf32, #tpu.memory_space<vmem>>, %arg6: memref<64x4xf32, #tpu.memory_space<vmem>>) attributes {dimension_semantics = [#tpu.dimension_semantics<parallel>], iteration_bounds = array<i64: 1>, scalar_prefetch = 0 : i64, scratch_operands = 0 : i64, tpu.core_type = #tpu.core_type<tc>, window_params = [{transform_indices = @transform_0, window_bounds = array<i64: 64, 10>}, {pipeline_mode = #tpu.pipeline_mode<synchronous>, transform_indices = @transform_1, window_bounds = array<i64: 10, 4>}, {pipeline_mode = #tpu.pipeline_mode<synchronous>, transform_indices = @transform_2, window_bounds = array<i64: 1, 4>}, {transform_indices = @transform_3, window_bounds = array<i64: 64, 4>}, {transform_indices = @transform_4, window_bounds = array<i64: 64, 4>}, {transform_indices = @transform_5, window_bounds = array<i64: 64, 4>}]} {
    %c0 = arith.constant 0 : index
    %c0_0 = arith.constant 0 : index
    %0 = vector.load %arg1[%c0, %c0_0] : memref<64x10xf32, #tpu.memory_space<vmem>>, vector<64x10xf32>
    %1 = arith.truncf %0 : vector<64x10xf32> to vector<64x10xbf16>
    %c0_1 = arith.constant 0 : index
    %c0_2 = arith.constant 0 : index
    %2 = vector.load %arg2[%c0_1, %c0_2] : memref<10x4xbf16, #tpu.memory_space<vmem>>, vector<10x4xbf16>
    %cst = arith.constant dense<0.000000e+00> : vector<64x4xf32>
    %3 = tpu.matmul %1, %2, %cst {dimension_numbers = #tpu.dot_dimension_numbers<[1], [0], [0], [1], [0, 0, 1, 1], [], []>} : vector<64x10xbf16>, vector<10x4xbf16>, vector<64x4xf32> -> vector<64x4xf32>
    %c0_3 = arith.constant 0 : index
    %c0_4 = arith.constant 0 : index
    %4 = vector.load %arg3[%c0_3, %c0_4] : memref<1x4xf32, #tpu.memory_space<vmem>>, vector<1x4xf32>
    %5 = vector.broadcast %4 : vector<1x4xf32> to vector<64x4xf32>
    %6 = arith.addf %3, %5 : vector<64x4xf32>
    %c0_5 = arith.constant 0 : index
    %c0_6 = arith.constant 0 : index
    %7 = vector.load %arg4[%c0_5, %c0_6] : memref<64x4xf32, #tpu.memory_space<vmem>>, vector<64x4xf32>
    %c0_7 = arith.constant 0 : index
    %c0_8 = arith.constant 0 : index
    %8 = vector.load %arg5[%c0_7, %c0_8] : memref<64x4xf32, #tpu.memory_space<vmem>>, vector<64x4xf32>
    %9 = arith.mulf %7, %8 : vector<64x4xf32>
    %cst_9 = arith.constant 0.000000e+00 : f32
    %10 = vector.broadcast %cst_9 : f32 to vector<64x4xf32>
    %11 = arith.maximumf %6, %10 : vector<64x4xf32>
    %12 = arith.addf %9, %11 : vector<64x4xf32>
    %c0_10 = arith.constant 0 : index
    %c0_11 = arith.constant 0 : index
    %13 = vector.load %arg6[%c0_10, %c0_11] : memref<64x4xf32, #tpu.memory_space<vmem>>, vector<64x4xf32>
    tpu.vector_store %arg6[%c0_10, %c0_11], %12 {strides = array<i32>} : memref<64x4xf32, #tpu.memory_space<vmem>>, vector<64x4xf32>,
    return
  }
  func.func @transform_0(%arg0: i32) -> (i32, i32) {
    %c0_i32 = arith.constant 0 : i32
    %c0_i32_0 = arith.constant 0 : i32
    return %arg0, %c0_i32 : i32, i32
  }
  func.func @transform_1(%arg0: i32) -> (i32, i32) {
    %c0_i32 = arith.constant 0 : i32
    %c0_i32_0 = arith.constant 0 : i32
    %c0_i32_1 = arith.constant 0 : i32
    return %c0_i32, %c0_i32_0 : i32, i32
  }
  func.func @transform_2(%arg0: i32) -> (i32, i32) {
    %c0_i32 = arith.constant 0 : i32
    %c0_i32_0 = arith.constant 0 : i32
    %c0_i32_1 = arith.constant 0 : i32
    return %c0_i32, %c0_i32_0 : i32, i32
  }
  func.func @transform_3(%arg0: i32) -> (i32, i32) {
    %c0_i32 = arith.constant 0 : i32
    %c0_i32_0 = arith.constant 0 : i32
    return %arg0, %c0_i32 : i32, i32
  }
  func.func @transform_4(%arg0: i32) -> (i32, i32) {
    %c0_i32 = arith.constant 0 : i32
    %c0_i32_0 = arith.constant 0 : i32
    return %arg0, %c0_i32 : i32, i32
  }
  func.func @transform_5(%arg0: i32) -> (i32, i32) {
    %c0_i32 = arith.constant 0 : i32
    %c0_i32_0 = arith.constant 0 : i32
    return %arg0, %c0_i32 : i32, i32
  }
}

module attributes {stable_mosaic.version = 11 : i64} {
  func.func @_mm_kernel(%arg0: i32, %arg1: i32, %arg2: memref<32x20xf32, #tpu.memory_space<vmem>>, %arg3: memref<20x8xbf16, #tpu.memory_space<vmem>>, %arg4: memref<1x8xf32, #tpu.memory_space<vmem>>, %arg5: memref<32x8xf32, #tpu.memory_space<vmem>>) attributes {dimension_semantics = [#tpu.dimension_semantics<parallel>, #tpu.dimension_semantics<parallel>], iteration_bounds = array<i64: 1, 1>, scalar_prefetch = 0 : i64, scratch_operands = 0 : i64, tpu.core_type = #tpu.core_type<tc>, window_params = [{transform_indices = @transform_0, window_bounds = array<i64: 32, 20>}, {transform_indices = @transform_1, window_bounds = array<i64: 20, 8>}, {transform_indices = @transform_2, window_bounds = array<i64: 1, 8>}, {transform_indices = @transform_3, window_bounds = array<i64: 32, 8>}]} {
    %c0 = arith.constant 0 : index
    %c0_0 = arith.constant 0 : index
    %0 = vector.load %arg2[%c0, %c0_0] : memref<32x20xf32, #tpu.memory_space<vmem>>, vector<32x20xf32>
    %1 = arith.truncf %0 : vector<32x20xf32> to vector<32x20xbf16>
    %c0_1 = arith.constant 0 : index
    %c0_2 = arith.constant 0 : index
    %2 = vector.load %arg3[%c0_1, %c0_2] : memref<20x8xbf16, #tpu.memory_space<vmem>>, vector<20x8xbf16>
    %cst = arith.constant dense<0.000000e+00> : vector<32x8xf32>
    %3 = tpu.matmul %1, %2, %cst {dimension_numbers = #tpu.dot_dimension_numbers<[1], [0], [0], [1], [0, 0, 1, 1], [], []>} : vector<32x20xbf16>, vector<20x8xbf16>, vector<32x8xf32> -> vector<32x8xf32>
    %c0_3 = arith.constant 0 : index
    %c0_4 = arith.constant 0 : index
    %4 = vector.load %arg4[%c0_3, %c0_4] : memref<1x8xf32, #tpu.memory_space<vmem>>, vector<1x8xf32>
    %5 = vector.broadcast %4 : vector<1x8xf32> to vector<32x8xf32>
    %6 = arith.addf %3, %5 : vector<32x8xf32>
    %cst_5 = arith.constant 0.000000e+00 : f32
    %7 = vector.broadcast %cst_5 : f32 to vector<32x8xf32>
    %8 = arith.maximumf %6, %7 : vector<32x8xf32>
    %c0_6 = arith.constant 0 : index
    %c0_7 = arith.constant 0 : index
    %9 = vector.load %arg5[%c0_6, %c0_7] : memref<32x8xf32, #tpu.memory_space<vmem>>, vector<32x8xf32>
    tpu.vector_store %arg5[%c0_6, %c0_7], %8 {strides = array<i32>} : memref<32x8xf32, #tpu.memory_space<vmem>>, vector<32x8xf32>,
    return
  }
  func.func @transform_0(%arg0: i32, %arg1: i32) -> (i32, i32) {
    %c0_i32 = arith.constant 0 : i32
    %c0_i32_0 = arith.constant 0 : i32
    return %arg0, %c0_i32 : i32, i32
  }
  func.func @transform_1(%arg0: i32, %arg1: i32) -> (i32, i32) {
    %c0_i32 = arith.constant 0 : i32
    %c0_i32_0 = arith.constant 0 : i32
    return %c0_i32, %arg1 : i32, i32
  }
  func.func @transform_2(%arg0: i32, %arg1: i32) -> (i32, i32) {
    %c0_i32 = arith.constant 0 : i32
    %c0_i32_0 = arith.constant 0 : i32
    return %c0_i32, %arg1 : i32, i32
  }
  func.func @transform_3(%arg0: i32, %arg1: i32) -> (i32, i32) {
    %c0_i32 = arith.constant 0 : i32
    return %arg0, %arg1 : i32, i32
  }
}

module attributes {stable_mosaic.version = 11 : i64} {
  func.func @_res_front_kernel(%arg0: i32, %arg1: memref<32x8xf32, #tpu.memory_space<vmem>>, %arg2: memref<8x4xbf16, #tpu.memory_space<vmem>>, %arg3: memref<1x4xf32, #tpu.memory_space<vmem>>, %arg4: memref<8x8xbf16, #tpu.memory_space<vmem>>, %arg5: memref<1x8xf32, #tpu.memory_space<vmem>>, %arg6: memref<32x4xf32, #tpu.memory_space<vmem>>, %arg7: memref<32x8xf32, #tpu.memory_space<vmem>>) attributes {dimension_semantics = [#tpu.dimension_semantics<parallel>], iteration_bounds = array<i64: 1>, scalar_prefetch = 0 : i64, scratch_operands = 0 : i64, tpu.core_type = #tpu.core_type<tc>, window_params = [{transform_indices = @transform_0, window_bounds = array<i64: 32, 8>}, {pipeline_mode = #tpu.pipeline_mode<synchronous>, transform_indices = @transform_1, window_bounds = array<i64: 8, 4>}, {pipeline_mode = #tpu.pipeline_mode<synchronous>, transform_indices = @transform_2, window_bounds = array<i64: 1, 4>}, {pipeline_mode = #tpu.pipeline_mode<synchronous>, transform_indices = @transform_3, window_bounds = array<i64: 8, 8>}, {pipeline_mode = #tpu.pipeline_mode<synchronous>, transform_indices = @transform_4, window_bounds = array<i64: 1, 8>}, {transform_indices = @transform_5, window_bounds = array<i64: 32, 4>}, {transform_indices = @transform_6, window_bounds = array<i64: 32, 8>}]} {
    %c0 = arith.constant 0 : index
    %c0_0 = arith.constant 0 : index
    %0 = vector.load %arg1[%c0, %c0_0] : memref<32x8xf32, #tpu.memory_space<vmem>>, vector<32x8xf32>
    %1 = arith.truncf %0 : vector<32x8xf32> to vector<32x8xbf16>
    %c0_1 = arith.constant 0 : index
    %c0_2 = arith.constant 0 : index
    %2 = vector.load %arg2[%c0_1, %c0_2] : memref<8x4xbf16, #tpu.memory_space<vmem>>, vector<8x4xbf16>
    %cst = arith.constant dense<0.000000e+00> : vector<32x4xf32>
    %3 = tpu.matmul %1, %2, %cst {dimension_numbers = #tpu.dot_dimension_numbers<[1], [0], [0], [1], [0, 0, 1, 1], [], []>} : vector<32x8xbf16>, vector<8x4xbf16>, vector<32x4xf32> -> vector<32x4xf32>
    %c0_3 = arith.constant 0 : index
    %c0_4 = arith.constant 0 : index
    %4 = vector.load %arg3[%c0_3, %c0_4] : memref<1x4xf32, #tpu.memory_space<vmem>>, vector<1x4xf32>
    %5 = vector.broadcast %4 : vector<1x4xf32> to vector<32x4xf32>
    %6 = arith.addf %3, %5 : vector<32x4xf32>
    %cst_5 = arith.constant 0.000000e+00 : f32
    %7 = vector.broadcast %cst_5 : f32 to vector<32x4xf32>
    %8 = arith.maximumf %6, %7 : vector<32x4xf32>
    %c0_6 = arith.constant 0 : index
    %c0_7 = arith.constant 0 : index
    %9 = vector.load %arg6[%c0_6, %c0_7] : memref<32x4xf32, #tpu.memory_space<vmem>>, vector<32x4xf32>
    tpu.vector_store %arg6[%c0_6, %c0_7], %8 {strides = array<i32>} : memref<32x4xf32, #tpu.memory_space<vmem>>, vector<32x4xf32>,
    %c0_8 = arith.constant 0 : index
    %c0_9 = arith.constant 0 : index
    %10 = vector.load %arg4[%c0_8, %c0_9] : memref<8x8xbf16, #tpu.memory_space<vmem>>, vector<8x8xbf16>
    %cst_10 = arith.constant dense<0.000000e+00> : vector<32x8xf32>
    %11 = tpu.matmul %1, %10, %cst_10 {dimension_numbers = #tpu.dot_dimension_numbers<[1], [0], [0], [1], [0, 0, 1, 1], [], []>} : vector<32x8xbf16>, vector<8x8xbf16>, vector<32x8xf32> -> vector<32x8xf32>
    %c0_11 = arith.constant 0 : index
    %c0_12 = arith.constant 0 : index
    %12 = vector.load %arg5[%c0_11, %c0_12] : memref<1x8xf32, #tpu.memory_space<vmem>>, vector<1x8xf32>
    %13 = vector.broadcast %12 : vector<1x8xf32> to vector<32x8xf32>
    %14 = arith.addf %11, %13 : vector<32x8xf32>
    %15 = arith.negf %14 : vector<32x8xf32>
    %16 = math.exp %15 : vector<32x8xf32>
    %cst_13 = arith.constant 1.000000e+00 : f32
    %17 = vector.broadcast %cst_13 : f32 to vector<32x8xf32>
    %18 = arith.addf %17, %16 : vector<32x8xf32>
    %19 = arith.divf %17, %18 : vector<32x8xf32>
    %c0_14 = arith.constant 0 : index
    %c0_15 = arith.constant 0 : index
    %20 = vector.load %arg7[%c0_14, %c0_15] : memref<32x8xf32, #tpu.memory_space<vmem>>, vector<32x8xf32>
    tpu.vector_store %arg7[%c0_14, %c0_15], %19 {strides = array<i32>} : memref<32x8xf32, #tpu.memory_space<vmem>>, vector<32x8xf32>,
    return
  }
  func.func @transform_0(%arg0: i32) -> (i32, i32) {
    %c0_i32 = arith.constant 0 : i32
    %c0_i32_0 = arith.constant 0 : i32
    return %arg0, %c0_i32 : i32, i32
  }
  func.func @transform_1(%arg0: i32) -> (i32, i32) {
    %c0_i32 = arith.constant 0 : i32
    %c0_i32_0 = arith.constant 0 : i32
    %c0_i32_1 = arith.constant 0 : i32
    return %c0_i32, %c0_i32_0 : i32, i32
  }
  func.func @transform_2(%arg0: i32) -> (i32, i32) {
    %c0_i32 = arith.constant 0 : i32
    %c0_i32_0 = arith.constant 0 : i32
    %c0_i32_1 = arith.constant 0 : i32
    return %c0_i32, %c0_i32_0 : i32, i32
  }
  func.func @transform_3(%arg0: i32) -> (i32, i32) {
    %c0_i32 = arith.constant 0 : i32
    %c0_i32_0 = arith.constant 0 : i32
    %c0_i32_1 = arith.constant 0 : i32
    return %c0_i32, %c0_i32_0 : i32, i32
  }
  func.func @transform_4(%arg0: i32) -> (i32, i32) {
    %c0_i32 = arith.constant 0 : i32
    %c0_i32_0 = arith.constant 0 : i32
    %c0_i32_1 = arith.constant 0 : i32
    return %c0_i32, %c0_i32_0 : i32, i32
  }
  func.func @transform_5(%arg0: i32) -> (i32, i32) {
    %c0_i32 = arith.constant 0 : i32
    %c0_i32_0 = arith.constant 0 : i32
    return %arg0, %c0_i32 : i32, i32
  }
  func.func @transform_6(%arg0: i32) -> (i32, i32) {
    %c0_i32 = arith.constant 0 : i32
    %c0_i32_0 = arith.constant 0 : i32
    return %arg0, %c0_i32 : i32, i32
  }
}

module attributes {stable_mosaic.version = 11 : i64} {
  func.func @_res_back_kernel(%arg0: i32, %arg1: memref<32x28xf32, #tpu.memory_space<vmem>>, %arg2: memref<28x8xbf16, #tpu.memory_space<vmem>>, %arg3: memref<1x8xf32, #tpu.memory_space<vmem>>, %arg4: memref<32x8xf32, #tpu.memory_space<vmem>>, %arg5: memref<32x8xf32, #tpu.memory_space<vmem>>, %arg6: memref<32x8xf32, #tpu.memory_space<vmem>>) attributes {dimension_semantics = [#tpu.dimension_semantics<parallel>], iteration_bounds = array<i64: 1>, scalar_prefetch = 0 : i64, scratch_operands = 0 : i64, tpu.core_type = #tpu.core_type<tc>, window_params = [{transform_indices = @transform_0, window_bounds = array<i64: 32, 28>}, {pipeline_mode = #tpu.pipeline_mode<synchronous>, transform_indices = @transform_1, window_bounds = array<i64: 28, 8>}, {pipeline_mode = #tpu.pipeline_mode<synchronous>, transform_indices = @transform_2, window_bounds = array<i64: 1, 8>}, {transform_indices = @transform_3, window_bounds = array<i64: 32, 8>}, {transform_indices = @transform_4, window_bounds = array<i64: 32, 8>}, {transform_indices = @transform_5, window_bounds = array<i64: 32, 8>}]} {
    %c0 = arith.constant 0 : index
    %c0_0 = arith.constant 0 : index
    %0 = vector.load %arg1[%c0, %c0_0] : memref<32x28xf32, #tpu.memory_space<vmem>>, vector<32x28xf32>
    %1 = arith.truncf %0 : vector<32x28xf32> to vector<32x28xbf16>
    %c0_1 = arith.constant 0 : index
    %c0_2 = arith.constant 0 : index
    %2 = vector.load %arg2[%c0_1, %c0_2] : memref<28x8xbf16, #tpu.memory_space<vmem>>, vector<28x8xbf16>
    %cst = arith.constant dense<0.000000e+00> : vector<32x8xf32>
    %3 = tpu.matmul %1, %2, %cst {dimension_numbers = #tpu.dot_dimension_numbers<[1], [0], [0], [1], [0, 0, 1, 1], [], []>} : vector<32x28xbf16>, vector<28x8xbf16>, vector<32x8xf32> -> vector<32x8xf32>
    %c0_3 = arith.constant 0 : index
    %c0_4 = arith.constant 0 : index
    %4 = vector.load %arg3[%c0_3, %c0_4] : memref<1x8xf32, #tpu.memory_space<vmem>>, vector<1x8xf32>
    %5 = vector.broadcast %4 : vector<1x8xf32> to vector<32x8xf32>
    %6 = arith.addf %3, %5 : vector<32x8xf32>
    %c0_5 = arith.constant 0 : index
    %c0_6 = arith.constant 0 : index
    %7 = vector.load %arg4[%c0_5, %c0_6] : memref<32x8xf32, #tpu.memory_space<vmem>>, vector<32x8xf32>
    %c0_7 = arith.constant 0 : index
    %c0_8 = arith.constant 0 : index
    %8 = vector.load %arg5[%c0_7, %c0_8] : memref<32x8xf32, #tpu.memory_space<vmem>>, vector<32x8xf32>
    %9 = arith.mulf %7, %8 : vector<32x8xf32>
    %cst_9 = arith.constant 0.000000e+00 : f32
    %10 = vector.broadcast %cst_9 : f32 to vector<32x8xf32>
    %11 = arith.maximumf %6, %10 : vector<32x8xf32>
    %12 = arith.addf %9, %11 : vector<32x8xf32>
    %c0_10 = arith.constant 0 : index
    %c0_11 = arith.constant 0 : index
    %13 = vector.load %arg6[%c0_10, %c0_11] : memref<32x8xf32, #tpu.memory_space<vmem>>, vector<32x8xf32>
    tpu.vector_store %arg6[%c0_10, %c0_11], %12 {strides = array<i32>} : memref<32x8xf32, #tpu.memory_space<vmem>>, vector<32x8xf32>,
    return
  }
  func.func @transform_0(%arg0: i32) -> (i32, i32) {
    %c0_i32 = arith.constant 0 : i32
    %c0_i32_0 = arith.constant 0 : i32
    return %arg0, %c0_i32 : i32, i32
  }
  func.func @transform_1(%arg0: i32) -> (i32, i32) {
    %c0_i32 = arith.constant 0 : i32
    %c0_i32_0 = arith.constant 0 : i32
    %c0_i32_1 = arith.constant 0 : i32
    return %c0_i32, %c0_i32_0 : i32, i32
  }
  func.func @transform_2(%arg0: i32) -> (i32, i32) {
    %c0_i32 = arith.constant 0 : i32
    %c0_i32_0 = arith.constant 0 : i32
    %c0_i32_1 = arith.constant 0 : i32
    return %c0_i32, %c0_i32_0 : i32, i32
  }
  func.func @transform_3(%arg0: i32) -> (i32, i32) {
    %c0_i32 = arith.constant 0 : i32
    %c0_i32_0 = arith.constant 0 : i32
    return %arg0, %c0_i32 : i32, i32
  }
  func.func @transform_4(%arg0: i32) -> (i32, i32) {
    %c0_i32 = arith.constant 0 : i32
    %c0_i32_0 = arith.constant 0 : i32
    return %arg0, %c0_i32 : i32, i32
  }
  func.func @transform_5(%arg0: i32) -> (i32, i32) {
    %c0_i32 = arith.constant 0 : i32
    %c0_i32_0 = arith.constant 0 : i32
    return %arg0, %c0_i32 : i32, i32
  }
}

module attributes {stable_mosaic.version = 11 : i64} {
  func.func @_mm_kernel(%arg0: i32, %arg1: i32, %arg2: memref<16x56xf32, #tpu.memory_space<vmem>>, %arg3: memref<56x16xbf16, #tpu.memory_space<vmem>>, %arg4: memref<1x16xf32, #tpu.memory_space<vmem>>, %arg5: memref<16x16xf32, #tpu.memory_space<vmem>>) attributes {dimension_semantics = [#tpu.dimension_semantics<parallel>, #tpu.dimension_semantics<parallel>], iteration_bounds = array<i64: 1, 1>, scalar_prefetch = 0 : i64, scratch_operands = 0 : i64, tpu.core_type = #tpu.core_type<tc>, window_params = [{transform_indices = @transform_0, window_bounds = array<i64: 16, 56>}, {transform_indices = @transform_1, window_bounds = array<i64: 56, 16>}, {transform_indices = @transform_2, window_bounds = array<i64: 1, 16>}, {transform_indices = @transform_3, window_bounds = array<i64: 16, 16>}]} {
    %c0 = arith.constant 0 : index
    %c0_0 = arith.constant 0 : index
    %0 = vector.load %arg2[%c0, %c0_0] : memref<16x56xf32, #tpu.memory_space<vmem>>, vector<16x56xf32>
    %1 = arith.truncf %0 : vector<16x56xf32> to vector<16x56xbf16>
    %c0_1 = arith.constant 0 : index
    %c0_2 = arith.constant 0 : index
    %2 = vector.load %arg3[%c0_1, %c0_2] : memref<56x16xbf16, #tpu.memory_space<vmem>>, vector<56x16xbf16>
    %cst = arith.constant dense<0.000000e+00> : vector<16x16xf32>
    %3 = tpu.matmul %1, %2, %cst {dimension_numbers = #tpu.dot_dimension_numbers<[1], [0], [0], [1], [0, 0, 1, 1], [], []>} : vector<16x56xbf16>, vector<56x16xbf16>, vector<16x16xf32> -> vector<16x16xf32>
    %c0_3 = arith.constant 0 : index
    %c0_4 = arith.constant 0 : index
    %4 = vector.load %arg4[%c0_3, %c0_4] : memref<1x16xf32, #tpu.memory_space<vmem>>, vector<1x16xf32>
    %5 = vector.broadcast %4 : vector<1x16xf32> to vector<16x16xf32>
    %6 = arith.addf %3, %5 : vector<16x16xf32>
    %cst_5 = arith.constant 0.000000e+00 : f32
    %7 = vector.broadcast %cst_5 : f32 to vector<16x16xf32>
    %8 = arith.maximumf %6, %7 : vector<16x16xf32>
    %c0_6 = arith.constant 0 : index
    %c0_7 = arith.constant 0 : index
    %9 = vector.load %arg5[%c0_6, %c0_7] : memref<16x16xf32, #tpu.memory_space<vmem>>, vector<16x16xf32>
    tpu.vector_store %arg5[%c0_6, %c0_7], %8 {strides = array<i32>} : memref<16x16xf32, #tpu.memory_space<vmem>>, vector<16x16xf32>,
    return
  }
  func.func @transform_0(%arg0: i32, %arg1: i32) -> (i32, i32) {
    %c0_i32 = arith.constant 0 : i32
    %c0_i32_0 = arith.constant 0 : i32
    return %arg0, %c0_i32 : i32, i32
  }
  func.func @transform_1(%arg0: i32, %arg1: i32) -> (i32, i32) {
    %c0_i32 = arith.constant 0 : i32
    %c0_i32_0 = arith.constant 0 : i32
    return %c0_i32, %arg1 : i32, i32
  }
  func.func @transform_2(%arg0: i32, %arg1: i32) -> (i32, i32) {
    %c0_i32 = arith.constant 0 : i32
    %c0_i32_0 = arith.constant 0 : i32
    return %c0_i32, %arg1 : i32, i32
  }
  func.func @transform_3(%arg0: i32, %arg1: i32) -> (i32, i32) {
    %c0_i32 = arith.constant 0 : i32
    return %arg0, %arg1 : i32, i32
  }
}

module attributes {stable_mosaic.version = 11 : i64} {
  func.func @_res_front_kernel(%arg0: i32, %arg1: memref<16x16xf32, #tpu.memory_space<vmem>>, %arg2: memref<16x8xbf16, #tpu.memory_space<vmem>>, %arg3: memref<1x8xf32, #tpu.memory_space<vmem>>, %arg4: memref<16x16xbf16, #tpu.memory_space<vmem>>, %arg5: memref<1x16xf32, #tpu.memory_space<vmem>>, %arg6: memref<16x8xf32, #tpu.memory_space<vmem>>, %arg7: memref<16x16xf32, #tpu.memory_space<vmem>>) attributes {dimension_semantics = [#tpu.dimension_semantics<parallel>], iteration_bounds = array<i64: 1>, scalar_prefetch = 0 : i64, scratch_operands = 0 : i64, tpu.core_type = #tpu.core_type<tc>, window_params = [{transform_indices = @transform_0, window_bounds = array<i64: 16, 16>}, {pipeline_mode = #tpu.pipeline_mode<synchronous>, transform_indices = @transform_1, window_bounds = array<i64: 16, 8>}, {pipeline_mode = #tpu.pipeline_mode<synchronous>, transform_indices = @transform_2, window_bounds = array<i64: 1, 8>}, {pipeline_mode = #tpu.pipeline_mode<synchronous>, transform_indices = @transform_3, window_bounds = array<i64: 16, 16>}, {pipeline_mode = #tpu.pipeline_mode<synchronous>, transform_indices = @transform_4, window_bounds = array<i64: 1, 16>}, {transform_indices = @transform_5, window_bounds = array<i64: 16, 8>}, {transform_indices = @transform_6, window_bounds = array<i64: 16, 16>}]} {
    %c0 = arith.constant 0 : index
    %c0_0 = arith.constant 0 : index
    %0 = vector.load %arg1[%c0, %c0_0] : memref<16x16xf32, #tpu.memory_space<vmem>>, vector<16x16xf32>
    %1 = arith.truncf %0 : vector<16x16xf32> to vector<16x16xbf16>
    %c0_1 = arith.constant 0 : index
    %c0_2 = arith.constant 0 : index
    %2 = vector.load %arg2[%c0_1, %c0_2] : memref<16x8xbf16, #tpu.memory_space<vmem>>, vector<16x8xbf16>
    %cst = arith.constant dense<0.000000e+00> : vector<16x8xf32>
    %3 = tpu.matmul %1, %2, %cst {dimension_numbers = #tpu.dot_dimension_numbers<[1], [0], [0], [1], [0, 0, 1, 1], [], []>} : vector<16x16xbf16>, vector<16x8xbf16>, vector<16x8xf32> -> vector<16x8xf32>
    %c0_3 = arith.constant 0 : index
    %c0_4 = arith.constant 0 : index
    %4 = vector.load %arg3[%c0_3, %c0_4] : memref<1x8xf32, #tpu.memory_space<vmem>>, vector<1x8xf32>
    %5 = vector.broadcast %4 : vector<1x8xf32> to vector<16x8xf32>
    %6 = arith.addf %3, %5 : vector<16x8xf32>
    %cst_5 = arith.constant 0.000000e+00 : f32
    %7 = vector.broadcast %cst_5 : f32 to vector<16x8xf32>
    %8 = arith.maximumf %6, %7 : vector<16x8xf32>
    %c0_6 = arith.constant 0 : index
    %c0_7 = arith.constant 0 : index
    %9 = vector.load %arg6[%c0_6, %c0_7] : memref<16x8xf32, #tpu.memory_space<vmem>>, vector<16x8xf32>
    tpu.vector_store %arg6[%c0_6, %c0_7], %8 {strides = array<i32>} : memref<16x8xf32, #tpu.memory_space<vmem>>, vector<16x8xf32>,
    %c0_8 = arith.constant 0 : index
    %c0_9 = arith.constant 0 : index
    %10 = vector.load %arg4[%c0_8, %c0_9] : memref<16x16xbf16, #tpu.memory_space<vmem>>, vector<16x16xbf16>
    %cst_10 = arith.constant dense<0.000000e+00> : vector<16x16xf32>
    %11 = tpu.matmul %1, %10, %cst_10 {dimension_numbers = #tpu.dot_dimension_numbers<[1], [0], [0], [1], [0, 0, 1, 1], [], []>} : vector<16x16xbf16>, vector<16x16xbf16>, vector<16x16xf32> -> vector<16x16xf32>
    %c0_11 = arith.constant 0 : index
    %c0_12 = arith.constant 0 : index
    %12 = vector.load %arg5[%c0_11, %c0_12] : memref<1x16xf32, #tpu.memory_space<vmem>>, vector<1x16xf32>
    %13 = vector.broadcast %12 : vector<1x16xf32> to vector<16x16xf32>
    %14 = arith.addf %11, %13 : vector<16x16xf32>
    %15 = arith.negf %14 : vector<16x16xf32>
    %16 = math.exp %15 : vector<16x16xf32>
    %cst_13 = arith.constant 1.000000e+00 : f32
    %17 = vector.broadcast %cst_13 : f32 to vector<16x16xf32>
    %18 = arith.addf %17, %16 : vector<16x16xf32>
    %19 = arith.divf %17, %18 : vector<16x16xf32>
    %c0_14 = arith.constant 0 : index
    %c0_15 = arith.constant 0 : index
    %20 = vector.load %arg7[%c0_14, %c0_15] : memref<16x16xf32, #tpu.memory_space<vmem>>, vector<16x16xf32>
    tpu.vector_store %arg7[%c0_14, %c0_15], %19 {strides = array<i32>} : memref<16x16xf32, #tpu.memory_space<vmem>>, vector<16x16xf32>,
    return
  }
  func.func @transform_0(%arg0: i32) -> (i32, i32) {
    %c0_i32 = arith.constant 0 : i32
    %c0_i32_0 = arith.constant 0 : i32
    return %arg0, %c0_i32 : i32, i32
  }
  func.func @transform_1(%arg0: i32) -> (i32, i32) {
    %c0_i32 = arith.constant 0 : i32
    %c0_i32_0 = arith.constant 0 : i32
    %c0_i32_1 = arith.constant 0 : i32
    return %c0_i32, %c0_i32_0 : i32, i32
  }
  func.func @transform_2(%arg0: i32) -> (i32, i32) {
    %c0_i32 = arith.constant 0 : i32
    %c0_i32_0 = arith.constant 0 : i32
    %c0_i32_1 = arith.constant 0 : i32
    return %c0_i32, %c0_i32_0 : i32, i32
  }
  func.func @transform_3(%arg0: i32) -> (i32, i32) {
    %c0_i32 = arith.constant 0 : i32
    %c0_i32_0 = arith.constant 0 : i32
    %c0_i32_1 = arith.constant 0 : i32
    return %c0_i32, %c0_i32_0 : i32, i32
  }
  func.func @transform_4(%arg0: i32) -> (i32, i32) {
    %c0_i32 = arith.constant 0 : i32
    %c0_i32_0 = arith.constant 0 : i32
    %c0_i32_1 = arith.constant 0 : i32
    return %c0_i32, %c0_i32_0 : i32, i32
  }
  func.func @transform_5(%arg0: i32) -> (i32, i32) {
    %c0_i32 = arith.constant 0 : i32
    %c0_i32_0 = arith.constant 0 : i32
    return %arg0, %c0_i32 : i32, i32
  }
  func.func @transform_6(%arg0: i32) -> (i32, i32) {
    %c0_i32 = arith.constant 0 : i32
    %c0_i32_0 = arith.constant 0 : i32
    return %arg0, %c0_i32 : i32, i32
  }
}

module attributes {stable_mosaic.version = 11 : i64} {
  func.func @_res_back_kernel(%arg0: i32, %arg1: memref<16x72xf32, #tpu.memory_space<vmem>>, %arg2: memref<72x16xbf16, #tpu.memory_space<vmem>>, %arg3: memref<1x16xf32, #tpu.memory_space<vmem>>, %arg4: memref<16x16xf32, #tpu.memory_space<vmem>>, %arg5: memref<16x16xf32, #tpu.memory_space<vmem>>, %arg6: memref<16x16xf32, #tpu.memory_space<vmem>>) attributes {dimension_semantics = [#tpu.dimension_semantics<parallel>], iteration_bounds = array<i64: 1>, scalar_prefetch = 0 : i64, scratch_operands = 0 : i64, tpu.core_type = #tpu.core_type<tc>, window_params = [{transform_indices = @transform_0, window_bounds = array<i64: 16, 72>}, {pipeline_mode = #tpu.pipeline_mode<synchronous>, transform_indices = @transform_1, window_bounds = array<i64: 72, 16>}, {pipeline_mode = #tpu.pipeline_mode<synchronous>, transform_indices = @transform_2, window_bounds = array<i64: 1, 16>}, {transform_indices = @transform_3, window_bounds = array<i64: 16, 16>}, {transform_indices = @transform_4, window_bounds = array<i64: 16, 16>}, {transform_indices = @transform_5, window_bounds = array<i64: 16, 16>}]} {
    %c0 = arith.constant 0 : index
    %c0_0 = arith.constant 0 : index
    %0 = vector.load %arg1[%c0, %c0_0] : memref<16x72xf32, #tpu.memory_space<vmem>>, vector<16x72xf32>
    %1 = arith.truncf %0 : vector<16x72xf32> to vector<16x72xbf16>
    %c0_1 = arith.constant 0 : index
    %c0_2 = arith.constant 0 : index
    %2 = vector.load %arg2[%c0_1, %c0_2] : memref<72x16xbf16, #tpu.memory_space<vmem>>, vector<72x16xbf16>
    %cst = arith.constant dense<0.000000e+00> : vector<16x16xf32>
    %3 = tpu.matmul %1, %2, %cst {dimension_numbers = #tpu.dot_dimension_numbers<[1], [0], [0], [1], [0, 0, 1, 1], [], []>} : vector<16x72xbf16>, vector<72x16xbf16>, vector<16x16xf32> -> vector<16x16xf32>
    %c0_3 = arith.constant 0 : index
    %c0_4 = arith.constant 0 : index
    %4 = vector.load %arg3[%c0_3, %c0_4] : memref<1x16xf32, #tpu.memory_space<vmem>>, vector<1x16xf32>
    %5 = vector.broadcast %4 : vector<1x16xf32> to vector<16x16xf32>
    %6 = arith.addf %3, %5 : vector<16x16xf32>
    %c0_5 = arith.constant 0 : index
    %c0_6 = arith.constant 0 : index
    %7 = vector.load %arg4[%c0_5, %c0_6] : memref<16x16xf32, #tpu.memory_space<vmem>>, vector<16x16xf32>
    %c0_7 = arith.constant 0 : index
    %c0_8 = arith.constant 0 : index
    %8 = vector.load %arg5[%c0_7, %c0_8] : memref<16x16xf32, #tpu.memory_space<vmem>>, vector<16x16xf32>
    %9 = arith.mulf %7, %8 : vector<16x16xf32>
    %cst_9 = arith.constant 0.000000e+00 : f32
    %10 = vector.broadcast %cst_9 : f32 to vector<16x16xf32>
    %11 = arith.maximumf %6, %10 : vector<16x16xf32>
    %12 = arith.addf %9, %11 : vector<16x16xf32>
    %c0_10 = arith.constant 0 : index
    %c0_11 = arith.constant 0 : index
    %13 = vector.load %arg6[%c0_10, %c0_11] : memref<16x16xf32, #tpu.memory_space<vmem>>, vector<16x16xf32>
    tpu.vector_store %arg6[%c0_10, %c0_11], %12 {strides = array<i32>} : memref<16x16xf32, #tpu.memory_space<vmem>>, vector<16x16xf32>,
    return
  }
  func.func @transform_0(%arg0: i32) -> (i32, i32) {
    %c0_i32 = arith.constant 0 : i32
    %c0_i32_0 = arith.constant 0 : i32
    return %arg0, %c0_i32 : i32, i32
  }
  func.func @transform_1(%arg0: i32) -> (i32, i32) {
    %c0_i32 = arith.constant 0 : i32
    %c0_i32_0 = arith.constant 0 : i32
    %c0_i32_1 = arith.constant 0 : i32
    return %c0_i32, %c0_i32_0 : i32, i32
  }
  func.func @transform_2(%arg0: i32) -> (i32, i32) {
    %c0_i32 = arith.constant 0 : i32
    %c0_i32_0 = arith.constant 0 : i32
    %c0_i32_1 = arith.constant 0 : i32
    return %c0_i32, %c0_i32_0 : i32, i32
  }
  func.func @transform_3(%arg0: i32) -> (i32, i32) {
    %c0_i32 = arith.constant 0 : i32
    %c0_i32_0 = arith.constant 0 : i32
    return %arg0, %c0_i32 : i32, i32
  }
  func.func @transform_4(%arg0: i32) -> (i32, i32) {
    %c0_i32 = arith.constant 0 : i32
    %c0_i32_0 = arith.constant 0 : i32
    return %arg0, %c0_i32 : i32, i32
  }
  func.func @transform_5(%arg0: i32) -> (i32, i32) {
    %c0_i32 = arith.constant 0 : i32
    %c0_i32_0 = arith.constant 0 : i32
    return %arg0, %c0_i32 : i32, i32
  }
}

module attributes {stable_mosaic.version = 11 : i64} {
  func.func @_mm_kernel(%arg0: i32, %arg1: i32, %arg2: memref<8x144xf32, #tpu.memory_space<vmem>>, %arg3: memref<144x32xbf16, #tpu.memory_space<vmem>>, %arg4: memref<1x32xf32, #tpu.memory_space<vmem>>, %arg5: memref<8x32xf32, #tpu.memory_space<vmem>>) attributes {dimension_semantics = [#tpu.dimension_semantics<parallel>, #tpu.dimension_semantics<parallel>], iteration_bounds = array<i64: 1, 1>, scalar_prefetch = 0 : i64, scratch_operands = 0 : i64, tpu.core_type = #tpu.core_type<tc>, window_params = [{transform_indices = @transform_0, window_bounds = array<i64: 8, 144>}, {transform_indices = @transform_1, window_bounds = array<i64: 144, 32>}, {transform_indices = @transform_2, window_bounds = array<i64: 1, 32>}, {transform_indices = @transform_3, window_bounds = array<i64: 8, 32>}]} {
    %c0 = arith.constant 0 : index
    %c0_0 = arith.constant 0 : index
    %0 = vector.load %arg2[%c0, %c0_0] : memref<8x144xf32, #tpu.memory_space<vmem>>, vector<8x144xf32>
    %1 = arith.truncf %0 : vector<8x144xf32> to vector<8x144xbf16>
    %c0_1 = arith.constant 0 : index
    %c0_2 = arith.constant 0 : index
    %2 = vector.load %arg3[%c0_1, %c0_2] : memref<144x32xbf16, #tpu.memory_space<vmem>>, vector<144x32xbf16>
    %cst = arith.constant dense<0.000000e+00> : vector<8x32xf32>
    %3 = tpu.matmul %1, %2, %cst {dimension_numbers = #tpu.dot_dimension_numbers<[1], [0], [0], [1], [0, 0, 1, 1], [], []>} : vector<8x144xbf16>, vector<144x32xbf16>, vector<8x32xf32> -> vector<8x32xf32>
    %c0_3 = arith.constant 0 : index
    %c0_4 = arith.constant 0 : index
    %4 = vector.load %arg4[%c0_3, %c0_4] : memref<1x32xf32, #tpu.memory_space<vmem>>, vector<1x32xf32>
    %5 = vector.broadcast %4 : vector<1x32xf32> to vector<8x32xf32>
    %6 = arith.addf %3, %5 : vector<8x32xf32>
    %cst_5 = arith.constant 0.000000e+00 : f32
    %7 = vector.broadcast %cst_5 : f32 to vector<8x32xf32>
    %8 = arith.maximumf %6, %7 : vector<8x32xf32>
    %c0_6 = arith.constant 0 : index
    %c0_7 = arith.constant 0 : index
    %9 = vector.load %arg5[%c0_6, %c0_7] : memref<8x32xf32, #tpu.memory_space<vmem>>, vector<8x32xf32>
    tpu.vector_store %arg5[%c0_6, %c0_7], %8 {strides = array<i32>} : memref<8x32xf32, #tpu.memory_space<vmem>>, vector<8x32xf32>,
    return
  }
  func.func @transform_0(%arg0: i32, %arg1: i32) -> (i32, i32) {
    %c0_i32 = arith.constant 0 : i32
    %c0_i32_0 = arith.constant 0 : i32
    return %arg0, %c0_i32 : i32, i32
  }
  func.func @transform_1(%arg0: i32, %arg1: i32) -> (i32, i32) {
    %c0_i32 = arith.constant 0 : i32
    %c0_i32_0 = arith.constant 0 : i32
    return %c0_i32, %arg1 : i32, i32
  }
  func.func @transform_2(%arg0: i32, %arg1: i32) -> (i32, i32) {
    %c0_i32 = arith.constant 0 : i32
    %c0_i32_0 = arith.constant 0 : i32
    return %c0_i32, %arg1 : i32, i32
  }
  func.func @transform_3(%arg0: i32, %arg1: i32) -> (i32, i32) {
    %c0_i32 = arith.constant 0 : i32
    return %arg0, %arg1 : i32, i32
  }
}

module attributes {stable_mosaic.version = 11 : i64} {
  func.func @_res_front_kernel(%arg0: i32, %arg1: memref<8x32xf32, #tpu.memory_space<vmem>>, %arg2: memref<32x16xbf16, #tpu.memory_space<vmem>>, %arg3: memref<1x16xf32, #tpu.memory_space<vmem>>, %arg4: memref<32x32xbf16, #tpu.memory_space<vmem>>, %arg5: memref<1x32xf32, #tpu.memory_space<vmem>>, %arg6: memref<8x16xf32, #tpu.memory_space<vmem>>, %arg7: memref<8x32xf32, #tpu.memory_space<vmem>>) attributes {dimension_semantics = [#tpu.dimension_semantics<parallel>], iteration_bounds = array<i64: 1>, scalar_prefetch = 0 : i64, scratch_operands = 0 : i64, tpu.core_type = #tpu.core_type<tc>, window_params = [{transform_indices = @transform_0, window_bounds = array<i64: 8, 32>}, {pipeline_mode = #tpu.pipeline_mode<synchronous>, transform_indices = @transform_1, window_bounds = array<i64: 32, 16>}, {pipeline_mode = #tpu.pipeline_mode<synchronous>, transform_indices = @transform_2, window_bounds = array<i64: 1, 16>}, {pipeline_mode = #tpu.pipeline_mode<synchronous>, transform_indices = @transform_3, window_bounds = array<i64: 32, 32>}, {pipeline_mode = #tpu.pipeline_mode<synchronous>, transform_indices = @transform_4, window_bounds = array<i64: 1, 32>}, {transform_indices = @transform_5, window_bounds = array<i64: 8, 16>}, {transform_indices = @transform_6, window_bounds = array<i64: 8, 32>}]} {
    %c0 = arith.constant 0 : index
    %c0_0 = arith.constant 0 : index
    %0 = vector.load %arg1[%c0, %c0_0] : memref<8x32xf32, #tpu.memory_space<vmem>>, vector<8x32xf32>
    %1 = arith.truncf %0 : vector<8x32xf32> to vector<8x32xbf16>
    %c0_1 = arith.constant 0 : index
    %c0_2 = arith.constant 0 : index
    %2 = vector.load %arg2[%c0_1, %c0_2] : memref<32x16xbf16, #tpu.memory_space<vmem>>, vector<32x16xbf16>
    %cst = arith.constant dense<0.000000e+00> : vector<8x16xf32>
    %3 = tpu.matmul %1, %2, %cst {dimension_numbers = #tpu.dot_dimension_numbers<[1], [0], [0], [1], [0, 0, 1, 1], [], []>} : vector<8x32xbf16>, vector<32x16xbf16>, vector<8x16xf32> -> vector<8x16xf32>
    %c0_3 = arith.constant 0 : index
    %c0_4 = arith.constant 0 : index
    %4 = vector.load %arg3[%c0_3, %c0_4] : memref<1x16xf32, #tpu.memory_space<vmem>>, vector<1x16xf32>
    %5 = vector.broadcast %4 : vector<1x16xf32> to vector<8x16xf32>
    %6 = arith.addf %3, %5 : vector<8x16xf32>
    %cst_5 = arith.constant 0.000000e+00 : f32
    %7 = vector.broadcast %cst_5 : f32 to vector<8x16xf32>
    %8 = arith.maximumf %6, %7 : vector<8x16xf32>
    %c0_6 = arith.constant 0 : index
    %c0_7 = arith.constant 0 : index
    %9 = vector.load %arg6[%c0_6, %c0_7] : memref<8x16xf32, #tpu.memory_space<vmem>>, vector<8x16xf32>
    tpu.vector_store %arg6[%c0_6, %c0_7], %8 {strides = array<i32>} : memref<8x16xf32, #tpu.memory_space<vmem>>, vector<8x16xf32>,
    %c0_8 = arith.constant 0 : index
    %c0_9 = arith.constant 0 : index
    %10 = vector.load %arg4[%c0_8, %c0_9] : memref<32x32xbf16, #tpu.memory_space<vmem>>, vector<32x32xbf16>
    %cst_10 = arith.constant dense<0.000000e+00> : vector<8x32xf32>
    %11 = tpu.matmul %1, %10, %cst_10 {dimension_numbers = #tpu.dot_dimension_numbers<[1], [0], [0], [1], [0, 0, 1, 1], [], []>} : vector<8x32xbf16>, vector<32x32xbf16>, vector<8x32xf32> -> vector<8x32xf32>
    %c0_11 = arith.constant 0 : index
    %c0_12 = arith.constant 0 : index
    %12 = vector.load %arg5[%c0_11, %c0_12] : memref<1x32xf32, #tpu.memory_space<vmem>>, vector<1x32xf32>
    %13 = vector.broadcast %12 : vector<1x32xf32> to vector<8x32xf32>
    %14 = arith.addf %11, %13 : vector<8x32xf32>
    %15 = arith.negf %14 : vector<8x32xf32>
    %16 = math.exp %15 : vector<8x32xf32>
    %cst_13 = arith.constant 1.000000e+00 : f32
    %17 = vector.broadcast %cst_13 : f32 to vector<8x32xf32>
    %18 = arith.addf %17, %16 : vector<8x32xf32>
    %19 = arith.divf %17, %18 : vector<8x32xf32>
    %c0_14 = arith.constant 0 : index
    %c0_15 = arith.constant 0 : index
    %20 = vector.load %arg7[%c0_14, %c0_15] : memref<8x32xf32, #tpu.memory_space<vmem>>, vector<8x32xf32>
    tpu.vector_store %arg7[%c0_14, %c0_15], %19 {strides = array<i32>} : memref<8x32xf32, #tpu.memory_space<vmem>>, vector<8x32xf32>,
    return
  }
  func.func @transform_0(%arg0: i32) -> (i32, i32) {
    %c0_i32 = arith.constant 0 : i32
    %c0_i32_0 = arith.constant 0 : i32
    return %arg0, %c0_i32 : i32, i32
  }
  func.func @transform_1(%arg0: i32) -> (i32, i32) {
    %c0_i32 = arith.constant 0 : i32
    %c0_i32_0 = arith.constant 0 : i32
    %c0_i32_1 = arith.constant 0 : i32
    return %c0_i32, %c0_i32_0 : i32, i32
  }
  func.func @transform_2(%arg0: i32) -> (i32, i32) {
    %c0_i32 = arith.constant 0 : i32
    %c0_i32_0 = arith.constant 0 : i32
    %c0_i32_1 = arith.constant 0 : i32
    return %c0_i32, %c0_i32_0 : i32, i32
  }
  func.func @transform_3(%arg0: i32) -> (i32, i32) {
    %c0_i32 = arith.constant 0 : i32
    %c0_i32_0 = arith.constant 0 : i32
    %c0_i32_1 = arith.constant 0 : i32
    return %c0_i32, %c0_i32_0 : i32, i32
  }
  func.func @transform_4(%arg0: i32) -> (i32, i32) {
    %c0_i32 = arith.constant 0 : i32
    %c0_i32_0 = arith.constant 0 : i32
    %c0_i32_1 = arith.constant 0 : i32
    return %c0_i32, %c0_i32_0 : i32, i32
  }
  func.func @transform_5(%arg0: i32) -> (i32, i32) {
    %c0_i32 = arith.constant 0 : i32
    %c0_i32_0 = arith.constant 0 : i32
    return %arg0, %c0_i32 : i32, i32
  }
  func.func @transform_6(%arg0: i32) -> (i32, i32) {
    %c0_i32 = arith.constant 0 : i32
    %c0_i32_0 = arith.constant 0 : i32
    return %arg0, %c0_i32 : i32, i32
  }
}

module attributes {stable_mosaic.version = 11 : i64} {
  func.func @_res_back_kernel(%arg0: i32, %arg1: memref<8x144xf32, #tpu.memory_space<vmem>>, %arg2: memref<144x32xbf16, #tpu.memory_space<vmem>>, %arg3: memref<1x32xf32, #tpu.memory_space<vmem>>, %arg4: memref<8x32xf32, #tpu.memory_space<vmem>>, %arg5: memref<8x32xf32, #tpu.memory_space<vmem>>, %arg6: memref<8x32xf32, #tpu.memory_space<vmem>>) attributes {dimension_semantics = [#tpu.dimension_semantics<parallel>], iteration_bounds = array<i64: 1>, scalar_prefetch = 0 : i64, scratch_operands = 0 : i64, tpu.core_type = #tpu.core_type<tc>, window_params = [{transform_indices = @transform_0, window_bounds = array<i64: 8, 144>}, {pipeline_mode = #tpu.pipeline_mode<synchronous>, transform_indices = @transform_1, window_bounds = array<i64: 144, 32>}, {pipeline_mode = #tpu.pipeline_mode<synchronous>, transform_indices = @transform_2, window_bounds = array<i64: 1, 32>}, {transform_indices = @transform_3, window_bounds = array<i64: 8, 32>}, {transform_indices = @transform_4, window_bounds = array<i64: 8, 32>}, {transform_indices = @transform_5, window_bounds = array<i64: 8, 32>}]} {
    %c0 = arith.constant 0 : index
    %c0_0 = arith.constant 0 : index
    %0 = vector.load %arg1[%c0, %c0_0] : memref<8x144xf32, #tpu.memory_space<vmem>>, vector<8x144xf32>
    %1 = arith.truncf %0 : vector<8x144xf32> to vector<8x144xbf16>
    %c0_1 = arith.constant 0 : index
    %c0_2 = arith.constant 0 : index
    %2 = vector.load %arg2[%c0_1, %c0_2] : memref<144x32xbf16, #tpu.memory_space<vmem>>, vector<144x32xbf16>
    %cst = arith.constant dense<0.000000e+00> : vector<8x32xf32>
    %3 = tpu.matmul %1, %2, %cst {dimension_numbers = #tpu.dot_dimension_numbers<[1], [0], [0], [1], [0, 0, 1, 1], [], []>} : vector<8x144xbf16>, vector<144x32xbf16>, vector<8x32xf32> -> vector<8x32xf32>
    %c0_3 = arith.constant 0 : index
    %c0_4 = arith.constant 0 : index
    %4 = vector.load %arg3[%c0_3, %c0_4] : memref<1x32xf32, #tpu.memory_space<vmem>>, vector<1x32xf32>
    %5 = vector.broadcast %4 : vector<1x32xf32> to vector<8x32xf32>
    %6 = arith.addf %3, %5 : vector<8x32xf32>
    %c0_5 = arith.constant 0 : index
    %c0_6 = arith.constant 0 : index
    %7 = vector.load %arg4[%c0_5, %c0_6] : memref<8x32xf32, #tpu.memory_space<vmem>>, vector<8x32xf32>
    %c0_7 = arith.constant 0 : index
    %c0_8 = arith.constant 0 : index
    %8 = vector.load %arg5[%c0_7, %c0_8] : memref<8x32xf32, #tpu.memory_space<vmem>>, vector<8x32xf32>
    %9 = arith.mulf %7, %8 : vector<8x32xf32>
    %cst_9 = arith.constant 0.000000e+00 : f32
    %10 = vector.broadcast %cst_9 : f32 to vector<8x32xf32>
    %11 = arith.maximumf %6, %10 : vector<8x32xf32>
    %12 = arith.addf %9, %11 : vector<8x32xf32>
    %c0_10 = arith.constant 0 : index
    %c0_11 = arith.constant 0 : index
    %13 = vector.load %arg6[%c0_10, %c0_11] : memref<8x32xf32, #tpu.memory_space<vmem>>, vector<8x32xf32>
    tpu.vector_store %arg6[%c0_10, %c0_11], %12 {strides = array<i32>} : memref<8x32xf32, #tpu.memory_space<vmem>>, vector<8x32xf32>,
    return
  }
  func.func @transform_0(%arg0: i32) -> (i32, i32) {
    %c0_i32 = arith.constant 0 : i32
    %c0_i32_0 = arith.constant 0 : i32
    return %arg0, %c0_i32 : i32, i32
  }
  func.func @transform_1(%arg0: i32) -> (i32, i32) {
    %c0_i32 = arith.constant 0 : i32
    %c0_i32_0 = arith.constant 0 : i32
    %c0_i32_1 = arith.constant 0 : i32
    return %c0_i32, %c0_i32_0 : i32, i32
  }
  func.func @transform_2(%arg0: i32) -> (i32, i32) {
    %c0_i32 = arith.constant 0 : i32
    %c0_i32_0 = arith.constant 0 : i32
    %c0_i32_1 = arith.constant 0 : i32
    return %c0_i32, %c0_i32_0 : i32, i32
  }
  func.func @transform_3(%arg0: i32) -> (i32, i32) {
    %c0_i32 = arith.constant 0 : i32
    %c0_i32_0 = arith.constant 0 : i32
    return %arg0, %c0_i32 : i32, i32
  }
  func.func @transform_4(%arg0: i32) -> (i32, i32) {
    %c0_i32 = arith.constant 0 : i32
    %c0_i32_0 = arith.constant 0 : i32
    return %arg0, %c0_i32 : i32, i32
  }
  func.func @transform_5(%arg0: i32) -> (i32, i32) {
    %c0_i32 = arith.constant 0 : i32
    %c0_i32_0 = arith.constant 0 : i32
    return %arg0, %c0_i32 : i32, i32
  }
}

module attributes {stable_mosaic.version = 11 : i64} {
  func.func @_mm_kernel(%arg0: i32, %arg1: i32, %arg2: memref<4x288xf32, #tpu.memory_space<vmem>>, %arg3: memref<288x64xbf16, #tpu.memory_space<vmem>>, %arg4: memref<1x64xf32, #tpu.memory_space<vmem>>, %arg5: memref<4x64xf32, #tpu.memory_space<vmem>>) attributes {dimension_semantics = [#tpu.dimension_semantics<parallel>, #tpu.dimension_semantics<parallel>], iteration_bounds = array<i64: 1, 1>, scalar_prefetch = 0 : i64, scratch_operands = 0 : i64, tpu.core_type = #tpu.core_type<tc>, window_params = [{transform_indices = @transform_0, window_bounds = array<i64: 4, 288>}, {transform_indices = @transform_1, window_bounds = array<i64: 288, 64>}, {transform_indices = @transform_2, window_bounds = array<i64: 1, 64>}, {transform_indices = @transform_3, window_bounds = array<i64: 4, 64>}]} {
    %c0 = arith.constant 0 : index
    %c0_0 = arith.constant 0 : index
    %0 = vector.load %arg2[%c0, %c0_0] : memref<4x288xf32, #tpu.memory_space<vmem>>, vector<4x288xf32>
    %1 = arith.truncf %0 : vector<4x288xf32> to vector<4x288xbf16>
    %c0_1 = arith.constant 0 : index
    %c0_2 = arith.constant 0 : index
    %2 = vector.load %arg3[%c0_1, %c0_2] : memref<288x64xbf16, #tpu.memory_space<vmem>>, vector<288x64xbf16>
    %cst = arith.constant dense<0.000000e+00> : vector<4x64xf32>
    %3 = tpu.matmul %1, %2, %cst {dimension_numbers = #tpu.dot_dimension_numbers<[1], [0], [0], [1], [0, 0, 1, 1], [], []>} : vector<4x288xbf16>, vector<288x64xbf16>, vector<4x64xf32> -> vector<4x64xf32>
    %c0_3 = arith.constant 0 : index
    %c0_4 = arith.constant 0 : index
    %4 = vector.load %arg4[%c0_3, %c0_4] : memref<1x64xf32, #tpu.memory_space<vmem>>, vector<1x64xf32>
    %5 = vector.broadcast %4 : vector<1x64xf32> to vector<4x64xf32>
    %6 = arith.addf %3, %5 : vector<4x64xf32>
    %cst_5 = arith.constant 0.000000e+00 : f32
    %7 = vector.broadcast %cst_5 : f32 to vector<4x64xf32>
    %8 = arith.maximumf %6, %7 : vector<4x64xf32>
    %c0_6 = arith.constant 0 : index
    %c0_7 = arith.constant 0 : index
    %9 = vector.load %arg5[%c0_6, %c0_7] : memref<4x64xf32, #tpu.memory_space<vmem>>, vector<4x64xf32>
    tpu.vector_store %arg5[%c0_6, %c0_7], %8 {strides = array<i32>} : memref<4x64xf32, #tpu.memory_space<vmem>>, vector<4x64xf32>,
    return
  }
  func.func @transform_0(%arg0: i32, %arg1: i32) -> (i32, i32) {
    %c0_i32 = arith.constant 0 : i32
    %c0_i32_0 = arith.constant 0 : i32
    return %arg0, %c0_i32 : i32, i32
  }
  func.func @transform_1(%arg0: i32, %arg1: i32) -> (i32, i32) {
    %c0_i32 = arith.constant 0 : i32
    %c0_i32_0 = arith.constant 0 : i32
    return %c0_i32, %arg1 : i32, i32
  }
  func.func @transform_2(%arg0: i32, %arg1: i32) -> (i32, i32) {
    %c0_i32 = arith.constant 0 : i32
    %c0_i32_0 = arith.constant 0 : i32
    return %c0_i32, %arg1 : i32, i32
  }
  func.func @transform_3(%arg0: i32, %arg1: i32) -> (i32, i32) {
    %c0_i32 = arith.constant 0 : i32
    return %arg0, %arg1 : i32, i32
  }
}

module attributes {stable_mosaic.version = 11 : i64} {
  func.func @_res_front_kernel(%arg0: i32, %arg1: memref<4x64xf32, #tpu.memory_space<vmem>>, %arg2: memref<64x32xbf16, #tpu.memory_space<vmem>>, %arg3: memref<1x32xf32, #tpu.memory_space<vmem>>, %arg4: memref<64x64xbf16, #tpu.memory_space<vmem>>, %arg5: memref<1x64xf32, #tpu.memory_space<vmem>>, %arg6: memref<4x32xf32, #tpu.memory_space<vmem>>, %arg7: memref<4x64xf32, #tpu.memory_space<vmem>>) attributes {dimension_semantics = [#tpu.dimension_semantics<parallel>], iteration_bounds = array<i64: 1>, scalar_prefetch = 0 : i64, scratch_operands = 0 : i64, tpu.core_type = #tpu.core_type<tc>, window_params = [{transform_indices = @transform_0, window_bounds = array<i64: 4, 64>}, {pipeline_mode = #tpu.pipeline_mode<synchronous>, transform_indices = @transform_1, window_bounds = array<i64: 64, 32>}, {pipeline_mode = #tpu.pipeline_mode<synchronous>, transform_indices = @transform_2, window_bounds = array<i64: 1, 32>}, {pipeline_mode = #tpu.pipeline_mode<synchronous>, transform_indices = @transform_3, window_bounds = array<i64: 64, 64>}, {pipeline_mode = #tpu.pipeline_mode<synchronous>, transform_indices = @transform_4, window_bounds = array<i64: 1, 64>}, {transform_indices = @transform_5, window_bounds = array<i64: 4, 32>}, {transform_indices = @transform_6, window_bounds = array<i64: 4, 64>}]} {
    %c0 = arith.constant 0 : index
    %c0_0 = arith.constant 0 : index
    %0 = vector.load %arg1[%c0, %c0_0] : memref<4x64xf32, #tpu.memory_space<vmem>>, vector<4x64xf32>
    %1 = arith.truncf %0 : vector<4x64xf32> to vector<4x64xbf16>
    %c0_1 = arith.constant 0 : index
    %c0_2 = arith.constant 0 : index
    %2 = vector.load %arg2[%c0_1, %c0_2] : memref<64x32xbf16, #tpu.memory_space<vmem>>, vector<64x32xbf16>
    %cst = arith.constant dense<0.000000e+00> : vector<4x32xf32>
    %3 = tpu.matmul %1, %2, %cst {dimension_numbers = #tpu.dot_dimension_numbers<[1], [0], [0], [1], [0, 0, 1, 1], [], []>} : vector<4x64xbf16>, vector<64x32xbf16>, vector<4x32xf32> -> vector<4x32xf32>
    %c0_3 = arith.constant 0 : index
    %c0_4 = arith.constant 0 : index
    %4 = vector.load %arg3[%c0_3, %c0_4] : memref<1x32xf32, #tpu.memory_space<vmem>>, vector<1x32xf32>
    %5 = vector.broadcast %4 : vector<1x32xf32> to vector<4x32xf32>
    %6 = arith.addf %3, %5 : vector<4x32xf32>
    %cst_5 = arith.constant 0.000000e+00 : f32
    %7 = vector.broadcast %cst_5 : f32 to vector<4x32xf32>
    %8 = arith.maximumf %6, %7 : vector<4x32xf32>
    %c0_6 = arith.constant 0 : index
    %c0_7 = arith.constant 0 : index
    %9 = vector.load %arg6[%c0_6, %c0_7] : memref<4x32xf32, #tpu.memory_space<vmem>>, vector<4x32xf32>
    tpu.vector_store %arg6[%c0_6, %c0_7], %8 {strides = array<i32>} : memref<4x32xf32, #tpu.memory_space<vmem>>, vector<4x32xf32>,
    %c0_8 = arith.constant 0 : index
    %c0_9 = arith.constant 0 : index
    %10 = vector.load %arg4[%c0_8, %c0_9] : memref<64x64xbf16, #tpu.memory_space<vmem>>, vector<64x64xbf16>
    %cst_10 = arith.constant dense<0.000000e+00> : vector<4x64xf32>
    %11 = tpu.matmul %1, %10, %cst_10 {dimension_numbers = #tpu.dot_dimension_numbers<[1], [0], [0], [1], [0, 0, 1, 1], [], []>} : vector<4x64xbf16>, vector<64x64xbf16>, vector<4x64xf32> -> vector<4x64xf32>
    %c0_11 = arith.constant 0 : index
    %c0_12 = arith.constant 0 : index
    %12 = vector.load %arg5[%c0_11, %c0_12] : memref<1x64xf32, #tpu.memory_space<vmem>>, vector<1x64xf32>
    %13 = vector.broadcast %12 : vector<1x64xf32> to vector<4x64xf32>
    %14 = arith.addf %11, %13 : vector<4x64xf32>
    %15 = arith.negf %14 : vector<4x64xf32>
    %16 = math.exp %15 : vector<4x64xf32>
    %cst_13 = arith.constant 1.000000e+00 : f32
    %17 = vector.broadcast %cst_13 : f32 to vector<4x64xf32>
    %18 = arith.addf %17, %16 : vector<4x64xf32>
    %19 = arith.divf %17, %18 : vector<4x64xf32>
    %c0_14 = arith.constant 0 : index
    %c0_15 = arith.constant 0 : index
    %20 = vector.load %arg7[%c0_14, %c0_15] : memref<4x64xf32, #tpu.memory_space<vmem>>, vector<4x64xf32>
    tpu.vector_store %arg7[%c0_14, %c0_15], %19 {strides = array<i32>} : memref<4x64xf32, #tpu.memory_space<vmem>>, vector<4x64xf32>,
    return
  }
  func.func @transform_0(%arg0: i32) -> (i32, i32) {
    %c0_i32 = arith.constant 0 : i32
    %c0_i32_0 = arith.constant 0 : i32
    return %arg0, %c0_i32 : i32, i32
  }
  func.func @transform_1(%arg0: i32) -> (i32, i32) {
    %c0_i32 = arith.constant 0 : i32
    %c0_i32_0 = arith.constant 0 : i32
    %c0_i32_1 = arith.constant 0 : i32
    return %c0_i32, %c0_i32_0 : i32, i32
  }
  func.func @transform_2(%arg0: i32) -> (i32, i32) {
    %c0_i32 = arith.constant 0 : i32
    %c0_i32_0 = arith.constant 0 : i32
    %c0_i32_1 = arith.constant 0 : i32
    return %c0_i32, %c0_i32_0 : i32, i32
  }
  func.func @transform_3(%arg0: i32) -> (i32, i32) {
    %c0_i32 = arith.constant 0 : i32
    %c0_i32_0 = arith.constant 0 : i32
    %c0_i32_1 = arith.constant 0 : i32
    return %c0_i32, %c0_i32_0 : i32, i32
  }
  func.func @transform_4(%arg0: i32) -> (i32, i32) {
    %c0_i32 = arith.constant 0 : i32
    %c0_i32_0 = arith.constant 0 : i32
    %c0_i32_1 = arith.constant 0 : i32
    return %c0_i32, %c0_i32_0 : i32, i32
  }
  func.func @transform_5(%arg0: i32) -> (i32, i32) {
    %c0_i32 = arith.constant 0 : i32
    %c0_i32_0 = arith.constant 0 : i32
    return %arg0, %c0_i32 : i32, i32
  }
  func.func @transform_6(%arg0: i32) -> (i32, i32) {
    %c0_i32 = arith.constant 0 : i32
    %c0_i32_0 = arith.constant 0 : i32
    return %arg0, %c0_i32 : i32, i32
  }
}

module attributes {stable_mosaic.version = 11 : i64} {
  func.func @_res_back_kernel(%arg0: i32, %arg1: memref<4x352xf32, #tpu.memory_space<vmem>>, %arg2: memref<352x64xbf16, #tpu.memory_space<vmem>>, %arg3: memref<1x64xf32, #tpu.memory_space<vmem>>, %arg4: memref<4x64xf32, #tpu.memory_space<vmem>>, %arg5: memref<4x64xf32, #tpu.memory_space<vmem>>, %arg6: memref<4x64xf32, #tpu.memory_space<vmem>>) attributes {dimension_semantics = [#tpu.dimension_semantics<parallel>], iteration_bounds = array<i64: 1>, scalar_prefetch = 0 : i64, scratch_operands = 0 : i64, tpu.core_type = #tpu.core_type<tc>, window_params = [{transform_indices = @transform_0, window_bounds = array<i64: 4, 352>}, {pipeline_mode = #tpu.pipeline_mode<synchronous>, transform_indices = @transform_1, window_bounds = array<i64: 352, 64>}, {pipeline_mode = #tpu.pipeline_mode<synchronous>, transform_indices = @transform_2, window_bounds = array<i64: 1, 64>}, {transform_indices = @transform_3, window_bounds = array<i64: 4, 64>}, {transform_indices = @transform_4, window_bounds = array<i64: 4, 64>}, {transform_indices = @transform_5, window_bounds = array<i64: 4, 64>}]} {
    %c0 = arith.constant 0 : index
    %c0_0 = arith.constant 0 : index
    %0 = vector.load %arg1[%c0, %c0_0] : memref<4x352xf32, #tpu.memory_space<vmem>>, vector<4x352xf32>
    %1 = arith.truncf %0 : vector<4x352xf32> to vector<4x352xbf16>
    %c0_1 = arith.constant 0 : index
    %c0_2 = arith.constant 0 : index
    %2 = vector.load %arg2[%c0_1, %c0_2] : memref<352x64xbf16, #tpu.memory_space<vmem>>, vector<352x64xbf16>
    %cst = arith.constant dense<0.000000e+00> : vector<4x64xf32>
    %3 = tpu.matmul %1, %2, %cst {dimension_numbers = #tpu.dot_dimension_numbers<[1], [0], [0], [1], [0, 0, 1, 1], [], []>} : vector<4x352xbf16>, vector<352x64xbf16>, vector<4x64xf32> -> vector<4x64xf32>
    %c0_3 = arith.constant 0 : index
    %c0_4 = arith.constant 0 : index
    %4 = vector.load %arg3[%c0_3, %c0_4] : memref<1x64xf32, #tpu.memory_space<vmem>>, vector<1x64xf32>
    %5 = vector.broadcast %4 : vector<1x64xf32> to vector<4x64xf32>
    %6 = arith.addf %3, %5 : vector<4x64xf32>
    %c0_5 = arith.constant 0 : index
    %c0_6 = arith.constant 0 : index
    %7 = vector.load %arg4[%c0_5, %c0_6] : memref<4x64xf32, #tpu.memory_space<vmem>>, vector<4x64xf32>
    %c0_7 = arith.constant 0 : index
    %c0_8 = arith.constant 0 : index
    %8 = vector.load %arg5[%c0_7, %c0_8] : memref<4x64xf32, #tpu.memory_space<vmem>>, vector<4x64xf32>
    %9 = arith.mulf %7, %8 : vector<4x64xf32>
    %cst_9 = arith.constant 0.000000e+00 : f32
    %10 = vector.broadcast %cst_9 : f32 to vector<4x64xf32>
    %11 = arith.maximumf %6, %10 : vector<4x64xf32>
    %12 = arith.addf %9, %11 : vector<4x64xf32>
    %c0_10 = arith.constant 0 : index
    %c0_11 = arith.constant 0 : index
    %13 = vector.load %arg6[%c0_10, %c0_11] : memref<4x64xf32, #tpu.memory_space<vmem>>, vector<4x64xf32>
    tpu.vector_store %arg6[%c0_10, %c0_11], %12 {strides = array<i32>} : memref<4x64xf32, #tpu.memory_space<vmem>>, vector<4x64xf32>,
    return
  }
  func.func @transform_0(%arg0: i32) -> (i32, i32) {
    %c0_i32 = arith.constant 0 : i32
    %c0_i32_0 = arith.constant 0 : i32
    return %arg0, %c0_i32 : i32, i32
  }
  func.func @transform_1(%arg0: i32) -> (i32, i32) {
    %c0_i32 = arith.constant 0 : i32
    %c0_i32_0 = arith.constant 0 : i32
    %c0_i32_1 = arith.constant 0 : i32
    return %c0_i32, %c0_i32_0 : i32, i32
  }
  func.func @transform_2(%arg0: i32) -> (i32, i32) {
    %c0_i32 = arith.constant 0 : i32
    %c0_i32_0 = arith.constant 0 : i32
    %c0_i32_1 = arith.constant 0 : i32
    return %c0_i32, %c0_i32_0 : i32, i32
  }
  func.func @transform_3(%arg0: i32) -> (i32, i32) {
    %c0_i32 = arith.constant 0 : i32
    %c0_i32_0 = arith.constant 0 : i32
    return %arg0, %c0_i32 : i32, i32
  }
  func.func @transform_4(%arg0: i32) -> (i32, i32) {
    %c0_i32 = arith.constant 0 : i32
    %c0_i32_0 = arith.constant 0 : i32
    return %arg0, %c0_i32 : i32, i32
  }
  func.func @transform_5(%arg0: i32) -> (i32, i32) {
    %c0_i32 = arith.constant 0 : i32
    %c0_i32_0 = arith.constant 0 : i32
    return %arg0, %c0_i32 : i32, i32
  }
}

module attributes {stable_mosaic.version = 11 : i64} {
  func.func @_mm_kernel(%arg0: i32, %arg1: i32, %arg2: memref<4x64xf32, #tpu.memory_space<vmem>>, %arg3: memref<64x4xbf16, #tpu.memory_space<vmem>>, %arg4: memref<1x4xf32, #tpu.memory_space<vmem>>, %arg5: memref<4x4xf32, #tpu.memory_space<vmem>>) attributes {dimension_semantics = [#tpu.dimension_semantics<parallel>, #tpu.dimension_semantics<parallel>], iteration_bounds = array<i64: 1, 1>, scalar_prefetch = 0 : i64, scratch_operands = 0 : i64, tpu.core_type = #tpu.core_type<tc>, window_params = [{transform_indices = @transform_0, window_bounds = array<i64: 4, 64>}, {transform_indices = @transform_1, window_bounds = array<i64: 64, 4>}, {transform_indices = @transform_2, window_bounds = array<i64: 1, 4>}, {transform_indices = @transform_3, window_bounds = array<i64: 4, 4>}]} {
    %c0 = arith.constant 0 : index
    %c0_0 = arith.constant 0 : index
    %0 = vector.load %arg2[%c0, %c0_0] : memref<4x64xf32, #tpu.memory_space<vmem>>, vector<4x64xf32>
    %1 = arith.truncf %0 : vector<4x64xf32> to vector<4x64xbf16>
    %c0_1 = arith.constant 0 : index
    %c0_2 = arith.constant 0 : index
    %2 = vector.load %arg3[%c0_1, %c0_2] : memref<64x4xbf16, #tpu.memory_space<vmem>>, vector<64x4xbf16>
    %cst = arith.constant dense<0.000000e+00> : vector<4x4xf32>
    %3 = tpu.matmul %1, %2, %cst {dimension_numbers = #tpu.dot_dimension_numbers<[1], [0], [0], [1], [0, 0, 1, 1], [], []>} : vector<4x64xbf16>, vector<64x4xbf16>, vector<4x4xf32> -> vector<4x4xf32>
    %c0_3 = arith.constant 0 : index
    %c0_4 = arith.constant 0 : index
    %4 = vector.load %arg4[%c0_3, %c0_4] : memref<1x4xf32, #tpu.memory_space<vmem>>, vector<1x4xf32>
    %5 = vector.broadcast %4 : vector<1x4xf32> to vector<4x4xf32>
    %6 = arith.addf %3, %5 : vector<4x4xf32>
    %c0_5 = arith.constant 0 : index
    %c0_6 = arith.constant 0 : index
    %7 = vector.load %arg5[%c0_5, %c0_6] : memref<4x4xf32, #tpu.memory_space<vmem>>, vector<4x4xf32>
    tpu.vector_store %arg5[%c0_5, %c0_6], %6 {strides = array<i32>} : memref<4x4xf32, #tpu.memory_space<vmem>>, vector<4x4xf32>,
    return
  }
  func.func @transform_0(%arg0: i32, %arg1: i32) -> (i32, i32) {
    %c0_i32 = arith.constant 0 : i32
    %c0_i32_0 = arith.constant 0 : i32
    return %arg0, %c0_i32 : i32, i32
  }
  func.func @transform_1(%arg0: i32, %arg1: i32) -> (i32, i32) {
    %c0_i32 = arith.constant 0 : i32
    %c0_i32_0 = arith.constant 0 : i32
    return %c0_i32, %arg1 : i32, i32
  }
  func.func @transform_2(%arg0: i32, %arg1: i32) -> (i32, i32) {
    %c0_i32 = arith.constant 0 : i32
    %c0_i32_0 = arith.constant 0 : i32
    return %c0_i32, %arg1 : i32, i32
  }
  func.func @transform_3(%arg0: i32, %arg1: i32) -> (i32, i32) {
    %c0_i32 = arith.constant 0 : i32
    return %arg0, %arg1 : i32, i32
  }
}

module attributes {stable_mosaic.version = 11 : i64} {
  func.func @_mm_kernel(%arg0: i32, %arg1: i32, %arg2: memref<8x2xf32, #tpu.memory_space<vmem>>, %arg3: memref<2x32xbf16, #tpu.memory_space<vmem>>, %arg4: memref<1x32xf32, #tpu.memory_space<vmem>>, %arg5: memref<8x32xf32, #tpu.memory_space<vmem>>) attributes {dimension_semantics = [#tpu.dimension_semantics<parallel>, #tpu.dimension_semantics<parallel>], iteration_bounds = array<i64: 1, 1>, scalar_prefetch = 0 : i64, scratch_operands = 0 : i64, tpu.core_type = #tpu.core_type<tc>, window_params = [{transform_indices = @transform_0, window_bounds = array<i64: 8, 2>}, {transform_indices = @transform_1, window_bounds = array<i64: 2, 32>}, {transform_indices = @transform_2, window_bounds = array<i64: 1, 32>}, {transform_indices = @transform_3, window_bounds = array<i64: 8, 32>}]} {
    %c0 = arith.constant 0 : index
    %c0_0 = arith.constant 0 : index
    %0 = vector.load %arg2[%c0, %c0_0] : memref<8x2xf32, #tpu.memory_space<vmem>>, vector<8x2xf32>
    %1 = arith.truncf %0 : vector<8x2xf32> to vector<8x2xbf16>
    %c0_1 = arith.constant 0 : index
    %c0_2 = arith.constant 0 : index
    %2 = vector.load %arg3[%c0_1, %c0_2] : memref<2x32xbf16, #tpu.memory_space<vmem>>, vector<2x32xbf16>
    %cst = arith.constant dense<0.000000e+00> : vector<8x32xf32>
    %3 = tpu.matmul %1, %2, %cst {dimension_numbers = #tpu.dot_dimension_numbers<[1], [0], [0], [1], [0, 0, 1, 1], [], []>} : vector<8x2xbf16>, vector<2x32xbf16>, vector<8x32xf32> -> vector<8x32xf32>
    %c0_3 = arith.constant 0 : index
    %c0_4 = arith.constant 0 : index
    %4 = vector.load %arg4[%c0_3, %c0_4] : memref<1x32xf32, #tpu.memory_space<vmem>>, vector<1x32xf32>
    %5 = vector.broadcast %4 : vector<1x32xf32> to vector<8x32xf32>
    %6 = arith.addf %3, %5 : vector<8x32xf32>
    %c0_5 = arith.constant 0 : index
    %c0_6 = arith.constant 0 : index
    %7 = vector.load %arg5[%c0_5, %c0_6] : memref<8x32xf32, #tpu.memory_space<vmem>>, vector<8x32xf32>
    tpu.vector_store %arg5[%c0_5, %c0_6], %6 {strides = array<i32>} : memref<8x32xf32, #tpu.memory_space<vmem>>, vector<8x32xf32>,
    return
  }
  func.func @transform_0(%arg0: i32, %arg1: i32) -> (i32, i32) {
    %c0_i32 = arith.constant 0 : i32
    %c0_i32_0 = arith.constant 0 : i32
    return %arg0, %c0_i32 : i32, i32
  }
  func.func @transform_1(%arg0: i32, %arg1: i32) -> (i32, i32) {
    %c0_i32 = arith.constant 0 : i32
    %c0_i32_0 = arith.constant 0 : i32
    return %c0_i32, %arg1 : i32, i32
  }
  func.func @transform_2(%arg0: i32, %arg1: i32) -> (i32, i32) {
    %c0_i32 = arith.constant 0 : i32
    %c0_i32_0 = arith.constant 0 : i32
    return %c0_i32, %arg1 : i32, i32
  }
  func.func @transform_3(%arg0: i32, %arg1: i32) -> (i32, i32) {
    %c0_i32 = arith.constant 0 : i32
    return %arg0, %arg1 : i32, i32
  }
}

module attributes {stable_mosaic.version = 11 : i64} {
  func.func @_mm_kernel(%arg0: i32, %arg1: i32, %arg2: memref<2x67xf32, #tpu.memory_space<vmem>>, %arg3: memref<67x64xbf16, #tpu.memory_space<vmem>>, %arg4: memref<1x64xf32, #tpu.memory_space<vmem>>, %arg5: memref<2x64xf32, #tpu.memory_space<vmem>>) attributes {dimension_semantics = [#tpu.dimension_semantics<parallel>, #tpu.dimension_semantics<parallel>], iteration_bounds = array<i64: 1, 1>, scalar_prefetch = 0 : i64, scratch_operands = 0 : i64, tpu.core_type = #tpu.core_type<tc>, window_params = [{transform_indices = @transform_0, window_bounds = array<i64: 2, 67>}, {transform_indices = @transform_1, window_bounds = array<i64: 67, 64>}, {transform_indices = @transform_2, window_bounds = array<i64: 1, 64>}, {transform_indices = @transform_3, window_bounds = array<i64: 2, 64>}]} {
    %c0 = arith.constant 0 : index
    %c0_0 = arith.constant 0 : index
    %0 = vector.load %arg2[%c0, %c0_0] : memref<2x67xf32, #tpu.memory_space<vmem>>, vector<2x67xf32>
    %1 = arith.truncf %0 : vector<2x67xf32> to vector<2x67xbf16>
    %c0_1 = arith.constant 0 : index
    %c0_2 = arith.constant 0 : index
    %2 = vector.load %arg3[%c0_1, %c0_2] : memref<67x64xbf16, #tpu.memory_space<vmem>>, vector<67x64xbf16>
    %cst = arith.constant dense<0.000000e+00> : vector<2x64xf32>
    %3 = tpu.matmul %1, %2, %cst {dimension_numbers = #tpu.dot_dimension_numbers<[1], [0], [0], [1], [0, 0, 1, 1], [], []>} : vector<2x67xbf16>, vector<67x64xbf16>, vector<2x64xf32> -> vector<2x64xf32>
    %c0_3 = arith.constant 0 : index
    %c0_4 = arith.constant 0 : index
    %4 = vector.load %arg4[%c0_3, %c0_4] : memref<1x64xf32, #tpu.memory_space<vmem>>, vector<1x64xf32>
    %5 = vector.broadcast %4 : vector<1x64xf32> to vector<2x64xf32>
    %6 = arith.addf %3, %5 : vector<2x64xf32>
    %c0_5 = arith.constant 0 : index
    %c0_6 = arith.constant 0 : index
    %7 = vector.load %arg5[%c0_5, %c0_6] : memref<2x64xf32, #tpu.memory_space<vmem>>, vector<2x64xf32>
    tpu.vector_store %arg5[%c0_5, %c0_6], %6 {strides = array<i32>} : memref<2x64xf32, #tpu.memory_space<vmem>>, vector<2x64xf32>,
    return
  }
  func.func @transform_0(%arg0: i32, %arg1: i32) -> (i32, i32) {
    %c0_i32 = arith.constant 0 : i32
    %c0_i32_0 = arith.constant 0 : i32
    return %arg0, %c0_i32 : i32, i32
  }
  func.func @transform_1(%arg0: i32, %arg1: i32) -> (i32, i32) {
    %c0_i32 = arith.constant 0 : i32
    %c0_i32_0 = arith.constant 0 : i32
    return %c0_i32, %arg1 : i32, i32
  }
  func.func @transform_2(%arg0: i32, %arg1: i32) -> (i32, i32) {
    %c0_i32 = arith.constant 0 : i32
    %c0_i32_0 = arith.constant 0 : i32
    return %c0_i32, %arg1 : i32, i32
  }
  func.func @transform_3(%arg0: i32, %arg1: i32) -> (i32, i32) {
    %c0_i32 = arith.constant 0 : i32
    return %arg0, %arg1 : i32, i32
  }
}

module attributes {stable_mosaic.version = 11 : i64} {
  func.func @_mm_kernel(%arg0: i32, %arg1: i32, %arg2: memref<8x32xf32, #tpu.memory_space<vmem>>, %arg3: memref<32x128xbf16, #tpu.memory_space<vmem>>, %arg4: memref<1x128xf32, #tpu.memory_space<vmem>>, %arg5: memref<8x128xf32, #tpu.memory_space<vmem>>) attributes {dimension_semantics = [#tpu.dimension_semantics<parallel>, #tpu.dimension_semantics<parallel>], iteration_bounds = array<i64: 1, 1>, scalar_prefetch = 0 : i64, scratch_operands = 0 : i64, tpu.core_type = #tpu.core_type<tc>, window_params = [{transform_indices = @transform_0, window_bounds = array<i64: 8, 32>}, {transform_indices = @transform_1, window_bounds = array<i64: 32, 128>}, {transform_indices = @transform_2, window_bounds = array<i64: 1, 128>}, {transform_indices = @transform_3, window_bounds = array<i64: 8, 128>}]} {
    %c0 = arith.constant 0 : index
    %c0_0 = arith.constant 0 : index
    %0 = vector.load %arg2[%c0, %c0_0] : memref<8x32xf32, #tpu.memory_space<vmem>>, vector<8x32xf32>
    %1 = arith.truncf %0 : vector<8x32xf32> to vector<8x32xbf16>
    %c0_1 = arith.constant 0 : index
    %c0_2 = arith.constant 0 : index
    %2 = vector.load %arg3[%c0_1, %c0_2] : memref<32x128xbf16, #tpu.memory_space<vmem>>, vector<32x128xbf16>
    %cst = arith.constant dense<0.000000e+00> : vector<8x128xf32>
    %3 = tpu.matmul %1, %2, %cst {dimension_numbers = #tpu.dot_dimension_numbers<[1], [0], [0], [1], [0, 0, 1, 1], [], []>} : vector<8x32xbf16>, vector<32x128xbf16>, vector<8x128xf32> -> vector<8x128xf32>
    %c0_3 = arith.constant 0 : index
    %c0_4 = arith.constant 0 : index
    %4 = vector.load %arg4[%c0_3, %c0_4] : memref<1x128xf32, #tpu.memory_space<vmem>>, vector<1x128xf32>
    %5 = vector.broadcast %4 : vector<1x128xf32> to vector<8x128xf32>
    %6 = arith.addf %3, %5 : vector<8x128xf32>
    %c0_5 = arith.constant 0 : index
    %c0_6 = arith.constant 0 : index
    %7 = vector.load %arg5[%c0_5, %c0_6] : memref<8x128xf32, #tpu.memory_space<vmem>>, vector<8x128xf32>
    tpu.vector_store %arg5[%c0_5, %c0_6], %6 {strides = array<i32>} : memref<8x128xf32, #tpu.memory_space<vmem>>, vector<8x128xf32>,
    return
  }
  func.func @transform_0(%arg0: i32, %arg1: i32) -> (i32, i32) {
    %c0_i32 = arith.constant 0 : i32
    %c0_i32_0 = arith.constant 0 : i32
    return %arg0, %c0_i32 : i32, i32
  }
  func.func @transform_1(%arg0: i32, %arg1: i32) -> (i32, i32) {
    %c0_i32 = arith.constant 0 : i32
    %c0_i32_0 = arith.constant 0 : i32
    return %c0_i32, %arg1 : i32, i32
  }
  func.func @transform_2(%arg0: i32, %arg1: i32) -> (i32, i32) {
    %c0_i32 = arith.constant 0 : i32
    %c0_i32_0 = arith.constant 0 : i32
    return %c0_i32, %arg1 : i32, i32
  }
  func.func @transform_3(%arg0: i32, %arg1: i32) -> (i32, i32) {
    %c0_i32 = arith.constant 0 : i32
    return %arg0, %arg1 : i32, i32
  }
}

module attributes {stable_mosaic.version = 11 : i64} {
  func.func @_mm_kernel(%arg0: i32, %arg1: i32, %arg2: memref<2x67xf32, #tpu.memory_space<vmem>>, %arg3: memref<67x128xbf16, #tpu.memory_space<vmem>>, %arg4: memref<1x128xf32, #tpu.memory_space<vmem>>, %arg5: memref<2x128xf32, #tpu.memory_space<vmem>>) attributes {dimension_semantics = [#tpu.dimension_semantics<parallel>, #tpu.dimension_semantics<parallel>], iteration_bounds = array<i64: 1, 1>, scalar_prefetch = 0 : i64, scratch_operands = 0 : i64, tpu.core_type = #tpu.core_type<tc>, window_params = [{transform_indices = @transform_0, window_bounds = array<i64: 2, 67>}, {transform_indices = @transform_1, window_bounds = array<i64: 67, 128>}, {transform_indices = @transform_2, window_bounds = array<i64: 1, 128>}, {transform_indices = @transform_3, window_bounds = array<i64: 2, 128>}]} {
    %c0 = arith.constant 0 : index
    %c0_0 = arith.constant 0 : index
    %0 = vector.load %arg2[%c0, %c0_0] : memref<2x67xf32, #tpu.memory_space<vmem>>, vector<2x67xf32>
    %1 = arith.truncf %0 : vector<2x67xf32> to vector<2x67xbf16>
    %c0_1 = arith.constant 0 : index
    %c0_2 = arith.constant 0 : index
    %2 = vector.load %arg3[%c0_1, %c0_2] : memref<67x128xbf16, #tpu.memory_space<vmem>>, vector<67x128xbf16>
    %cst = arith.constant dense<0.000000e+00> : vector<2x128xf32>
    %3 = tpu.matmul %1, %2, %cst {dimension_numbers = #tpu.dot_dimension_numbers<[1], [0], [0], [1], [0, 0, 1, 1], [], []>} : vector<2x67xbf16>, vector<67x128xbf16>, vector<2x128xf32> -> vector<2x128xf32>
    %c0_3 = arith.constant 0 : index
    %c0_4 = arith.constant 0 : index
    %4 = vector.load %arg4[%c0_3, %c0_4] : memref<1x128xf32, #tpu.memory_space<vmem>>, vector<1x128xf32>
    %5 = vector.broadcast %4 : vector<1x128xf32> to vector<2x128xf32>
    %6 = arith.addf %3, %5 : vector<2x128xf32>
    %c0_5 = arith.constant 0 : index
    %c0_6 = arith.constant 0 : index
    %7 = vector.load %arg5[%c0_5, %c0_6] : memref<2x128xf32, #tpu.memory_space<vmem>>, vector<2x128xf32>
    tpu.vector_store %arg5[%c0_5, %c0_6], %6 {strides = array<i32>} : memref<2x128xf32, #tpu.memory_space<vmem>>, vector<2x128xf32>,
    return
  }
  func.func @transform_0(%arg0: i32, %arg1: i32) -> (i32, i32) {
    %c0_i32 = arith.constant 0 : i32
    %c0_i32_0 = arith.constant 0 : i32
    return %arg0, %c0_i32 : i32, i32
  }
  func.func @transform_1(%arg0: i32, %arg1: i32) -> (i32, i32) {
    %c0_i32 = arith.constant 0 : i32
    %c0_i32_0 = arith.constant 0 : i32
    return %c0_i32, %arg1 : i32, i32
  }
  func.func @transform_2(%arg0: i32, %arg1: i32) -> (i32, i32) {
    %c0_i32 = arith.constant 0 : i32
    %c0_i32_0 = arith.constant 0 : i32
    return %c0_i32, %arg1 : i32, i32
  }
  func.func @transform_3(%arg0: i32, %arg1: i32) -> (i32, i32) {
    %c0_i32 = arith.constant 0 : i32
    return %arg0, %arg1 : i32, i32
  }
}

module attributes {stable_mosaic.version = 11 : i64} {
  func.func @_ln_mm_kernel(%arg0: i32, %arg1: i32, %arg2: memref<10x128xf32, #tpu.memory_space<vmem>>, %arg3: memref<1x128xf32, #tpu.memory_space<vmem>>, %arg4: memref<1x128xf32, #tpu.memory_space<vmem>>, %arg5: memref<128x384xbf16, #tpu.memory_space<vmem>>, %arg6: memref<1x384xf32, #tpu.memory_space<vmem>>, %arg7: memref<10x384xf32, #tpu.memory_space<vmem>>) attributes {dimension_semantics = [#tpu.dimension_semantics<parallel>, #tpu.dimension_semantics<parallel>], iteration_bounds = array<i64: 1, 1>, scalar_prefetch = 0 : i64, scratch_operands = 0 : i64, tpu.core_type = #tpu.core_type<tc>, window_params = [{transform_indices = @transform_0, window_bounds = array<i64: 10, 128>}, {pipeline_mode = #tpu.pipeline_mode<synchronous>, transform_indices = @transform_1, window_bounds = array<i64: 1, 128>}, {pipeline_mode = #tpu.pipeline_mode<synchronous>, transform_indices = @transform_2, window_bounds = array<i64: 1, 128>}, {transform_indices = @transform_3, window_bounds = array<i64: 128, 384>}, {transform_indices = @transform_4, window_bounds = array<i64: 1, 384>}, {transform_indices = @transform_5, window_bounds = array<i64: 10, 384>}]} {
    %c0 = arith.constant 0 : index
    %c0_0 = arith.constant 0 : index
    %0 = vector.load %arg2[%c0, %c0_0] : memref<10x128xf32, #tpu.memory_space<vmem>>, vector<10x128xf32>
    %cst = arith.constant dense<0.000000e+00> : vector<10xf32>
    %1 = vector.multi_reduction <add>, %0, %cst [1] : vector<10x128xf32> to vector<10xf32>
    %2 = vector.shape_cast %1 : vector<10xf32> to vector<10x1xf32>
    %cst_1 = arith.constant 1.280000e+02 : f32
    %3 = vector.broadcast %cst_1 : f32 to vector<10x1xf32>
    %4 = arith.divf %2, %3 : vector<10x1xf32>
    %5 = vector.broadcast %4 : vector<10x1xf32> to vector<10x128xf32>
    %6 = arith.subf %0, %5 : vector<10x128xf32>
    %7 = arith.mulf %6, %6 : vector<10x128xf32>
    %cst_2 = arith.constant dense<0.000000e+00> : vector<10xf32>
    %8 = vector.multi_reduction <add>, %7, %cst_2 [1] : vector<10x128xf32> to vector<10xf32>
    %9 = vector.shape_cast %8 : vector<10xf32> to vector<10x1xf32>
    %cst_3 = arith.constant 1.280000e+02 : f32
    %10 = vector.broadcast %cst_3 : f32 to vector<10x1xf32>
    %11 = arith.divf %9, %10 : vector<10x1xf32>
    %12 = vector.broadcast %4 : vector<10x1xf32> to vector<10x128xf32>
    %13 = arith.subf %0, %12 : vector<10x128xf32>
    %cst_4 = arith.constant 9.99999974E-6 : f32
    %14 = vector.broadcast %cst_4 : f32 to vector<10x1xf32>
    %15 = arith.addf %11, %14 : vector<10x1xf32>
    %16 = math.rsqrt %15 : vector<10x1xf32>
    %17 = vector.broadcast %16 : vector<10x1xf32> to vector<10x128xf32>
    %18 = arith.mulf %13, %17 : vector<10x128xf32>
    %c0_5 = arith.constant 0 : index
    %c0_6 = arith.constant 0 : index
    %19 = vector.load %arg3[%c0_5, %c0_6] : memref<1x128xf32, #tpu.memory_space<vmem>>, vector<1x128xf32>
    %20 = vector.broadcast %19 : vector<1x128xf32> to vector<10x128xf32>
    %21 = arith.mulf %18, %20 : vector<10x128xf32>
    %c0_7 = arith.constant 0 : index
    %c0_8 = arith.constant 0 : index
    %22 = vector.load %arg4[%c0_7, %c0_8] : memref<1x128xf32, #tpu.memory_space<vmem>>, vector<1x128xf32>
    %23 = vector.broadcast %22 : vector<1x128xf32> to vector<10x128xf32>
    %24 = arith.addf %21, %23 : vector<10x128xf32>
    %25 = arith.truncf %24 : vector<10x128xf32> to vector<10x128xbf16>
    %c0_9 = arith.constant 0 : index
    %c0_10 = arith.constant 0 : index
    %26 = vector.load %arg5[%c0_9, %c0_10] : memref<128x384xbf16, #tpu.memory_space<vmem>>, vector<128x384xbf16>
    %cst_11 = arith.constant dense<0.000000e+00> : vector<10x384xf32>
    %27 = tpu.matmul %25, %26, %cst_11 {dimension_numbers = #tpu.dot_dimension_numbers<[1], [0], [0], [1], [0, 0, 1, 1], [], []>} : vector<10x128xbf16>, vector<128x384xbf16>, vector<10x384xf32> -> vector<10x384xf32>
    %c0_12 = arith.constant 0 : index
    %c0_13 = arith.constant 0 : index
    %28 = vector.load %arg6[%c0_12, %c0_13] : memref<1x384xf32, #tpu.memory_space<vmem>>, vector<1x384xf32>
    %29 = vector.broadcast %28 : vector<1x384xf32> to vector<10x384xf32>
    %30 = arith.addf %27, %29 : vector<10x384xf32>
    %c0_14 = arith.constant 0 : index
    %c0_15 = arith.constant 0 : index
    %31 = vector.load %arg7[%c0_14, %c0_15] : memref<10x384xf32, #tpu.memory_space<vmem>>, vector<10x384xf32>
    tpu.vector_store %arg7[%c0_14, %c0_15], %30 {strides = array<i32>} : memref<10x384xf32, #tpu.memory_space<vmem>>, vector<10x384xf32>,
    return
  }
  func.func @transform_0(%arg0: i32, %arg1: i32) -> (i32, i32) {
    %c0_i32 = arith.constant 0 : i32
    %c0_i32_0 = arith.constant 0 : i32
    return %arg0, %c0_i32 : i32, i32
  }
  func.func @transform_1(%arg0: i32, %arg1: i32) -> (i32, i32) {
    %c0_i32 = arith.constant 0 : i32
    %c0_i32_0 = arith.constant 0 : i32
    %c0_i32_1 = arith.constant 0 : i32
    return %c0_i32, %c0_i32_0 : i32, i32
  }
  func.func @transform_2(%arg0: i32, %arg1: i32) -> (i32, i32) {
    %c0_i32 = arith.constant 0 : i32
    %c0_i32_0 = arith.constant 0 : i32
    %c0_i32_1 = arith.constant 0 : i32
    return %c0_i32, %c0_i32_0 : i32, i32
  }
  func.func @transform_3(%arg0: i32, %arg1: i32) -> (i32, i32) {
    %c0_i32 = arith.constant 0 : i32
    %c0_i32_0 = arith.constant 0 : i32
    return %c0_i32, %arg1 : i32, i32
  }
  func.func @transform_4(%arg0: i32, %arg1: i32) -> (i32, i32) {
    %c0_i32 = arith.constant 0 : i32
    %c0_i32_0 = arith.constant 0 : i32
    return %c0_i32, %arg1 : i32, i32
  }
  func.func @transform_5(%arg0: i32, %arg1: i32) -> (i32, i32) {
    %c0_i32 = arith.constant 0 : i32
    return %arg0, %arg1 : i32, i32
  }
}

module attributes {stable_mosaic.version = 11 : i64} {
  func.func @_attn_kernel(%arg0: i32, %arg1: memref<1x8x5x16xf32, #tpu.memory_space<vmem>>, %arg2: memref<1x8x5x16xf32, #tpu.memory_space<vmem>>, %arg3: memref<1x8x5x16xf32, #tpu.memory_space<vmem>>, %arg4: memref<1x8x5x16xf32, #tpu.memory_space<vmem>>) attributes {dimension_semantics = [#tpu.dimension_semantics<parallel>], iteration_bounds = array<i64: 2>, scalar_prefetch = 0 : i64, scratch_operands = 0 : i64, tpu.core_type = #tpu.core_type<tc>, window_params = [{transform_indices = @transform_0, window_bounds = array<i64: 1, 8, 5, 16>}, {transform_indices = @transform_1, window_bounds = array<i64: 1, 8, 5, 16>}, {transform_indices = @transform_2, window_bounds = array<i64: 1, 8, 5, 16>}, {transform_indices = @transform_3, window_bounds = array<i64: 1, 8, 5, 16>}]} {
    %c0 = arith.constant 0 : index
    %c0_0 = arith.constant 0 : index
    %c0_1 = arith.constant 0 : index
    %c0_2 = arith.constant 0 : index
    %0 = vector.load %arg1[%c0, %c0_0, %c0_1, %c0_2] : memref<1x8x5x16xf32, #tpu.memory_space<vmem>>, vector<1x8x5x16xf32>
    %1 = vector.shape_cast %0 : vector<1x8x5x16xf32> to vector<8x5x16xf32>
    %2 = arith.truncf %1 : vector<8x5x16xf32> to vector<8x5x16xbf16>
    %c0_3 = arith.constant 0 : index
    %c0_4 = arith.constant 0 : index
    %c0_5 = arith.constant 0 : index
    %c0_6 = arith.constant 0 : index
    %3 = vector.load %arg2[%c0_3, %c0_4, %c0_5, %c0_6] : memref<1x8x5x16xf32, #tpu.memory_space<vmem>>, vector<1x8x5x16xf32>
    %4 = vector.shape_cast %3 : vector<1x8x5x16xf32> to vector<8x5x16xf32>
    %5 = arith.truncf %4 : vector<8x5x16xf32> to vector<8x5x16xbf16>
    %c0_7 = arith.constant 0 : index
    %c0_8 = arith.constant 0 : index
    %c0_9 = arith.constant 0 : index
    %c0_10 = arith.constant 0 : index
    %6 = vector.load %arg3[%c0_7, %c0_8, %c0_9, %c0_10] : memref<1x8x5x16xf32, #tpu.memory_space<vmem>>, vector<1x8x5x16xf32>
    %7 = vector.shape_cast %6 : vector<1x8x5x16xf32> to vector<8x5x16xf32>
    %8 = arith.truncf %7 : vector<8x5x16xf32> to vector<8x5x16xbf16>
    "tpu.trace_start"() <{level = 10 : i32, message = "hqd,hkd->hqk"}> : () -> ()
    %cst = arith.constant dense<0.000000e+00> : vector<8x5x5xf32>
    %9 = tpu.matmul %2, %5, %cst {dimension_numbers = #tpu.dot_dimension_numbers<[2], [2], [1], [1], [0, 0, 0, 1, 1, 1], [0], [0]>} : vector<8x5x16xbf16>, vector<8x5x16xbf16>, vector<8x5x5xf32> -> vector<8x5x5xf32>
    "tpu.trace_stop"() : () -> ()
    %cst_11 = arith.constant 2.500000e-01 : f32
    %10 = vector.broadcast %cst_11 : f32 to vector<8x5x5xf32>
    %11 = arith.mulf %9, %10 : vector<8x5x5xf32>
    %cst_12 = arith.constant dense<0xFF800000> : vector<8x5xf32>
    %12 = vector.multi_reduction <maximumf>, %11, %cst_12 [2] : vector<8x5x5xf32> to vector<8x5xf32>
    %13 = vector.shape_cast %12 : vector<8x5xf32> to vector<8x5x1xf32>
    %14 = vector.broadcast %13 : vector<8x5x1xf32> to vector<8x5x5xf32>
    %15 = arith.subf %11, %14 : vector<8x5x5xf32>
    %16 = math.exp %15 : vector<8x5x5xf32>
    %cst_13 = arith.constant dense<0.000000e+00> : vector<8x5xf32>
    %17 = vector.multi_reduction <add>, %16, %cst_13 [2] : vector<8x5x5xf32> to vector<8x5xf32>
    %18 = vector.shape_cast %17 : vector<8x5xf32> to vector<8x5x1xf32>
    %19 = tpu.reciprocal %18 {approx = true} : vector<8x5x1xf32> -> vector<8x5x1xf32>
    %20 = vector.broadcast %19 : vector<8x5x1xf32> to vector<8x5x5xf32>
    %21 = arith.mulf %16, %20 : vector<8x5x5xf32>
    %22 = arith.truncf %21 : vector<8x5x5xf32> to vector<8x5x5xbf16>
    "tpu.trace_start"() <{level = 10 : i32, message = "hqk,hkd->hqd"}> : () -> ()
    %cst_14 = arith.constant dense<0.000000e+00> : vector<8x5x16xf32>
    %23 = tpu.matmul %22, %8, %cst_14 {dimension_numbers = #tpu.dot_dimension_numbers<[2], [1], [1], [2], [0, 0, 0, 1, 1, 2], [0], [0]>} : vector<8x5x5xbf16>, vector<8x5x16xbf16>, vector<8x5x16xf32> -> vector<8x5x16xf32>
    "tpu.trace_stop"() : () -> ()
    %c0_15 = arith.constant 0 : index
    %c0_16 = arith.constant 0 : index
    %c0_17 = arith.constant 0 : index
    %c0_18 = arith.constant 0 : index
    %24 = vector.load %arg4[%c0_15, %c0_16, %c0_17, %c0_18] : memref<1x8x5x16xf32, #tpu.memory_space<vmem>>, vector<1x8x5x16xf32>
    %25 = vector.shape_cast %24 : vector<1x8x5x16xf32> to vector<8x5x16xf32>
    %26 = vector.shape_cast %23 : vector<8x5x16xf32> to vector<1x8x5x16xf32>
    tpu.vector_store %arg4[%c0_15, %c0_16, %c0_17, %c0_18], %26 {strides = array<i32>} : memref<1x8x5x16xf32, #tpu.memory_space<vmem>>, vector<1x8x5x16xf32>,
    return
  }
  func.func @transform_0(%arg0: i32) -> (i32, i32, i32, i32) {
    %c0_i32 = arith.constant 0 : i32
    %c0_i32_0 = arith.constant 0 : i32
    %c0_i32_1 = arith.constant 0 : i32
    %c0_i32_2 = arith.constant 0 : i32
    return %arg0, %c0_i32, %c0_i32_0, %c0_i32_1 : i32, i32, i32, i32
  }
  func.func @transform_1(%arg0: i32) -> (i32, i32, i32, i32) {
    %c0_i32 = arith.constant 0 : i32
    %c0_i32_0 = arith.constant 0 : i32
    %c0_i32_1 = arith.constant 0 : i32
    %c0_i32_2 = arith.constant 0 : i32
    return %arg0, %c0_i32, %c0_i32_0, %c0_i32_1 : i32, i32, i32, i32
  }
  func.func @transform_2(%arg0: i32) -> (i32, i32, i32, i32) {
    %c0_i32 = arith.constant 0 : i32
    %c0_i32_0 = arith.constant 0 : i32
    %c0_i32_1 = arith.constant 0 : i32
    %c0_i32_2 = arith.constant 0 : i32
    return %arg0, %c0_i32, %c0_i32_0, %c0_i32_1 : i32, i32, i32, i32
  }
  func.func @transform_3(%arg0: i32) -> (i32, i32, i32, i32) {
    %c0_i32 = arith.constant 0 : i32
    %c0_i32_0 = arith.constant 0 : i32
    %c0_i32_1 = arith.constant 0 : i32
    %c0_i32_2 = arith.constant 0 : i32
    return %arg0, %c0_i32, %c0_i32_0, %c0_i32_1 : i32, i32, i32, i32
  }
}

module attributes {stable_mosaic.version = 11 : i64} {
  func.func @_mm_kernel(%arg0: i32, %arg1: i32, %arg2: memref<10x128xf32, #tpu.memory_space<vmem>>, %arg3: memref<128x128xbf16, #tpu.memory_space<vmem>>, %arg4: memref<1x128xf32, #tpu.memory_space<vmem>>, %arg5: memref<10x128xf32, #tpu.memory_space<vmem>>) attributes {dimension_semantics = [#tpu.dimension_semantics<parallel>, #tpu.dimension_semantics<parallel>], iteration_bounds = array<i64: 1, 1>, scalar_prefetch = 0 : i64, scratch_operands = 0 : i64, tpu.core_type = #tpu.core_type<tc>, window_params = [{transform_indices = @transform_0, window_bounds = array<i64: 10, 128>}, {transform_indices = @transform_1, window_bounds = array<i64: 128, 128>}, {transform_indices = @transform_2, window_bounds = array<i64: 1, 128>}, {transform_indices = @transform_3, window_bounds = array<i64: 10, 128>}]} {
    %c0 = arith.constant 0 : index
    %c0_0 = arith.constant 0 : index
    %0 = vector.load %arg2[%c0, %c0_0] : memref<10x128xf32, #tpu.memory_space<vmem>>, vector<10x128xf32>
    %1 = arith.truncf %0 : vector<10x128xf32> to vector<10x128xbf16>
    %c0_1 = arith.constant 0 : index
    %c0_2 = arith.constant 0 : index
    %2 = vector.load %arg3[%c0_1, %c0_2] : memref<128x128xbf16, #tpu.memory_space<vmem>>, vector<128x128xbf16>
    %cst = arith.constant dense<0.000000e+00> : vector<10x128xf32>
    %3 = tpu.matmul %1, %2, %cst {dimension_numbers = #tpu.dot_dimension_numbers<[1], [0], [0], [1], [0, 0, 1, 1], [], []>} : vector<10x128xbf16>, vector<128x128xbf16>, vector<10x128xf32> -> vector<10x128xf32>
    %c0_3 = arith.constant 0 : index
    %c0_4 = arith.constant 0 : index
    %4 = vector.load %arg4[%c0_3, %c0_4] : memref<1x128xf32, #tpu.memory_space<vmem>>, vector<1x128xf32>
    %5 = vector.broadcast %4 : vector<1x128xf32> to vector<10x128xf32>
    %6 = arith.addf %3, %5 : vector<10x128xf32>
    %c0_5 = arith.constant 0 : index
    %c0_6 = arith.constant 0 : index
    %7 = vector.load %arg5[%c0_5, %c0_6] : memref<10x128xf32, #tpu.memory_space<vmem>>, vector<10x128xf32>
    tpu.vector_store %arg5[%c0_5, %c0_6], %6 {strides = array<i32>} : memref<10x128xf32, #tpu.memory_space<vmem>>, vector<10x128xf32>,
    return
  }
  func.func @transform_0(%arg0: i32, %arg1: i32) -> (i32, i32) {
    %c0_i32 = arith.constant 0 : i32
    %c0_i32_0 = arith.constant 0 : i32
    return %arg0, %c0_i32 : i32, i32
  }
  func.func @transform_1(%arg0: i32, %arg1: i32) -> (i32, i32) {
    %c0_i32 = arith.constant 0 : i32
    %c0_i32_0 = arith.constant 0 : i32
    return %c0_i32, %arg1 : i32, i32
  }
  func.func @transform_2(%arg0: i32, %arg1: i32) -> (i32, i32) {
    %c0_i32 = arith.constant 0 : i32
    %c0_i32_0 = arith.constant 0 : i32
    return %c0_i32, %arg1 : i32, i32
  }
  func.func @transform_3(%arg0: i32, %arg1: i32) -> (i32, i32) {
    %c0_i32 = arith.constant 0 : i32
    return %arg0, %arg1 : i32, i32
  }
}

module attributes {stable_mosaic.version = 11 : i64} {
  func.func @_ln_mm_kernel(%arg0: i32, %arg1: i32, %arg2: memref<10x128xf32, #tpu.memory_space<vmem>>, %arg3: memref<1x128xf32, #tpu.memory_space<vmem>>, %arg4: memref<1x128xf32, #tpu.memory_space<vmem>>, %arg5: memref<128x256xbf16, #tpu.memory_space<vmem>>, %arg6: memref<1x256xf32, #tpu.memory_space<vmem>>, %arg7: memref<10x256xf32, #tpu.memory_space<vmem>>) attributes {dimension_semantics = [#tpu.dimension_semantics<parallel>, #tpu.dimension_semantics<parallel>], iteration_bounds = array<i64: 1, 1>, scalar_prefetch = 0 : i64, scratch_operands = 0 : i64, tpu.core_type = #tpu.core_type<tc>, window_params = [{transform_indices = @transform_0, window_bounds = array<i64: 10, 128>}, {pipeline_mode = #tpu.pipeline_mode<synchronous>, transform_indices = @transform_1, window_bounds = array<i64: 1, 128>}, {pipeline_mode = #tpu.pipeline_mode<synchronous>, transform_indices = @transform_2, window_bounds = array<i64: 1, 128>}, {transform_indices = @transform_3, window_bounds = array<i64: 128, 256>}, {transform_indices = @transform_4, window_bounds = array<i64: 1, 256>}, {transform_indices = @transform_5, window_bounds = array<i64: 10, 256>}]} {
    %c0 = arith.constant 0 : index
    %c0_0 = arith.constant 0 : index
    %0 = vector.load %arg2[%c0, %c0_0] : memref<10x128xf32, #tpu.memory_space<vmem>>, vector<10x128xf32>
    %cst = arith.constant dense<0.000000e+00> : vector<10xf32>
    %1 = vector.multi_reduction <add>, %0, %cst [1] : vector<10x128xf32> to vector<10xf32>
    %2 = vector.shape_cast %1 : vector<10xf32> to vector<10x1xf32>
    %cst_1 = arith.constant 1.280000e+02 : f32
    %3 = vector.broadcast %cst_1 : f32 to vector<10x1xf32>
    %4 = arith.divf %2, %3 : vector<10x1xf32>
    %5 = vector.broadcast %4 : vector<10x1xf32> to vector<10x128xf32>
    %6 = arith.subf %0, %5 : vector<10x128xf32>
    %7 = arith.mulf %6, %6 : vector<10x128xf32>
    %cst_2 = arith.constant dense<0.000000e+00> : vector<10xf32>
    %8 = vector.multi_reduction <add>, %7, %cst_2 [1] : vector<10x128xf32> to vector<10xf32>
    %9 = vector.shape_cast %8 : vector<10xf32> to vector<10x1xf32>
    %cst_3 = arith.constant 1.280000e+02 : f32
    %10 = vector.broadcast %cst_3 : f32 to vector<10x1xf32>
    %11 = arith.divf %9, %10 : vector<10x1xf32>
    %12 = vector.broadcast %4 : vector<10x1xf32> to vector<10x128xf32>
    %13 = arith.subf %0, %12 : vector<10x128xf32>
    %cst_4 = arith.constant 9.99999974E-6 : f32
    %14 = vector.broadcast %cst_4 : f32 to vector<10x1xf32>
    %15 = arith.addf %11, %14 : vector<10x1xf32>
    %16 = math.rsqrt %15 : vector<10x1xf32>
    %17 = vector.broadcast %16 : vector<10x1xf32> to vector<10x128xf32>
    %18 = arith.mulf %13, %17 : vector<10x128xf32>
    %c0_5 = arith.constant 0 : index
    %c0_6 = arith.constant 0 : index
    %19 = vector.load %arg3[%c0_5, %c0_6] : memref<1x128xf32, #tpu.memory_space<vmem>>, vector<1x128xf32>
    %20 = vector.broadcast %19 : vector<1x128xf32> to vector<10x128xf32>
    %21 = arith.mulf %18, %20 : vector<10x128xf32>
    %c0_7 = arith.constant 0 : index
    %c0_8 = arith.constant 0 : index
    %22 = vector.load %arg4[%c0_7, %c0_8] : memref<1x128xf32, #tpu.memory_space<vmem>>, vector<1x128xf32>
    %23 = vector.broadcast %22 : vector<1x128xf32> to vector<10x128xf32>
    %24 = arith.addf %21, %23 : vector<10x128xf32>
    %25 = arith.truncf %24 : vector<10x128xf32> to vector<10x128xbf16>
    %c0_9 = arith.constant 0 : index
    %c0_10 = arith.constant 0 : index
    %26 = vector.load %arg5[%c0_9, %c0_10] : memref<128x256xbf16, #tpu.memory_space<vmem>>, vector<128x256xbf16>
    %cst_11 = arith.constant dense<0.000000e+00> : vector<10x256xf32>
    %27 = tpu.matmul %25, %26, %cst_11 {dimension_numbers = #tpu.dot_dimension_numbers<[1], [0], [0], [1], [0, 0, 1, 1], [], []>} : vector<10x128xbf16>, vector<128x256xbf16>, vector<10x256xf32> -> vector<10x256xf32>
    %c0_12 = arith.constant 0 : index
    %c0_13 = arith.constant 0 : index
    %28 = vector.load %arg6[%c0_12, %c0_13] : memref<1x256xf32, #tpu.memory_space<vmem>>, vector<1x256xf32>
    %29 = vector.broadcast %28 : vector<1x256xf32> to vector<10x256xf32>
    %30 = arith.addf %27, %29 : vector<10x256xf32>
    %cst_14 = arith.constant 0.000000e+00 : f32
    %31 = vector.broadcast %cst_14 : f32 to vector<10x256xf32>
    %32 = arith.maximumf %30, %31 : vector<10x256xf32>
    %c0_15 = arith.constant 0 : index
    %c0_16 = arith.constant 0 : index
    %33 = vector.load %arg7[%c0_15, %c0_16] : memref<10x256xf32, #tpu.memory_space<vmem>>, vector<10x256xf32>
    tpu.vector_store %arg7[%c0_15, %c0_16], %32 {strides = array<i32>} : memref<10x256xf32, #tpu.memory_space<vmem>>, vector<10x256xf32>,
    return
  }
  func.func @transform_0(%arg0: i32, %arg1: i32) -> (i32, i32) {
    %c0_i32 = arith.constant 0 : i32
    %c0_i32_0 = arith.constant 0 : i32
    return %arg0, %c0_i32 : i32, i32
  }
  func.func @transform_1(%arg0: i32, %arg1: i32) -> (i32, i32) {
    %c0_i32 = arith.constant 0 : i32
    %c0_i32_0 = arith.constant 0 : i32
    %c0_i32_1 = arith.constant 0 : i32
    return %c0_i32, %c0_i32_0 : i32, i32
  }
  func.func @transform_2(%arg0: i32, %arg1: i32) -> (i32, i32) {
    %c0_i32 = arith.constant 0 : i32
    %c0_i32_0 = arith.constant 0 : i32
    %c0_i32_1 = arith.constant 0 : i32
    return %c0_i32, %c0_i32_0 : i32, i32
  }
  func.func @transform_3(%arg0: i32, %arg1: i32) -> (i32, i32) {
    %c0_i32 = arith.constant 0 : i32
    %c0_i32_0 = arith.constant 0 : i32
    return %c0_i32, %arg1 : i32, i32
  }
  func.func @transform_4(%arg0: i32, %arg1: i32) -> (i32, i32) {
    %c0_i32 = arith.constant 0 : i32
    %c0_i32_0 = arith.constant 0 : i32
    return %c0_i32, %arg1 : i32, i32
  }
  func.func @transform_5(%arg0: i32, %arg1: i32) -> (i32, i32) {
    %c0_i32 = arith.constant 0 : i32
    return %arg0, %arg1 : i32, i32
  }
}

module attributes {stable_mosaic.version = 11 : i64} {
  func.func @_mm_kernel(%arg0: i32, %arg1: i32, %arg2: memref<10x256xf32, #tpu.memory_space<vmem>>, %arg3: memref<256x128xbf16, #tpu.memory_space<vmem>>, %arg4: memref<1x128xf32, #tpu.memory_space<vmem>>, %arg5: memref<10x128xf32, #tpu.memory_space<vmem>>) attributes {dimension_semantics = [#tpu.dimension_semantics<parallel>, #tpu.dimension_semantics<parallel>], iteration_bounds = array<i64: 1, 1>, scalar_prefetch = 0 : i64, scratch_operands = 0 : i64, tpu.core_type = #tpu.core_type<tc>, window_params = [{transform_indices = @transform_0, window_bounds = array<i64: 10, 256>}, {transform_indices = @transform_1, window_bounds = array<i64: 256, 128>}, {transform_indices = @transform_2, window_bounds = array<i64: 1, 128>}, {transform_indices = @transform_3, window_bounds = array<i64: 10, 128>}]} {
    %c0 = arith.constant 0 : index
    %c0_0 = arith.constant 0 : index
    %0 = vector.load %arg2[%c0, %c0_0] : memref<10x256xf32, #tpu.memory_space<vmem>>, vector<10x256xf32>
    %1 = arith.truncf %0 : vector<10x256xf32> to vector<10x256xbf16>
    %c0_1 = arith.constant 0 : index
    %c0_2 = arith.constant 0 : index
    %2 = vector.load %arg3[%c0_1, %c0_2] : memref<256x128xbf16, #tpu.memory_space<vmem>>, vector<256x128xbf16>
    %cst = arith.constant dense<0.000000e+00> : vector<10x128xf32>
    %3 = tpu.matmul %1, %2, %cst {dimension_numbers = #tpu.dot_dimension_numbers<[1], [0], [0], [1], [0, 0, 1, 1], [], []>} : vector<10x256xbf16>, vector<256x128xbf16>, vector<10x128xf32> -> vector<10x128xf32>
    %c0_3 = arith.constant 0 : index
    %c0_4 = arith.constant 0 : index
    %4 = vector.load %arg4[%c0_3, %c0_4] : memref<1x128xf32, #tpu.memory_space<vmem>>, vector<1x128xf32>
    %5 = vector.broadcast %4 : vector<1x128xf32> to vector<10x128xf32>
    %6 = arith.addf %3, %5 : vector<10x128xf32>
    %c0_5 = arith.constant 0 : index
    %c0_6 = arith.constant 0 : index
    %7 = vector.load %arg5[%c0_5, %c0_6] : memref<10x128xf32, #tpu.memory_space<vmem>>, vector<10x128xf32>
    tpu.vector_store %arg5[%c0_5, %c0_6], %6 {strides = array<i32>} : memref<10x128xf32, #tpu.memory_space<vmem>>, vector<10x128xf32>,
    return
  }
  func.func @transform_0(%arg0: i32, %arg1: i32) -> (i32, i32) {
    %c0_i32 = arith.constant 0 : i32
    %c0_i32_0 = arith.constant 0 : i32
    return %arg0, %c0_i32 : i32, i32
  }
  func.func @transform_1(%arg0: i32, %arg1: i32) -> (i32, i32) {
    %c0_i32 = arith.constant 0 : i32
    %c0_i32_0 = arith.constant 0 : i32
    return %c0_i32, %arg1 : i32, i32
  }
  func.func @transform_2(%arg0: i32, %arg1: i32) -> (i32, i32) {
    %c0_i32 = arith.constant 0 : i32
    %c0_i32_0 = arith.constant 0 : i32
    return %c0_i32, %arg1 : i32, i32
  }
  func.func @transform_3(%arg0: i32, %arg1: i32) -> (i32, i32) {
    %c0_i32 = arith.constant 0 : i32
    return %arg0, %arg1 : i32, i32
  }
}

module attributes {stable_mosaic.version = 11 : i64} {
  func.func @_ln_mm_kernel(%arg0: i32, %arg1: i32, %arg2: memref<8x128xf32, #tpu.memory_space<vmem>>, %arg3: memref<1x128xf32, #tpu.memory_space<vmem>>, %arg4: memref<1x128xf32, #tpu.memory_space<vmem>>, %arg5: memref<128x32xbf16, #tpu.memory_space<vmem>>, %arg6: memref<1x32xf32, #tpu.memory_space<vmem>>, %arg7: memref<8x32xf32, #tpu.memory_space<vmem>>) attributes {dimension_semantics = [#tpu.dimension_semantics<parallel>, #tpu.dimension_semantics<parallel>], iteration_bounds = array<i64: 1, 1>, scalar_prefetch = 0 : i64, scratch_operands = 0 : i64, tpu.core_type = #tpu.core_type<tc>, window_params = [{transform_indices = @transform_0, window_bounds = array<i64: 8, 128>}, {pipeline_mode = #tpu.pipeline_mode<synchronous>, transform_indices = @transform_1, window_bounds = array<i64: 1, 128>}, {pipeline_mode = #tpu.pipeline_mode<synchronous>, transform_indices = @transform_2, window_bounds = array<i64: 1, 128>}, {transform_indices = @transform_3, window_bounds = array<i64: 128, 32>}, {transform_indices = @transform_4, window_bounds = array<i64: 1, 32>}, {transform_indices = @transform_5, window_bounds = array<i64: 8, 32>}]} {
    %c0 = arith.constant 0 : index
    %c0_0 = arith.constant 0 : index
    %0 = vector.load %arg2[%c0, %c0_0] : memref<8x128xf32, #tpu.memory_space<vmem>>, vector<8x128xf32>
    %cst = arith.constant dense<0.000000e+00> : vector<8xf32>
    %1 = vector.multi_reduction <add>, %0, %cst [1] : vector<8x128xf32> to vector<8xf32>
    %2 = vector.shape_cast %1 : vector<8xf32> to vector<8x1xf32>
    %cst_1 = arith.constant 1.280000e+02 : f32
    %3 = vector.broadcast %cst_1 : f32 to vector<8x1xf32>
    %4 = arith.divf %2, %3 : vector<8x1xf32>
    %5 = vector.broadcast %4 : vector<8x1xf32> to vector<8x128xf32>
    %6 = arith.subf %0, %5 : vector<8x128xf32>
    %7 = arith.mulf %6, %6 : vector<8x128xf32>
    %cst_2 = arith.constant dense<0.000000e+00> : vector<8xf32>
    %8 = vector.multi_reduction <add>, %7, %cst_2 [1] : vector<8x128xf32> to vector<8xf32>
    %9 = vector.shape_cast %8 : vector<8xf32> to vector<8x1xf32>
    %cst_3 = arith.constant 1.280000e+02 : f32
    %10 = vector.broadcast %cst_3 : f32 to vector<8x1xf32>
    %11 = arith.divf %9, %10 : vector<8x1xf32>
    %12 = vector.broadcast %4 : vector<8x1xf32> to vector<8x128xf32>
    %13 = arith.subf %0, %12 : vector<8x128xf32>
    %cst_4 = arith.constant 9.99999974E-6 : f32
    %14 = vector.broadcast %cst_4 : f32 to vector<8x1xf32>
    %15 = arith.addf %11, %14 : vector<8x1xf32>
    %16 = math.rsqrt %15 : vector<8x1xf32>
    %17 = vector.broadcast %16 : vector<8x1xf32> to vector<8x128xf32>
    %18 = arith.mulf %13, %17 : vector<8x128xf32>
    %c0_5 = arith.constant 0 : index
    %c0_6 = arith.constant 0 : index
    %19 = vector.load %arg3[%c0_5, %c0_6] : memref<1x128xf32, #tpu.memory_space<vmem>>, vector<1x128xf32>
    %20 = vector.broadcast %19 : vector<1x128xf32> to vector<8x128xf32>
    %21 = arith.mulf %18, %20 : vector<8x128xf32>
    %c0_7 = arith.constant 0 : index
    %c0_8 = arith.constant 0 : index
    %22 = vector.load %arg4[%c0_7, %c0_8] : memref<1x128xf32, #tpu.memory_space<vmem>>, vector<1x128xf32>
    %23 = vector.broadcast %22 : vector<1x128xf32> to vector<8x128xf32>
    %24 = arith.addf %21, %23 : vector<8x128xf32>
    %25 = arith.truncf %24 : vector<8x128xf32> to vector<8x128xbf16>
    %c0_9 = arith.constant 0 : index
    %c0_10 = arith.constant 0 : index
    %26 = vector.load %arg5[%c0_9, %c0_10] : memref<128x32xbf16, #tpu.memory_space<vmem>>, vector<128x32xbf16>
    %cst_11 = arith.constant dense<0.000000e+00> : vector<8x32xf32>
    %27 = tpu.matmul %25, %26, %cst_11 {dimension_numbers = #tpu.dot_dimension_numbers<[1], [0], [0], [1], [0, 0, 1, 1], [], []>} : vector<8x128xbf16>, vector<128x32xbf16>, vector<8x32xf32> -> vector<8x32xf32>
    %c0_12 = arith.constant 0 : index
    %c0_13 = arith.constant 0 : index
    %28 = vector.load %arg6[%c0_12, %c0_13] : memref<1x32xf32, #tpu.memory_space<vmem>>, vector<1x32xf32>
    %29 = vector.broadcast %28 : vector<1x32xf32> to vector<8x32xf32>
    %30 = arith.addf %27, %29 : vector<8x32xf32>
    %c0_14 = arith.constant 0 : index
    %c0_15 = arith.constant 0 : index
    %31 = vector.load %arg7[%c0_14, %c0_15] : memref<8x32xf32, #tpu.memory_space<vmem>>, vector<8x32xf32>
    tpu.vector_store %arg7[%c0_14, %c0_15], %30 {strides = array<i32>} : memref<8x32xf32, #tpu.memory_space<vmem>>, vector<8x32xf32>,
    return
  }
  func.func @transform_0(%arg0: i32, %arg1: i32) -> (i32, i32) {
    %c0_i32 = arith.constant 0 : i32
    %c0_i32_0 = arith.constant 0 : i32
    return %arg0, %c0_i32 : i32, i32
  }
  func.func @transform_1(%arg0: i32, %arg1: i32) -> (i32, i32) {
    %c0_i32 = arith.constant 0 : i32
    %c0_i32_0 = arith.constant 0 : i32
    %c0_i32_1 = arith.constant 0 : i32
    return %c0_i32, %c0_i32_0 : i32, i32
  }
  func.func @transform_2(%arg0: i32, %arg1: i32) -> (i32, i32) {
    %c0_i32 = arith.constant 0 : i32
    %c0_i32_0 = arith.constant 0 : i32
    %c0_i32_1 = arith.constant 0 : i32
    return %c0_i32, %c0_i32_0 : i32, i32
  }
  func.func @transform_3(%arg0: i32, %arg1: i32) -> (i32, i32) {
    %c0_i32 = arith.constant 0 : i32
    %c0_i32_0 = arith.constant 0 : i32
    return %c0_i32, %arg1 : i32, i32
  }
  func.func @transform_4(%arg0: i32, %arg1: i32) -> (i32, i32) {
    %c0_i32 = arith.constant 0 : i32
    %c0_i32_0 = arith.constant 0 : i32
    return %c0_i32, %arg1 : i32, i32
  }
  func.func @transform_5(%arg0: i32, %arg1: i32) -> (i32, i32) {
    %c0_i32 = arith.constant 0 : i32
    return %arg0, %arg1 : i32, i32
  }
}

</mosaic_0001>

<bundles_post_ra>
// kernel: _lambda_.93
= control target key start
LH: loop header
LB: loop body
LE: loop exit
PB: predicated region body
PF: predicated region fallthrough
CT: control target
= control target key end

     0   :  { %v135_v0 = vmov 0.0   ;;  %vm136_vm0 = vmmov 0   ;;  %vm56_vm1 = vcmask 523264   ;;  %vm100_vm2 = vcmask 500736   ;;  %s178_s1 = inlined_call_operand.vmem [shape: bf16[64,62], index: 1, kind: input, shape index: {}]   ;;  %s179_s0 = inlined_call_operand.vmem [shape: f32[2,64], index: 0, kind: input, shape index: {}]   ;;  %s180_s2 = inlined_call_operand.vmem [shape: f32[1,62], index: 2, kind: input, shape index: {}]   ;;  %s181_s3 = inlined_call_operand.vmem [shape: f32[2,62], index: 3, kind: output, shape index: {}]  }
   0x1   :  { %117 = vmatprep.subr.bf16.mxu0 %v135_v0  ;;  %v131_v1 = vld [vmem:[%s178_s1 + $0x18] sm:$0xff]   ;;  %125 = vmatprep.mubr.msk.bf16.mxu0 %vm136_vm0, %v135_v0  ;;  %v132_v2 = vld [vmem:[%s178_s1 + $0x10] sm:$0xff]   ;;  %v133_v3 = vld [vmem:[%s178_s1 + $0x8] sm:$0xff]  }
   0x2   :  { %118 = vmatpush3.bf16.msra.mxu0 %v131_v1  ;;  %v134_v4 = vld [vmem:[%s178_s1] sm:$0xff]  }
   0x3   :  { %119 = vmatprep.subr.bf16.mxu0 %v135_v0  ;;  %v15_v5 = vld [vmem:[%s179_s0] sm:$0x3] }
   0x4   :  { %v16_v6 = vpack.c.bf16 %v15_v5, %v15_v5  ;;  %v106_v7 = vld [vmem:[%s180_s2] ss:$0 sm:$0xff] }
   0x6   :  { %120 = vmatpush3.bf16.msra.mxu0 %v132_v2 }
   0x7   :  { %121 = vmatprep.subr.bf16.mxu0 %v135_v0 }
   0xa   :  { %122 = vmatpush3.bf16.msra.mxu0 %v133_v3 }
   0xb   :  { %123 = vmatprep.subr.bf16.mxu0 %v135_v0 }
   0xe   :  { %124 = vmatpush3.bf16.msra.mxu0 %v134_v4 }
  0x11   :  { %126 = vmatmul.mubr.msk.bf16.vlgmr.msra.gmra.mxu0 %vm56_vm1, %v16_v6 }
  0xd1   :  { %v94_v8 = vpop.f32.mrf.mxu0 }
  0xd2   :  { %v95_v9 = vadd.f32 %v106_v7, %v94_v8 }
  0xd3   :  { %v127_v10 = vpop.f32.mrf.mxu0 }
  0xd4   :  { %101 = vst.msk [vmem:[%s181_s3] sm:$0x3] %vm100_vm2, %v95_v9 }
  0xd5   :  { %v97_v11 = vpop.f32.mrf.mxu0 }
  0xd7   :  { %v128_v12 = vpop.f32.mrf.mxu0 }

// kernel: _lambda_.94
= control target key start
LH: loop header
LB: loop body
LE: loop exit
PB: predicated region body
PF: predicated region fallthrough
CT: control target
= control target key end

     0   :  { %vm56_vm0 = vcmask 1041408   ;;  %vm43_vm1 = vcmask 31744   ;;  %vm133_vm2 = vcmask 15360   ;;  %s511_s3 = inlined_call_operand.vmem [shape: bf16[4,4], index: 3, kind: input, shape index: {}]   ;;  %s512_s0 = inlined_call_operand.vmem [shape: f32[64,4], index: 0, kind: input, shape index: {}]   ;;  %s513_s1 = inlined_call_operand.vmem [shape: bf16[4,2], index: 1, kind: input, shape index: {}]   ;;  %s514_s4 = inlined_call_operand.vmem [shape: f32[1,4], index: 4, kind: input, shape index: {}]   ;;  %s515_s2 = inlined_call_operand.vmem [shape: f32[1,2], index: 2, kind: input, shape index: {}]   ;;  %s516_s5 = inlined_call_operand.vmem [shape: f32[64,2], index: 5, kind: output, shape index: {0}]   ;;  %s517_s6 = inlined_call_operand.vmem [shape: f32[64,4], index: 6, kind: output, shape index: {1}]  }
   0x1   :  { %v142_v0 = vld [vmem:[%s511_s3] sm:$0x3]  ;;  %v24_v2 = vld [vmem:[%s512_s0 + $0x8] sm:$0xff]  ;;  %v25_v5 = vld [vmem:[%s512_s0 + $0x10] sm:$0xff] }
   0x2   :  { %v23_v1 = vld [vmem:[%s512_s0] sm:$0xff]  ;;  %331 = vmatprep.subr.msk.bf16.mxu1 %vm56_vm0, %v142_v0  ;;  %v151_v3 = vsel %vm56_vm0, %v142_v0, 0  ;;  %v26_v6 = vld [vmem:[%s512_s0 + $0x18] sm:$0xff]  ;;  %v28_v9 = vld [vmem:[%s512_s0 + $0x28] sm:$0xff] }
   0x3   :  { %v31_v4 = vpack.c.bf16 %v24_v2, %v23_v1  ;;  %v27_v7 = vld [vmem:[%s512_s0 + $0x20] sm:$0xff]  ;;  %321 = vmatpush3.bf16.msra.mxu1 %v151_v3  ;;  %v32_v8 = vpack.c.bf16 %v26_v6, %v25_v5  ;;  %v29_v13 = vld [vmem:[%s512_s0 + $0x30] sm:$0xff]  ;;  %v30_v14 = vld [vmem:[%s512_s0 + $0x38] sm:$0xff] }
   0x4   :  { %v33_v10 = vpack.c.bf16 %v28_v9, %v27_v7  ;;  %v35_v11 = vld [vmem:[%s513_s1] sm:$0x3]  ;;  %v34_v15 = vpack.c.bf16 %v30_v14, %v29_v13 }
   0x5   :  { %322 = vmatprep.mubr.msk.bf16.mxu1 %vm43_vm1, %v31_v4  ;;  %312 = vmatprep.mubr.msk.bf16.mxu0 %vm43_vm1, %v31_v4  ;;  %v58_v12 = vsel %vm56_vm0, %v35_v11, 0  ;;  %v287_v16 = vld [vmem:[%s514_s4] ss:$0 sm:$0xff] }
   0x6   :  { %330 = vmatprep.subr.msk.bf16.mxu0 %vm56_vm0, %v35_v11  ;;  %323 = vmatmul.mubr.msk.bf16.vlgmr.msra.gmra.mxu1 %vm43_vm1, %v32_v8  ;;  %v282_v19 = vld [vmem:[%s515_s2] ss:$0 sm:$0xff] }
   0x7   :  { %311 = vmatpush3.bf16.msra.mxu0 %v58_v12  ;;  %326 = vmatprep.mubr.msk.bf16.mxu1 %vm43_vm1, %v33_v10 }
   0xa   :  { %313 = vmatmul.mubr.msk.bf16.vlgmr.msra.gmra.mxu0 %vm43_vm1, %v32_v8 }
   0xb   :  { %316 = vmatprep.mubr.msk.bf16.mxu0 %vm43_vm1, %v33_v10 }
   0xe   :  { %327 = vmatmul.mubr.msk.bf16.gmra.mxu1 %vm43_vm1, %v34_v15 }
  0x12   :  { %317 = vmatmul.mubr.msk.bf16.gmra.mxu0 %vm43_vm1, %v34_v15 }
  0xc6   :  { %v324_v17 = vpop.f32.mrf.mxu1 }
  0xc7   :  { %v196_v18 = vadd.f32 %v324_v17, %v287_v16 }
  0xc8   :  { %v187_v20 = vpop.f32.mrf.mxu1 }
  0xc9   :  { %v294_v21 = vmul.f32 -1.442695, %v196_v18  ;;  %v188_v22 = vadd.f32 %v287_v16, %v187_v20 }
  0xca   :  { %v314_v23 = vpop.f32.mrf.mxu0  ;;  %v325_v24 = vpop.f32.mrf.mxu1 }
  0xcb   :  { %v103_v25 = vadd.f32 %v314_v23, %v282_v19  ;;  %332 = vpow2.f32 %v294_v21  ;;  %v292_v26 = vmul.f32 -1.442695, %v188_v22  ;;  %v199_v27 = vadd.f32 %v325_v24, %v287_v16 }
  0xcc   :  { %v94_v28 = vpop.f32.mrf.mxu0  ;;  %v190_v29 = vpop.f32.mrf.mxu1 }
  0xcd   :  { %v127_v30 = vmax.f32 %v103_v25, 0.0  ;;  %v95_v31 = vadd.f32 %v282_v19, %v94_v28  ;;  %334 = vpow2.f32 %v292_v26  ;;  %v295_v32 = vmul.f32 -1.442695, %v199_v27 }
  0xce   :  { %v191_v33 = vadd.f32 %v287_v16, %v190_v29  ;;  %v315_v34 = vpop.f32.mrf.mxu0  ;;  %v328_v35 = vpop.f32.mrf.mxu1 }
  0xcf   :  { %136 = vst.msk [vmem:[%s516_s5 + $0x10] sm:$0xff] %vm133_vm2, %v127_v30  ;;  %v125_v36 = vmax.f32 %v95_v31, 0.0  ;;  %v106_v37 = vadd.f32 %v315_v34, %v282_v19  ;;  %336 = vpow2.f32 %v295_v32  ;;  %v212_v39 = vadd.f32 %v328_v35, %v287_v16 }
  0xd0   :  { %v293_v38 = vmul.f32 -1.442695, %v191_v33  ;;  %v97_v40 = vpop.f32.mrf.mxu0  ;;  %v203_v41 = vpop.f32.mrf.mxu1 }
  0xd1   :  { %134 = vst.msk [vmem:[%s516_s5] sm:$0xff] %vm133_vm2, %v125_v36  ;;  %v128_v42 = vmax.f32 %v106_v37, 0.0  ;;  %v98_v43 = vadd.f32 %v282_v19, %v97_v40  ;;  %v298_v44 = vmul.f32 -1.442695, %v212_v39  ;;  %v204_v45 = vadd.f32 %v287_v16, %v203_v41 }
  0xd2   :  { %338 = vpow2.f32 %v293_v38  ;;  %v318_v46 = vpop.f32.mrf.mxu0  ;;  %v329_v47 = vpop.f32.mrf.mxu1 }
  0xd3   :  { %137 = vst.msk [vmem:[%s516_s5 + $0x18] sm:$0xff] %vm133_vm2, %v128_v42  ;;  %v126_v48 = vmax.f32 %v98_v43, 0.0  ;;  %v119_v49 = vadd.f32 %v318_v46, %v282_v19  ;;  %340 = vpow2.f32 %v298_v44  ;;  %v296_v50 = vmul.f32 -1.442695, %v204_v45 }
  0xd4   :  { %v215_v51 = vadd.f32 %v329_v47, %v287_v16  ;;  %v110_v52 = vpop.f32.mrf.mxu0  ;;  %v206_v53 = vpop.f32.mrf.mxu1 }
  0xd5   :  { %135 = vst.msk [vmem:[%s516_s5 + $0x8] sm:$0xff] %vm133_vm2, %v126_v48  ;;  %v131_v54 = vmax.f32 %v119_v49, 0.0  ;;  %v111_v55 = vadd.f32 %v282_v19, %v110_v52  ;;  %342 = vpow2.f32 %v296_v50  ;;  %v207_v57 = vadd.f32 %v287_v16, %v206_v53 }
  0xd6   :  { %v299_v56 = vmul.f32 -1.442695, %v215_v51  ;;  %v319_v58 = vpop.f32.mrf.mxu0 }
  0xd7   :  { %140 = vst.msk [vmem:[%s516_s5 + $0x30] sm:$0xff] %vm133_vm2, %v131_v54  ;;  %v129_v59 = vmax.f32 %v111_v55, 0.0  ;;  %v122_v60 = vadd.f32 %v319_v58, %v282_v19  ;;  %v297_v61 = vmul.f32 -1.442695, %v207_v57 }
  0xd8   :  { %344 = vpow2.f32 %v299_v56  ;;  %v113_v62 = vpop.f32.mrf.mxu0  ;;  %v333_v63 = vpop.eup %332 }
  0xd9   :  { %138 = vst.msk [vmem:[%s516_s5 + $0x20] sm:$0xff] %vm133_vm2, %v129_v59  ;;  %v132_v0 = vmax.f32 %v122_v60, 0.0  ;;  %v114_v1 = vadd.f32 %v282_v19, %v113_v62  ;;  %v244_v2 = vadd.f32 1.0, %v333_v63  ;;  %346 = vpow2.f32 %v297_v61 }
  0xda   :  { %v335_v3 = vpop.eup %334 }
  0xdb   :  { %141 = vst.msk [vmem:[%s516_s5 + $0x38] sm:$0xff] %vm133_vm2, %v132_v0  ;;  %v130_v4 = vmax.f32 %v114_v1, 0.0  ;;  %348 = vrcp.f32 %v244_v2  ;;  %v242_v5 = vadd.f32 1.0, %v335_v3 }
  0xdc   :  { %v337_v6 = vpop.eup %336 }
  0xdd   :  { %139 = vst.msk [vmem:[%s516_s5 + $0x28] sm:$0xff] %vm133_vm2, %v130_v4  ;;  %350 = vrcp.f32 %v242_v5  ;;  %v245_v7 = vadd.f32 1.0, %v337_v6 }
  0xdf   :  { %v339_v8 = vpop.eup %338  ;;  %352 = vrcp.f32 %v245_v7 }
  0xe0   :  { %v243_v9 = vadd.f32 1.0, %v339_v8  ;;  %v341_v10 = vpop.eup %340 }
  0xe1   :  { %v248_v11 = vadd.f32 1.0, %v341_v10 }
  0xe2   :  { %354 = vrcp.f32 %v243_v9  ;;  %v343_v12 = vpop.eup %342 }
  0xe3   :  { %356 = vrcp.f32 %v248_v11  ;;  %v246_v13 = vadd.f32 1.0, %v343_v12 }
  0xe5   :  { %v345_v14 = vpop.eup %344  ;;  %358 = vrcp.f32 %v246_v13 }
  0xe6   :  { %v249_v15 = vadd.f32 1.0, %v345_v14  ;;  %v347_v16 = vpop.eup %346 }
  0xe7   :  { %v247_v17 = vadd.f32 1.0, %v347_v16 }
  0xe8   :  { %360 = vrcp.f32 %v249_v15  ;;  %v349_v18 = vpop.eup %348 }
  0xe9   :  { %268 = vst.msk [vmem:[%s517_s6 + $0x10] sm:$0xff] %vm43_vm1, %v349_v18  ;;  %362 = vrcp.f32 %v247_v17 }
  0xea   :  { %v351_v19 = vpop.eup %350 }
  0xeb   :  { %266 = vst.msk [vmem:[%s517_s6] sm:$0xff] %vm43_vm1, %v351_v19 }
  0xec   :  { %v353_v20 = vpop.eup %352 }
  0xed   :  { %269 = vst.msk [vmem:[%s517_s6 + $0x18] sm:$0xff] %vm43_vm1, %v353_v20 }
  0xef   :  { %v355_v21 = vpop.eup %354 }
  0xf0   :  { %267 = vst.msk [vmem:[%s517_s6 + $0x8] sm:$0xff] %vm43_vm1, %v355_v21  ;;  %v357_v22 = vpop.eup %356 }
  0xf1   :  { %272 = vst.msk [vmem:[%s517_s6 + $0x30] sm:$0xff] %vm43_vm1, %v357_v22 }
  0xf2   :  { %v359_v23 = vpop.eup %358 }
  0xf3   :  { %270 = vst.msk [vmem:[%s517_s6 + $0x20] sm:$0xff] %vm43_vm1, %v359_v23 }
  0xf5   :  { %v361_v24 = vpop.eup %360 }
  0xf6   :  { %273 = vst.msk [vmem:[%s517_s6 + $0x38] sm:$0xff] %vm43_vm1, %v361_v24  ;;  %v363_v25 = vpop.eup %362 }
  0xf7   :  { %271 = vst.msk [vmem:[%s517_s6 + $0x28] sm:$0xff] %vm43_vm1, %v363_v25 }

// kernel: _lambda_.92
= control target key start
LH: loop header
LB: loop body
LE: loop exit
PB: predicated region body
PF: predicated region fallthrough
CT: control target
= control target key end

     0   :  { %vm48_vm0 = vcmask 1043456   ;;  %vm35_vm1 = vcmask 64512   ;;  %vm117_vm2 = vcmask 31744   ;;  %s240_s1 = inlined_call_operand.vmem [shape: bf16[8,4], index: 1, kind: input, shape index: {}]   ;;  %s241_s0 = inlined_call_operand.vmem [shape: f32[64,8], index: 0, kind: input, shape index: {}]   ;;  %s242_s2 = inlined_call_operand.vmem [shape: f32[1,4], index: 2, kind: input, shape index: {}]   ;;  %s243_s3 = inlined_call_operand.vmem [shape: f32[64,4], index: 3, kind: output, shape index: {}]  }
   0x1   :  { %v27_v0 = vld [vmem:[%s240_s1] sm:$0xf]  ;;  %v16_v2 = vld [vmem:[%s241_s0 + $0x8] sm:$0xff]  ;;  %v17_v7 = vld [vmem:[%s241_s0 + $0x10] sm:$0xff] }
   0x2   :  { %v15_v1 = vld [vmem:[%s241_s0] sm:$0xff]  ;;  %152 = vmatprep.subr.msk.bf16.mxu0 %vm48_vm0, %v27_v0  ;;  %153 = vmatprep.subr.msk.bf16.mxu1 %vm48_vm0, %v27_v0  ;;  %v50_v3 = vsel %vm48_vm0, %v27_v0, 0  ;;  %v20_v6 = vld [vmem:[%s241_s0 + $0x28] sm:$0xff]  ;;  %v18_v9 = vld [vmem:[%s241_s0 + $0x18] sm:$0xff] }
   0x3   :  { %v23_v4 = vpack.c.bf16 %v16_v2, %v15_v1  ;;  %v19_v5 = vld [vmem:[%s241_s0 + $0x20] sm:$0xff]  ;;  %141 = vmatpush3.bf16.msra.mxu0 %v50_v3  ;;  %151 = vmatpush3.bf16.msra.mxu1 %v50_v3  ;;  %v21_v10 = vld [vmem:[%s241_s0 + $0x30] sm:$0xff]  ;;  %v22_v11 = vld [vmem:[%s241_s0 + $0x38] sm:$0xff]  ;;  %v24_v12 = vpack.c.bf16 %v18_v9, %v17_v7 }
   0x4   :  { %v25_v8 = vpack.c.bf16 %v20_v6, %v19_v5  ;;  %v26_v13 = vpack.c.bf16 %v22_v11, %v21_v10  ;;  %v130_v14 = vld [vmem:[%s242_s2] ss:$0 sm:$0xff] }
   0x5   :  { %142 = vmatprep.mubr.msk.bf16.mxu0 %vm35_vm1, %v23_v4 }
   0x6   :  { %146 = vmatprep.mubr.msk.bf16.mxu1 %vm35_vm1, %v25_v8  ;;  %143 = vmatmul.mubr.msk.bf16.vlgmr.msra.gmra.mxu0 %vm35_vm1, %v24_v12 }
   0x7   :  { %147 = vmatmul.mubr.msk.bf16.vlgmr.msra.gmra.mxu1 %vm35_vm1, %v26_v13 }
  0xc6   :  { %v144_v15 = vpop.f32.mrf.mxu0 }
  0xc7   :  { %v148_v16 = vpop.f32.mrf.mxu1  ;;  %v95_v17 = vadd.f32 %v144_v15, %v130_v14 }
  0xc8   :  { %v111_v18 = vadd.f32 %v148_v16, %v130_v14  ;;  %v86_v19 = vpop.f32.mrf.mxu0 }
  0xc9   :  { %v102_v20 = vpop.f32.mrf.mxu1  ;;  %120 = vst.msk [vmem:[%s243_s3 + $0x10] sm:$0xff] %vm117_vm2, %v95_v17  ;;  %v87_v21 = vadd.f32 %v130_v14, %v86_v19 }
  0xca   :  { %124 = vst.msk [vmem:[%s243_s3 + $0x30] sm:$0xff] %vm117_vm2, %v111_v18  ;;  %v103_v22 = vadd.f32 %v130_v14, %v102_v20  ;;  %v145_v23 = vpop.f32.mrf.mxu0 }
  0xcb   :  { %v149_v24 = vpop.f32.mrf.mxu1  ;;  %118 = vst.msk [vmem:[%s243_s3] sm:$0xff] %vm117_vm2, %v87_v21  ;;  %v98_v25 = vadd.f32 %v145_v23, %v130_v14 }
  0xcc   :  { %122 = vst.msk [vmem:[%s243_s3 + $0x20] sm:$0xff] %vm117_vm2, %v103_v22  ;;  %v114_v26 = vadd.f32 %v149_v24, %v130_v14  ;;  %v89_v27 = vpop.f32.mrf.mxu0 }
  0xcd   :  { %v105_v28 = vpop.f32.mrf.mxu1  ;;  %121 = vst.msk [vmem:[%s243_s3 + $0x18] sm:$0xff] %vm117_vm2, %v98_v25  ;;  %v90_v29 = vadd.f32 %v130_v14, %v89_v27 }
  0xce   :  { %125 = vst.msk [vmem:[%s243_s3 + $0x38] sm:$0xff] %vm117_vm2, %v114_v26  ;;  %v106_v30 = vadd.f32 %v130_v14, %v105_v28 }
  0xcf   :  { %119 = vst.msk [vmem:[%s243_s3 + $0x8] sm:$0xff] %vm117_vm2, %v90_v29 }
  0xd0   :  { %123 = vst.msk [vmem:[%s243_s3 + $0x28] sm:$0xff] %vm117_vm2, %v106_v30 }

// kernel: _lambda_.95
= control target key start
LH: loop header
LB: loop body
LE: loop exit
PB: predicated region body
PF: predicated region fallthrough
CT: control target
= control target key end

     0   :  { %vm60_vm0 = vcmask 1044480   ;;  %vm47_vm1 = vcmask 80896   ;;  %vm169_vm2 = vcmask 31744   ;;  %s352_s1 = inlined_call_operand.vmem [shape: bf16[10,4], index: 1, kind: input, shape index: {}]   ;;  %s353_s0 = inlined_call_operand.vmem [shape: f32[64,10], index: 0, kind: input, shape index: {}]   ;;  %s354_s2 = inlined_call_operand.vmem [shape: f32[1,4], index: 2, kind: input, shape index: {}]   ;;  %s355_s3 = inlined_call_operand.vmem [shape: f32[64,4], index: 3, kind: input, shape index: {}]   ;;  %s356_s4 = inlined_call_operand.vmem [shape: f32[64,4], index: 4, kind: input, shape index: {}]   ;;  %s357_s5 = inlined_call_operand.vmem [shape: f32[64,4], index: 5, kind: output, shape index: {}]  }
   0x1   :  { %v207_v0 = vld [vmem:[%s352_s1] sm:$0x1f]   ;;  %v22_v2 = vld [vmem:[%s353_s0 + $0x8] sm:$0xff]  ;;  %v23_v7 = vld [vmem:[%s353_s0 + $0x10] sm:$0xff] }
   0x2   :  { %v21_v1 = vld [vmem:[%s353_s0] sm:$0xff]  ;;  %205 = vmatprep.subr.msk.bf16.mxu0 %vm60_vm0, %v207_v0  ;;  %206 = vmatprep.subr.msk.bf16.mxu1 %vm60_vm0, %v207_v0  ;;  %v62_v4 = vsel %vm60_vm0, %v207_v0, 0  ;;  %v26_v6 = vld [vmem:[%s353_s0 + $0x28] sm:$0xff]  ;;  %v24_v8 = vld [vmem:[%s353_s0 + $0x18] sm:$0xff] }
   0x3   :  { %v25_v3 = vld [vmem:[%s353_s0 + $0x20] sm:$0xff]  ;;  %v29_v5 = vpack.c.bf16 %v22_v2, %v21_v1  ;;  %194 = vmatpush3.bf16.msra.mxu0 %v62_v4  ;;  %204 = vmatpush3.bf16.msra.mxu1 %v62_v4  ;;  %v30_v10 = vpack.c.bf16 %v24_v8, %v23_v7  ;;  %v27_v11 = vld [vmem:[%s353_s0 + $0x30] sm:$0xff]  ;;  %v28_v12 = vld [vmem:[%s353_s0 + $0x38] sm:$0xff] }
   0x4   :  { %v31_v9 = vpack.c.bf16 %v26_v6, %v25_v3  ;;  %v32_v13 = vpack.c.bf16 %v28_v12, %v27_v11  ;;  %v182_v14 = vld [vmem:[%s354_s2] ss:$0 sm:$0xff]  ;;  %v131_v15 = vld [vmem:[%s355_s3 + $0x10] sm:$0xff]  ;;  %v132_v25 = vld [vmem:[%s355_s3 + $0x18] sm:$0xff] }
   0x5   :  { %195 = vmatprep.mubr.msk.bf16.mxu0 %vm47_vm1, %v29_v5  ;;  %v139_v16 = vld [vmem:[%s356_s4 + $0x10] sm:$0xff]  ;;  %v129_v19 = vld [vmem:[%s355_s3] sm:$0xff]  ;;  %v140_v30 = vld [vmem:[%s356_s4 + $0x18] sm:$0xff] }
   0x6   :  { %199 = vmatprep.mubr.msk.bf16.mxu1 %vm47_vm1, %v31_v9  ;;  %196 = vmatmul.mubr.msk.bf16.vlgmr.msra.gmra.mxu0 %vm47_vm1, %v30_v10  ;;  %v135_v17 = vld [vmem:[%s355_s3 + $0x30] sm:$0xff]  ;;  %v137_v20 = vld [vmem:[%s356_s4] sm:$0xff]  ;;  %v147_v27 = vmul.f32 %v139_v16, %v131_v15  ;;  %v136_v31 = vld [vmem:[%s355_s3 + $0x38] sm:$0xff]  ;;  %v148_v46 = vmul.f32 %v140_v30, %v132_v25 }
   0x7   :  { %200 = vmatmul.mubr.msk.bf16.vlgmr.msra.gmra.mxu1 %vm47_vm1, %v32_v13  ;;  %v143_v18 = vld [vmem:[%s356_s4 + $0x30] sm:$0xff]  ;;  %v133_v21 = vld [vmem:[%s355_s3 + $0x20] sm:$0xff]  ;;  %v144_v32 = vld [vmem:[%s356_s4 + $0x38] sm:$0xff]  ;;  %v145_v34 = vmul.f32 %v137_v20, %v129_v19 }
   0x8   :  { %v141_v22 = vld [vmem:[%s356_s4 + $0x20] sm:$0xff]  ;;  %v151_v29 = vmul.f32 %v143_v18, %v135_v17  ;;  %v130_v37 = vld [vmem:[%s355_s3 + $0x8] sm:$0xff]  ;;  %v152_v48 = vmul.f32 %v144_v32, %v136_v31 }
   0x9   :  { %v149_v36 = vmul.f32 %v141_v22, %v133_v21  ;;  %v138_v42 = vld [vmem:[%s356_s4 + $0x8] sm:$0xff] }
   0xa   :  { %v134_v43 = vld [vmem:[%s355_s3 + $0x28] sm:$0xff]  ;;  %v146_v56 = vmul.f32 %v138_v42, %v130_v37 }
   0xb   :  { %v142_v44 = vld [vmem:[%s356_s4 + $0x28] sm:$0xff] }
   0xc   :  { %v150_v58 = vmul.f32 %v142_v44, %v134_v43 }
  0xc6   :  { %v197_v23 = vpop.f32.mrf.mxu0 }
  0xc7   :  { %v201_v24 = vpop.f32.mrf.mxu1  ;;  %v107_v26 = vadd.f32 %v197_v23, %v182_v14 }
  0xc8   :  { %v123_v28 = vadd.f32 %v201_v24, %v182_v14  ;;  %v98_v33 = vpop.f32.mrf.mxu0 }
  0xc9   :  { %v114_v35 = vpop.f32.mrf.mxu1  ;;  %v155_v38 = vmax.f32 %v107_v26, 0.0  ;;  %v99_v40 = vadd.f32 %v182_v14, %v98_v33 }
  0xca   :  { %v159_v39 = vmax.f32 %v123_v28, 0.0  ;;  %v115_v41 = vadd.f32 %v182_v14, %v114_v35  ;;  %v198_v45 = vpop.f32.mrf.mxu0 }
  0xcb   :  { %v202_v47 = vpop.f32.mrf.mxu1  ;;  %v163_v49 = vadd.f32 %v155_v38, %v147_v27  ;;  %v153_v51 = vmax.f32 %v99_v40, 0.0  ;;  %v110_v53 = vadd.f32 %v198_v45, %v182_v14 }
  0xcc   :  { %v167_v50 = vadd.f32 %v159_v39, %v151_v29  ;;  %v157_v52 = vmax.f32 %v115_v41, 0.0  ;;  %v126_v54 = vadd.f32 %v202_v47, %v182_v14  ;;  %v101_v55 = vpop.f32.mrf.mxu0 }
  0xcd   :  { %v117_v57 = vpop.f32.mrf.mxu1  ;;  %172 = vst.msk [vmem:[%s357_s5 + $0x10] sm:$0xff] %vm169_vm2, %v163_v49  ;;  %v161_v59 = vadd.f32 %v153_v51, %v145_v34  ;;  %v102_v61 = vadd.f32 %v182_v14, %v101_v55  ;;  %v156_v63 = vmax.f32 %v110_v53, 0.0 }
  0xce   :  { %176 = vst.msk [vmem:[%s357_s5 + $0x30] sm:$0xff] %vm169_vm2, %v167_v50  ;;  %v165_v60 = vadd.f32 %v157_v52, %v149_v36  ;;  %v118_v62 = vadd.f32 %v182_v14, %v117_v57  ;;  %v160_v0 = vmax.f32 %v126_v54, 0.0 }
  0xcf   :  { %170 = vst.msk [vmem:[%s357_s5] sm:$0xff] %vm169_vm2, %v161_v59  ;;  %v154_v1 = vmax.f32 %v102_v61, 0.0  ;;  %v164_v3 = vadd.f32 %v156_v63, %v148_v46 }
  0xd0   :  { %174 = vst.msk [vmem:[%s357_s5 + $0x20] sm:$0xff] %vm169_vm2, %v165_v60  ;;  %v158_v2 = vmax.f32 %v118_v62, 0.0  ;;  %v168_v4 = vadd.f32 %v160_v0, %v152_v48 }
  0xd1   :  { %v162_v5 = vadd.f32 %v154_v1, %v146_v56  ;;  %173 = vst.msk [vmem:[%s357_s5 + $0x18] sm:$0xff] %vm169_vm2, %v164_v3 }
  0xd2   :  { %v166_v6 = vadd.f32 %v158_v2, %v150_v58  ;;  %177 = vst.msk [vmem:[%s357_s5 + $0x38] sm:$0xff] %vm169_vm2, %v168_v4 }
  0xd3   :  { %171 = vst.msk [vmem:[%s357_s5 + $0x8] sm:$0xff] %vm169_vm2, %v162_v5 }
  0xd4   :  { %175 = vst.msk [vmem:[%s357_s5 + $0x28] sm:$0xff] %vm169_vm2, %v166_v6 }

// kernel: _lambda_.102
= control target key start
LH: loop header
LB: loop body
LE: loop exit
PB: predicated region body
PF: predicated region fallthrough
CT: control target
= control target key end

     0   :  { %vm47_vm0 = vcmask 1041408   ;;  %vm40_vm1 = vcmask 162816   ;;  %vm104_vm2 = vcmask 64512   ;;  %s186_s1 = inlined_call_operand.vmem [shape: bf16[20,8], index: 1, kind: input, shape index: {}]   ;;  %s187_s0 = inlined_call_operand.vmem [shape: f32[32,20], index: 0, kind: input, shape index: {}]   ;;  %s188_s2 = inlined_call_operand.vmem [shape: f32[1,8], index: 2, kind: input, shape index: {}]   ;;  %s189_s3 = inlined_call_operand.vmem [shape: f32[32,8], index: 3, kind: output, shape index: {}]  }
   0x1   :  { %v131_v0 = vld [vmem:[%s186_s1 + $0x8] ss:$0 sps:$4 sm:$0x33]   ;;  %v132_v1 = vld [vmem:[%s186_s1] sm:$0xff]   ;;  %v17_v6 = vld [vmem:[%s187_s0 + $0x10] sm:$0xff] }
   0x2   :  { %v15_v2 = vld [vmem:[%s187_s0] sm:$0xff]  ;;  %130 = vmatprep.subr.msk.bf16.mxu0 %vm47_vm0, %v131_v0  ;;  %v49_v3 = vsel %vm47_vm0, %v131_v0, 0  ;;  %v16_v4 = vld [vmem:[%s187_s0 + $0x8] sm:$0xff]  ;;  %v18_v7 = vld [vmem:[%s187_s0 + $0x18] sm:$0xff] }
   0x3   :  { %123 = vmatpush3.bf16.msra.mxu0 %v49_v3  ;;  %v19_v5 = vpack.c.bf16 %v16_v4, %v15_v2  ;;  %v20_v8 = vpack.c.bf16 %v18_v7, %v17_v6  ;;  %v113_v9 = vld [vmem:[%s188_s2] ss:$0 sm:$0xff] }
   0x4   :  { %124 = vmatprep.subr.bf16.mxu0 %v132_v1 }
   0x5   :  { %126 = vmatprep.mubr.msk.bf16.mxu0 %vm40_vm1, %v19_v5 }
   0x7   :  { %125 = vmatpush3.bf16.msra.mxu0 %v132_v1 }
   0xa   :  { %127 = vmatmul.mubr.msk.bf16.vlgmr.msra.gmra.mxu0 %vm40_vm1, %v20_v8 }
  0xca   :  { %v128_v10 = vpop.f32.mrf.mxu0 }
  0xcb   :  { %v94_v11 = vadd.f32 %v128_v10, %v113_v9 }
  0xcc   :  { %v85_v12 = vpop.f32.mrf.mxu0 }
  0xcd   :  { %v102_v13 = vmax.f32 %v94_v11, 0.0  ;;  %v86_v14 = vadd.f32 %v113_v9, %v85_v12 }
  0xce   :  { %v129_v15 = vpop.f32.mrf.mxu0 }
  0xcf   :  { %107 = vst.msk [vmem:[%s189_s3 + $0x10] sm:$0xff] %vm104_vm2, %v102_v13  ;;  %v100_v16 = vmax.f32 %v86_v14, 0.0  ;;  %v97_v17 = vadd.f32 %v129_v15, %v113_v9 }
  0xd0   :  { %v88_v18 = vpop.f32.mrf.mxu0 }
  0xd1   :  { %105 = vst.msk [vmem:[%s189_s3] sm:$0xff] %vm104_vm2, %v100_v16  ;;  %v103_v19 = vmax.f32 %v97_v17, 0.0  ;;  %v89_v20 = vadd.f32 %v113_v9, %v88_v18 }
  0xd3   :  { %108 = vst.msk [vmem:[%s189_s3 + $0x18] sm:$0xff] %vm104_vm2, %v103_v19  ;;  %v101_v21 = vmax.f32 %v89_v20, 0.0 }
  0xd5   :  { %106 = vst.msk [vmem:[%s189_s3 + $0x8] sm:$0xff] %vm104_vm2, %v101_v21 }

// kernel: _lambda_.103
= control target key start
LH: loop header
LB: loop body
LE: loop exit
PB: predicated region body
PF: predicated region fallthrough
CT: control target
= control target key end

     0   :  { %vm44_vm0 = vcmask 1043456   ;;  %vm37_vm1 = vcmask 64512   ;;  %vm101_vm2 = vcmask 31744   ;;  %s347_s3 = inlined_call_operand.vmem [shape: bf16[8,8], index: 3, kind: input, shape index: {}]   ;;  %s348_s0 = inlined_call_operand.vmem [shape: f32[32,8], index: 0, kind: input, shape index: {}]   ;;  %s349_s1 = inlined_call_operand.vmem [shape: bf16[8,4], index: 1, kind: input, shape index: {}]   ;;  %s350_s4 = inlined_call_operand.vmem [shape: f32[1,8], index: 4, kind: input, shape index: {}]   ;;  %s351_s2 = inlined_call_operand.vmem [shape: f32[1,4], index: 2, kind: input, shape index: {}]   ;;  %s352_s5 = inlined_call_operand.vmem [shape: f32[32,4], index: 5, kind: output, shape index: {0}]   ;;  %s353_s6 = inlined_call_operand.vmem [shape: f32[32,8], index: 6, kind: output, shape index: {1}]  }
   0x1   :  { %v106_v0 = vld [vmem:[%s347_s3] sm:$0xf]  ;;  %v24_v2 = vld [vmem:[%s348_s0 + $0x8] sm:$0xff]  ;;  %v25_v5 = vld [vmem:[%s348_s0 + $0x10] sm:$0xff] }
   0x2   :  { %v23_v1 = vld [vmem:[%s348_s0] sm:$0xff]  ;;  %231 = vmatprep.subr.msk.bf16.mxu1 %vm44_vm0, %v106_v0  ;;  %v115_v3 = vsel %vm44_vm0, %v106_v0, 0  ;;  %v26_v6 = vld [vmem:[%s348_s0 + $0x18] sm:$0xff] }
   0x3   :  { %v27_v4 = vpack.c.bf16 %v24_v2, %v23_v1  ;;  %v29_v7 = vld [vmem:[%s349_s1] sm:$0xf]  ;;  %225 = vmatpush3.bf16.msra.mxu1 %v115_v3  ;;  %v28_v8 = vpack.c.bf16 %v26_v6, %v25_v5 }
   0x4   :  { %230 = vmatprep.subr.msk.bf16.mxu0 %vm44_vm0, %v29_v7  ;;  %v46_v9 = vsel %vm44_vm0, %v29_v7, 0  ;;  %v205_v10 = vld [vmem:[%s350_s4] ss:$0 sm:$0xff] }
   0x5   :  { %226 = vmatprep.mubr.msk.bf16.mxu1 %vm37_vm1, %v27_v4  ;;  %219 = vmatpush3.bf16.msra.mxu0 %v46_v9  ;;  %v202_v11 = vld [vmem:[%s351_s2] ss:$0 sm:$0xff] }
   0x6   :  { %220 = vmatprep.mubr.msk.bf16.mxu0 %vm37_vm1, %v27_v4  ;;  %227 = vmatmul.mubr.msk.bf16.vlgmr.msra.gmra.mxu1 %vm37_vm1, %v28_v8 }
   0x8   :  { %221 = vmatmul.mubr.msk.bf16.vlgmr.msra.gmra.mxu0 %vm37_vm1, %v28_v8 }
  0xc6   :  { %v228_v12 = vpop.f32.mrf.mxu1 }
  0xc7   :  { %v160_v13 = vadd.f32 %v228_v12, %v205_v10 }
  0xc8   :  { %v222_v14 = vpop.f32.mrf.mxu0  ;;  %v151_v15 = vpop.f32.mrf.mxu1 }
  0xc9   :  { %v91_v16 = vadd.f32 %v222_v14, %v202_v11  ;;  %v210_v17 = vmul.f32 -1.442695, %v160_v13  ;;  %v152_v18 = vadd.f32 %v205_v10, %v151_v15 }
  0xca   :  { %v82_v19 = vpop.f32.mrf.mxu0  ;;  %v229_v20 = vpop.f32.mrf.mxu1 }
  0xcb   :  { %v99_v21 = vmax.f32 %v91_v16, 0.0  ;;  %v83_v22 = vadd.f32 %v202_v11, %v82_v19  ;;  %232 = vpow2.f32 %v210_v17  ;;  %v208_v23 = vmul.f32 -1.442695, %v152_v18 }
  0xcc   :  { %v163_v24 = vadd.f32 %v229_v20, %v205_v10  ;;  %v223_v25 = vpop.f32.mrf.mxu0  ;;  %v154_v26 = vpop.f32.mrf.mxu1 }
  0xcd   :  { %104 = vst.msk [vmem:[%s352_s5 + $0x10] sm:$0xff] %vm101_vm2, %v99_v21  ;;  %v97_v27 = vmax.f32 %v83_v22, 0.0  ;;  %v94_v28 = vadd.f32 %v223_v25, %v202_v11  ;;  %234 = vpow2.f32 %v208_v23  ;;  %v155_v30 = vadd.f32 %v205_v10, %v154_v26 }
  0xce   :  { %v211_v29 = vmul.f32 -1.442695, %v163_v24  ;;  %v85_v31 = vpop.f32.mrf.mxu0 }
  0xcf   :  { %102 = vst.msk [vmem:[%s352_s5] sm:$0xff] %vm101_vm2, %v97_v27  ;;  %v100_v32 = vmax.f32 %v94_v28, 0.0  ;;  %v86_v33 = vadd.f32 %v202_v11, %v85_v31  ;;  %v209_v34 = vmul.f32 -1.442695, %v155_v30 }
  0xd0   :  { %236 = vpow2.f32 %v211_v29 }
  0xd1   :  { %105 = vst.msk [vmem:[%s352_s5 + $0x18] sm:$0xff] %vm101_vm2, %v100_v32  ;;  %v98_v35 = vmax.f32 %v86_v33, 0.0  ;;  %238 = vpow2.f32 %v209_v34 }
  0xd3   :  { %103 = vst.msk [vmem:[%s352_s5 + $0x8] sm:$0xff] %vm101_vm2, %v98_v35 }
  0xd8   :  { %v233_v36 = vpop.eup %232 }
  0xd9   :  { %v180_v37 = vadd.f32 1.0, %v233_v36 }
  0xda   :  { %v235_v38 = vpop.eup %234 }
  0xdb   :  { %240 = vrcp.f32 %v180_v37  ;;  %v178_v39 = vadd.f32 1.0, %v235_v38 }
  0xdd   :  { %v237_v40 = vpop.eup %236  ;;  %242 = vrcp.f32 %v178_v39 }
  0xde   :  { %v181_v41 = vadd.f32 1.0, %v237_v40  ;;  %v239_v42 = vpop.eup %238 }
  0xdf   :  { %v179_v43 = vadd.f32 1.0, %v239_v42 }
  0xe0   :  { %244 = vrcp.f32 %v181_v41 }
  0xe1   :  { %246 = vrcp.f32 %v179_v43 }
  0xe8   :  { %v241_v44 = vpop.eup %240 }
  0xe9   :  { %192 = vst.msk [vmem:[%s353_s6 + $0x10] sm:$0xff] %vm37_vm1, %v241_v44 }
  0xea   :  { %v243_v45 = vpop.eup %242 }
  0xeb   :  { %190 = vst.msk [vmem:[%s353_s6] sm:$0xff] %vm37_vm1, %v243_v45 }
  0xed   :  { %v245_v46 = vpop.eup %244 }
  0xee   :  { %193 = vst.msk [vmem:[%s353_s6 + $0x18] sm:$0xff] %vm37_vm1, %v245_v46  ;;  %v247_v47 = vpop.eup %246 }
  0xef   :  { %191 = vst.msk [vmem:[%s353_s6 + $0x8] sm:$0xff] %vm37_vm1, %v247_v47 }

// kernel: _lambda_.104
= control target key start
LH: loop header
LB: loop body
LE: loop exit
PB: predicated region body
PF: predicated region fallthrough
CT: control target
= control target key end

     0   :  { %vm56_vm0 = vcmask 1045504   ;;  %vm49_vm1 = vcmask 228352   ;;  %vm129_vm2 = vcmask 64512   ;;  %s249_s1 = inlined_call_operand.vmem [shape: bf16[28,8], index: 1, kind: input, shape index: {}]   ;;  %s250_s0 = inlined_call_operand.vmem [shape: f32[32,28], index: 0, kind: input, shape index: {}]   ;;  %s251_s2 = inlined_call_operand.vmem [shape: f32[1,8], index: 2, kind: input, shape index: {}]   ;;  %s252_s3 = inlined_call_operand.vmem [shape: f32[32,8], index: 3, kind: input, shape index: {}]   ;;  %s253_s4 = inlined_call_operand.vmem [shape: f32[32,8], index: 4, kind: input, shape index: {}]   ;;  %s254_s5 = inlined_call_operand.vmem [shape: f32[32,8], index: 5, kind: output, shape index: {}]  }
   0x1   :  { %v156_v0 = vld [vmem:[%s249_s1 + $0x8] sm:$0x3f]   ;;  %v157_v1 = vld [vmem:[%s249_s1] sm:$0xff]   ;;  %v23_v6 = vld [vmem:[%s250_s0 + $0x10] sm:$0xff] }
   0x2   :  { %155 = vmatprep.subr.msk.bf16.mxu0 %vm56_vm0, %v156_v0  ;;  %v58_v2 = vsel %vm56_vm0, %v156_v0, 0  ;;  %v21_v3 = vld [vmem:[%s250_s0] sm:$0xff]  ;;  %v22_v4 = vld [vmem:[%s250_s0 + $0x8] sm:$0xff]  ;;  %v24_v7 = vld [vmem:[%s250_s0 + $0x18] sm:$0xff] }
   0x3   :  { %148 = vmatpush3.bf16.msra.mxu0 %v58_v2  ;;  %v25_v5 = vpack.c.bf16 %v22_v4, %v21_v3  ;;  %v26_v8 = vpack.c.bf16 %v24_v7, %v23_v6  ;;  %v138_v9 = vld [vmem:[%s251_s2] ss:$0 sm:$0xff]  ;;  %v111_v10 = vld [vmem:[%s252_s3 + $0x10] sm:$0xff]  ;;  %v112_v18 = vld [vmem:[%s252_s3 + $0x18] sm:$0xff] }
   0x4   :  { %149 = vmatprep.subr.bf16.mxu0 %v157_v1  ;;  %v115_v11 = vld [vmem:[%s253_s4 + $0x10] sm:$0xff]  ;;  %v109_v13 = vld [vmem:[%s252_s3] sm:$0xff]  ;;  %v116_v19 = vld [vmem:[%s253_s4 + $0x18] sm:$0xff] }
   0x5   :  { %151 = vmatprep.mubr.msk.bf16.mxu0 %vm49_vm1, %v25_v5  ;;  %v113_v14 = vld [vmem:[%s253_s4] sm:$0xff]  ;;  %v119_v16 = vmul.f32 %v115_v11, %v111_v10  ;;  %v110_v24 = vld [vmem:[%s252_s3 + $0x8] sm:$0xff]  ;;  %v120_v29 = vmul.f32 %v116_v19, %v112_v18 }
   0x6   :  { %v117_v22 = vmul.f32 %v113_v14, %v109_v13  ;;  %v114_v25 = vld [vmem:[%s253_s4 + $0x8] sm:$0xff] }
   0x7   :  { %150 = vmatpush3.bf16.msra.mxu0 %v157_v1  ;;  %v118_v34 = vmul.f32 %v114_v25, %v110_v24 }
   0xa   :  { %152 = vmatmul.mubr.msk.bf16.vlgmr.msra.gmra.mxu0 %vm49_vm1, %v26_v8 }
  0xca   :  { %v153_v12 = vpop.f32.mrf.mxu0 }
  0xcb   :  { %v103_v15 = vadd.f32 %v153_v12, %v138_v9 }
  0xcc   :  { %v94_v17 = vpop.f32.mrf.mxu0 }
  0xcd   :  { %v123_v20 = vmax.f32 %v103_v15, 0.0  ;;  %v95_v21 = vadd.f32 %v138_v9, %v94_v17 }
  0xce   :  { %v154_v23 = vpop.f32.mrf.mxu0 }
  0xcf   :  { %v127_v26 = vadd.f32 %v123_v20, %v119_v16  ;;  %v121_v27 = vmax.f32 %v95_v21, 0.0  ;;  %v106_v28 = vadd.f32 %v154_v23, %v138_v9 }
  0xd0   :  { %v97_v30 = vpop.f32.mrf.mxu0 }
  0xd1   :  { %132 = vst.msk [vmem:[%s254_s5 + $0x10] sm:$0xff] %vm129_vm2, %v127_v26  ;;  %v125_v31 = vadd.f32 %v121_v27, %v117_v22  ;;  %v124_v32 = vmax.f32 %v106_v28, 0.0  ;;  %v98_v33 = vadd.f32 %v138_v9, %v97_v30 }
  0xd3   :  { %130 = vst.msk [vmem:[%s254_s5] sm:$0xff] %vm129_vm2, %v125_v31  ;;  %v128_v35 = vadd.f32 %v124_v32, %v120_v29  ;;  %v122_v36 = vmax.f32 %v98_v33, 0.0 }
  0xd5   :  { %133 = vst.msk [vmem:[%s254_s5 + $0x18] sm:$0xff] %vm129_vm2, %v128_v35  ;;  %v126_v37 = vadd.f32 %v122_v36, %v118_v34 }
  0xd7   :  { %131 = vst.msk [vmem:[%s254_s5 + $0x8] sm:$0xff] %vm129_vm2, %v126_v37 }

// kernel: _lambda_.111
= control target key start
LH: loop header
LB: loop body
LE: loop exit
PB: predicated region body
PF: predicated region fallthrough
CT: control target
= control target key end

     0   :  { %vm57_vm0 = vcmask 1043456   ;;  %v140_v0 = vmov 0.0   ;;  %vm141_vm1 = vmmov 0   ;;  %vm53_vm2 = vcmask 457728   ;;  %s189_s1 = inlined_call_operand.vmem [shape: bf16[56,16], index: 1, kind: input, shape index: {}]   ;;  %s190_s0 = inlined_call_operand.vmem [shape: f32[16,56], index: 0, kind: input, shape index: {}]   ;;  %s191_s2 = inlined_call_operand.vmem [shape: f32[1,16], index: 2, kind: input, shape index: {}]   ;;  %s192_s3 = inlined_call_operand.vmem [shape: f32[16,16], index: 3, kind: output, shape index: {}]  }
   0x1   :  { %122 = vmatprep.subr.bf16.mxu0 %v140_v0  ;;  %v136_v1 = vld [vmem:[%s189_s1 + $0x18] ss:$0 sps:$4 sm:$0xff]   ;;  %130 = vmatprep.mubr.msk.bf16.mxu0 %vm141_vm1, %v140_v0  ;;  %v137_v3 = vld [vmem:[%s189_s1 + $0x10] sm:$0xff]   ;;  %v138_v4 = vld [vmem:[%s189_s1 + $0x8] sm:$0xff]   ;;  %vm104_vm3 = vcmask 130048  }
   0x2   :  { %v59_v2 = vsel %vm57_vm0, %v136_v1, 0  ;;  %v139_v5 = vld [vmem:[%s189_s1] sm:$0xff]   ;;  %v16_v7 = vld [vmem:[%s190_s0 + $0x8] sm:$0xff] }
   0x3   :  { %123 = vmatpush3.bf16.msra.mxu0 %v59_v2  ;;  %v15_v6 = vld [vmem:[%s190_s0] sm:$0xff] }
   0x4   :  { %124 = vmatprep.subr.bf16.mxu0 %v140_v0  ;;  %v17_v8 = vpack.c.bf16 %v16_v7, %v15_v6  ;;  %v111_v9 = vld [vmem:[%s191_s2] ss:$0 sm:$0xff] }
   0x7   :  { %125 = vmatpush3.bf16.msra.mxu0 %v137_v3 }
   0x8   :  { %126 = vmatprep.subr.bf16.mxu0 %v140_v0 }
   0xb   :  { %127 = vmatpush3.bf16.msra.mxu0 %v138_v4 }
   0xc   :  { %128 = vmatprep.subr.bf16.mxu0 %v140_v0 }
   0xf   :  { %129 = vmatpush3.bf16.msra.mxu0 %v139_v5 }
  0x12   :  { %131 = vmatmul.mubr.msk.bf16.vlgmr.msra.gmra.mxu0 %vm53_vm2, %v17_v8 }
  0xd2   :  { %v95_v10 = vpop.f32.mrf.mxu0 }
  0xd3   :  { %v96_v11 = vadd.f32 %v111_v9, %v95_v10 }
  0xd4   :  { %v132_v12 = vpop.f32.mrf.mxu0 }
  0xd5   :  { %v102_v13 = vmax.f32 %v96_v11, 0.0 }
  0xd6   :  { %v98_v14 = vpop.f32.mrf.mxu0 }
  0xd7   :  { %105 = vst.msk [vmem:[%s192_s3] sm:$0xff] %vm104_vm3, %v102_v13  ;;  %v99_v15 = vadd.f32 %v111_v9, %v98_v14 }
  0xd8   :  { %v133_v16 = vpop.f32.mrf.mxu0 }
  0xd9   :  { %v103_v17 = vmax.f32 %v99_v15, 0.0 }
  0xdb   :  { %106 = vst.msk [vmem:[%s192_s3 + $0x8] sm:$0xff] %vm104_vm3, %v103_v17 }

// kernel: _lambda_.112
= control target key start
LH: loop header
LB: loop body
LE: loop exit
PB: predicated region body
PF: predicated region fallthrough
CT: control target
= control target key end

     0   :  { %v205_v0 = vmov 0.0   ;;  %vm206_vm0 = vmmov 0   ;;  %vm41_vm1 = vcmask 130048   ;;  %vm88_vm2 = vcmask 64512   ;;  %s276_s3 = inlined_call_operand.vmem [shape: bf16[16,16], index: 3, kind: input, shape index: {}]   ;;  %s277_s0 = inlined_call_operand.vmem [shape: f32[16,16], index: 0, kind: input, shape index: {}]   ;;  %s278_s1 = inlined_call_operand.vmem [shape: bf16[16,8], index: 1, kind: input, shape index: {}]   ;;  %s279_s4 = inlined_call_operand.vmem [shape: f32[1,16], index: 4, kind: input, shape index: {}]   ;;  %s280_s2 = inlined_call_operand.vmem [shape: f32[1,8], index: 2, kind: input, shape index: {}]   ;;  %s281_s5 = inlined_call_operand.vmem [shape: f32[16,8], index: 5, kind: output, shape index: {0}]   ;;  %s282_s6 = inlined_call_operand.vmem [shape: f32[16,16], index: 6, kind: output, shape index: {1}]  }
   0x1   :  { %187 = vmatprep.subr.bf16.mxu1 %v205_v0  ;;  %v195_v1 = vld [vmem:[%s276_s3] sm:$0xff]   ;;  %189 = vmatprep.mubr.msk.bf16.mxu1 %vm206_vm0, %v205_v0  ;;  %v24_v3 = vld [vmem:[%s277_s0 + $0x8] sm:$0xff] }
   0x2   :  { %v23_v2 = vld [vmem:[%s277_s0] sm:$0xff]  ;;  %181 = vmatprep.subr.bf16.mxu0 %v205_v0  ;;  %183 = vmatprep.mubr.msk.bf16.mxu0 %vm206_vm0, %v205_v0 }
   0x3   :  { %188 = vmatpush3.bf16.msra.mxu1 %v195_v1  ;;  %v25_v4 = vpack.c.bf16 %v24_v3, %v23_v2  ;;  %v196_v5 = vld [vmem:[%s278_s1] sm:$0xff]  }
   0x4   :  { %182 = vmatpush3.bf16.msra.mxu0 %v196_v5  ;;  %v172_v6 = vld [vmem:[%s279_s4] ss:$0 sm:$0xff] }
   0x5   :  { %v169_v8 = vld [vmem:[%s280_s2] ss:$0 sm:$0xff] }
   0x6   :  { %190 = vmatmul.mubr.msk.bf16.vlgmr.msra.gmra.mxu1 %vm41_vm1, %v25_v4 }
   0x7   :  { %184 = vmatmul.mubr.msk.bf16.vlgmr.msra.gmra.mxu0 %vm41_vm1, %v25_v4 }
  0xc6   :  { %v140_v7 = vpop.f32.mrf.mxu1 }
  0xc7   :  { %v141_v9 = vadd.f32 %v172_v6, %v140_v7  ;;  %v79_v11 = vpop.f32.mrf.mxu0 }
  0xc8   :  { %v191_v10 = vpop.f32.mrf.mxu1  ;;  %v80_v13 = vadd.f32 %v169_v8, %v79_v11 }
  0xc9   :  { %v175_v12 = vmul.f32 -1.442695, %v141_v9  ;;  %v185_v15 = vpop.f32.mrf.mxu0 }
  0xca   :  { %v143_v14 = vpop.f32.mrf.mxu1  ;;  %v86_v17 = vmax.f32 %v80_v13, 0.0 }
  0xcb   :  { %197 = vpow2.f32 %v175_v12  ;;  %v144_v16 = vadd.f32 %v172_v6, %v143_v14  ;;  %v82_v19 = vpop.f32.mrf.mxu0 }
  0xcc   :  { %v192_v18 = vpop.f32.mrf.mxu1  ;;  %89 = vst.msk [vmem:[%s281_s5] sm:$0xff] %vm88_vm2, %v86_v17  ;;  %v83_v21 = vadd.f32 %v169_v8, %v82_v19 }
  0xcd   :  { %v176_v20 = vmul.f32 -1.442695, %v144_v16  ;;  %v186_v22 = vpop.f32.mrf.mxu0 }
  0xce   :  { %v87_v23 = vmax.f32 %v83_v21, 0.0 }
  0xcf   :  { %199 = vpow2.f32 %v176_v20 }
  0xd0   :  { %90 = vst.msk [vmem:[%s281_s5 + $0x8] sm:$0xff] %vm88_vm2, %v87_v23 }
  0xd8   :  { %v198_v24 = vpop.eup %197 }
  0xd9   :  { %v153_v25 = vadd.f32 1.0, %v198_v24 }
  0xdb   :  { %201 = vrcp.f32 %v153_v25 }
  0xdc   :  { %v200_v26 = vpop.eup %199 }
  0xdd   :  { %v154_v27 = vadd.f32 1.0, %v200_v26 }
  0xdf   :  { %203 = vrcp.f32 %v154_v27 }
  0xe8   :  { %v202_v28 = vpop.eup %201 }
  0xe9   :  { %159 = vst.msk [vmem:[%s282_s6] sm:$0xff] %vm41_vm1, %v202_v28 }
  0xec   :  { %v204_v29 = vpop.eup %203 }
  0xed   :  { %160 = vst.msk [vmem:[%s282_s6 + $0x8] sm:$0xff] %vm41_vm1, %v204_v29 }

// kernel: _lambda_.113
= control target key start
LH: loop header
LB: loop body
LE: loop exit
PB: predicated region body
PF: predicated region fallthrough
CT: control target
= control target key end

     0   :  { %vm71_vm0 = vcmask 1043456   ;;  %v167_v0 = vmov 0.0   ;;  %vm168_vm1 = vmmov 0   ;;  %vm67_vm2 = vcmask 588800   ;;  %s241_s1 = inlined_call_operand.vmem [shape: bf16[72,16], index: 1, kind: input, shape index: {}]   ;;  %s242_s0 = inlined_call_operand.vmem [shape: f32[16,72], index: 0, kind: input, shape index: {}]   ;;  %s243_s2 = inlined_call_operand.vmem [shape: f32[1,16], index: 2, kind: input, shape index: {}]   ;;  %s244_s3 = inlined_call_operand.vmem [shape: f32[16,16], index: 3, kind: input, shape index: {}]   ;;  %s245_s4 = inlined_call_operand.vmem [shape: f32[16,16], index: 4, kind: input, shape index: {}]   ;;  %s246_s5 = inlined_call_operand.vmem [shape: f32[16,16], index: 5, kind: output, shape index: {}]  }
   0x1   :  { %146 = vmatprep.subr.bf16.mxu0 %v167_v0  ;;  %v162_v1 = vld [vmem:[%s241_s1 + $0x20] ss:$0 sps:$4 sm:$0xff]   ;;  %156 = vmatprep.mubr.msk.bf16.mxu0 %vm168_vm1, %v167_v0  ;;  %v163_v3 = vld [vmem:[%s241_s1 + $0x18] sm:$0xff]   ;;  %v164_v4 = vld [vmem:[%s241_s1 + $0x10] sm:$0xff]   ;;  %vm126_vm3 = vcmask 130048  }
   0x2   :  { %v73_v2 = vsel %vm71_vm0, %v162_v1, 0  ;;  %v165_v5 = vld [vmem:[%s241_s1 + $0x8] sm:$0xff]   ;;  %v166_v6 = vld [vmem:[%s241_s1] sm:$0xff]  }
   0x3   :  { %147 = vmatpush3.bf16.msra.mxu0 %v73_v2  ;;  %v21_v7 = vld [vmem:[%s242_s0] sm:$0xff]  ;;  %v22_v8 = vld [vmem:[%s242_s0 + $0x8] sm:$0xff] }
   0x4   :  { %148 = vmatprep.subr.bf16.mxu0 %v167_v0  ;;  %v23_v9 = vpack.c.bf16 %v22_v8, %v21_v7  ;;  %v133_v10 = vld [vmem:[%s243_s2] ss:$0 sm:$0xff]  ;;  %v117_v17 = vld [vmem:[%s244_s3 + $0x8] sm:$0xff] }
   0x5   :  { %v116_v11 = vld [vmem:[%s244_s3] sm:$0xff]  ;;  %v119_v18 = vld [vmem:[%s245_s4 + $0x8] sm:$0xff] }
   0x6   :  { %v118_v12 = vld [vmem:[%s245_s4] sm:$0xff]  ;;  %v121_v23 = vmul.f32 %v119_v18, %v117_v17 }
   0x7   :  { %149 = vmatpush3.bf16.msra.mxu0 %v163_v3  ;;  %v120_v15 = vmul.f32 %v118_v12, %v116_v11 }
   0x8   :  { %150 = vmatprep.subr.bf16.mxu0 %v167_v0 }
   0xb   :  { %151 = vmatpush3.bf16.msra.mxu0 %v164_v4 }
   0xc   :  { %152 = vmatprep.subr.bf16.mxu0 %v167_v0 }
   0xf   :  { %153 = vmatpush3.bf16.msra.mxu0 %v165_v5 }
  0x10   :  { %154 = vmatprep.subr.bf16.mxu0 %v167_v0 }
  0x13   :  { %155 = vmatpush3.bf16.msra.mxu0 %v166_v6 }
  0x16   :  { %157 = vmatmul.mubr.msk.bf16.vlgmr.msra.gmra.mxu0 %vm67_vm2, %v23_v9 }
  0xd6   :  { %v109_v13 = vpop.f32.mrf.mxu0 }
  0xd7   :  { %v110_v14 = vadd.f32 %v133_v10, %v109_v13 }
  0xd8   :  { %v158_v16 = vpop.f32.mrf.mxu0 }
  0xd9   :  { %v122_v19 = vmax.f32 %v110_v14, 0.0 }
  0xda   :  { %v112_v20 = vpop.f32.mrf.mxu0 }
  0xdb   :  { %v124_v21 = vadd.f32 %v122_v19, %v120_v15  ;;  %v113_v22 = vadd.f32 %v133_v10, %v112_v20 }
  0xdc   :  { %v159_v24 = vpop.f32.mrf.mxu0 }
  0xdd   :  { %127 = vst.msk [vmem:[%s246_s5] sm:$0xff] %vm126_vm3, %v124_v21  ;;  %v123_v25 = vmax.f32 %v113_v22, 0.0 }
  0xdf   :  { %v125_v26 = vadd.f32 %v123_v25, %v121_v23 }
  0xe1   :  { %128 = vst.msk [vmem:[%s246_s5 + $0x8] sm:$0xff] %vm126_vm3, %v125_v26 }

// kernel: _lambda_.129
= control target key start
LH: loop header
LB: loop body
LE: loop exit
PB: predicated region body
PF: predicated region fallthrough
CT: control target
= control target key end

     0   :  { %v214_v0 = vmov 0.0   ;;  %vm215_vm0 = vmmov 0   ;;  %vm48_vm1 = vcmask 261120   ;;  %vm93_vm2 = vcmask 130048   ;;  %s281_s3 = inlined_call_operand.vmem [shape: bf16[32,32], index: 3, kind: input, shape index: {}]   ;;  %s282_s0 = inlined_call_operand.vmem [shape: f32[8,32], index: 0, kind: input, shape index: {}]   ;;  %s283_s1 = inlined_call_operand.vmem [shape: bf16[32,16], index: 1, kind: input, shape index: {}]   ;;  %s284_s4 = inlined_call_operand.vmem [shape: f32[1,32], index: 4, kind: input, shape index: {}]   ;;  %s285_s2 = inlined_call_operand.vmem [shape: f32[1,16], index: 2, kind: input, shape index: {}]   ;;  %s286_s5 = inlined_call_operand.vmem [shape: f32[8,16], index: 5, kind: output, shape index: {0}]   ;;  %s287_s6 = inlined_call_operand.vmem [shape: f32[8,32], index: 6, kind: output, shape index: {1}]  }
   0x1   :  { %196 = vmatprep.subr.bf16.mxu1 %v214_v0  ;;  %v206_v1 = vld [vmem:[%s281_s3 + $0x8] sm:$0xff]   ;;  %200 = vmatprep.mubr.msk.bf16.mxu1 %vm215_vm0, %v214_v0  ;;  %v207_v2 = vld [vmem:[%s281_s3] sm:$0xff]  }
   0x2   :  { %188 = vmatprep.subr.bf16.mxu0 %v214_v0  ;;  %192 = vmatprep.mubr.msk.bf16.mxu0 %vm215_vm0, %v214_v0  ;;  %v23_v3 = vld [vmem:[%s282_s0] sm:$0xff]  ;;  %v208_v4 = vld [vmem:[%s283_s1 + $0x8] sm:$0xff]  }
   0x3   :  { %197 = vmatpush3.bf16.msra.mxu1 %v206_v1  ;;  %v24_v5 = vpack.c.bf16 %v23_v3, %v23_v3  ;;  %189 = vmatpush3.bf16.msra.mxu0 %v208_v4  ;;  %v209_v6 = vld [vmem:[%s283_s1] sm:$0xff]  }
   0x4   :  { %198 = vmatprep.subr.bf16.mxu1 %v214_v0  ;;  %190 = vmatprep.subr.bf16.mxu0 %v214_v0  ;;  %v177_v7 = vld [vmem:[%s284_s4] ss:$0 sm:$0xff] }
   0x5   :  { %v173_v10 = vld [vmem:[%s285_s2] ss:$0 sm:$0xff] }
   0x7   :  { %199 = vmatpush3.bf16.msra.mxu1 %v207_v2  ;;  %191 = vmatpush3.bf16.msra.mxu0 %v209_v6 }
   0xa   :  { %201 = vmatmul.mubr.msk.bf16.vlgmr.msra.gmra.mxu1 %vm48_vm1, %v24_v5  ;;  %193 = vmatmul.mubr.msk.bf16.vlgmr.msra.gmra.mxu0 %vm48_vm1, %v24_v5 }
  0xca   :  { %v152_v8 = vpop.f32.mrf.mxu1  ;;  %v86_v13 = vpop.f32.mrf.mxu0 }
  0xcb   :  { %v153_v9 = vadd.f32 %v177_v7, %v152_v8  ;;  %v87_v15 = vadd.f32 %v173_v10, %v86_v13 }
  0xcc   :  { %v202_v11 = vpop.f32.mrf.mxu1  ;;  %v194_v16 = vpop.f32.mrf.mxu0 }
  0xcd   :  { %v181_v12 = vmul.f32 -1.442695, %v153_v9  ;;  %v92_v18 = vmax.f32 %v87_v15, 0.0 }
  0xce   :  { %v155_v14 = vpop.f32.mrf.mxu1  ;;  %v89_v19 = vpop.f32.mrf.mxu0 }
  0xcf   :  { %210 = vpow2.f32 %v181_v12  ;;  %94 = vst.msk [vmem:[%s286_s5] sm:$0xff] %vm93_vm2, %v92_v18 }
  0xd0   :  { %v203_v17 = vpop.f32.mrf.mxu1  ;;  %v195_v20 = vpop.f32.mrf.mxu0 }
  0xdc   :  { %v211_v21 = vpop.eup %210 }
  0xdd   :  { %v161_v22 = vadd.f32 1.0, %v211_v21 }
  0xdf   :  { %212 = vrcp.f32 %v161_v22 }
  0xec   :  { %v213_v23 = vpop.eup %212 }
  0xed   :  { %164 = vst.msk [vmem:[%s287_s6] sm:$0xff] %vm48_vm1, %v213_v23 }

// kernel: _lambda_.128
= control target key start
LH: loop header
LB: loop body
LE: loop exit
PB: predicated region body
PF: predicated region fallthrough
CT: control target
= control target key end

     0   :  { %v170_v0 = vmov 0   ;;  %vm98_vm0 = vcmask 130048   ;;  %vm143_vm1 = vcmask 261120   ;;  %s230_s1 = inlined_call_operand.vmem [shape: bf16[144,32], index: 1, kind: input, shape index: {}]   ;;  %s231_s0 = inlined_call_operand.vmem [shape: f32[8,144], index: 0, kind: input, shape index: {}]   ;;  %s232_s2 = inlined_call_operand.vmem [shape: f32[1,32], index: 2, kind: input, shape index: {}]   ;;  %s233_s3 = inlined_call_operand.vmem [shape: f32[8,32], index: 3, kind: output, shape index: {}]  }
   0x1   :  { %102 = vmatprep.subr.bf16.mxu0 %v170_v0  ;;  %v161_v1 = vld [vmem:[%s230_s1 + $0x38] sm:$0xff]   ;;  %v162_v2 = vld [vmem:[%s230_s1 + $0x30] sm:$0xff]   ;;  %v163_v3 = vld [vmem:[%s230_s1 + $0x28] sm:$0xff]  }
   0x2   :  { %103 = vmatpush1.bf16.msra.mxu0 %v161_v1  ;;  %v16_v4 = vld [vmem:[%s231_s0 + $0x8] sm:$0xff]  ;;  %v164_v5 = vld [vmem:[%s230_s1 + $0x20] sm:$0xff]   ;;  %v165_v7 = vld [vmem:[%s230_s1 + $0x18] sm:$0xff]  }
   0x3   :  { %104 = vmatprep.subr.bf16.mxu0 %v170_v0  ;;  %v18_v6 = vpack.c.bf16 %v16_v4, %v16_v4  ;;  %v166_v8 = vld [vmem:[%s230_s1 + $0x10] sm:$0xff]   ;;  %v167_v9 = vld [vmem:[%s230_s1 + $0x8] sm:$0xff]   ;;  %v168_v10 = vld [vmem:[%s230_s1] sm:$0xff]  }
   0x4   :  { %v169_v11 = vld [vmem:[%s230_s1 + $0x40] sm:$0xff]  }
   0x5   :  { %159 = vmatprep.mubr.msk.bf16.mxu0 %vm98_vm0, %v18_v6  ;;  %v15_v12 = vld [vmem:[%s231_s0] sm:$0xff] }
   0x6   :  { %105 = vmatpush1.bf16.msra.mxu0 %v162_v2  ;;  %v17_v13 = vpack.c.bf16 %v15_v12, %v15_v12  ;;  %v149_v14 = vld [vmem:[%s232_s2] ss:$0 sm:$0xff] }
   0x7   :  { %106 = vmatprep.subr.bf16.mxu0 %v170_v0 }
   0xa   :  { %107 = vmatpush1.bf16.msra.mxu0 %v163_v3 }
   0xb   :  { %108 = vmatprep.subr.bf16.mxu0 %v170_v0 }
   0xe   :  { %109 = vmatpush1.bf16.msra.mxu0 %v164_v5 }
   0xf   :  { %110 = vmatprep.subr.bf16.mxu0 %v170_v0 }
  0x12   :  { %111 = vmatpush1.bf16.msra.mxu0 %v165_v7 }
  0x13   :  { %112 = vmatprep.subr.bf16.mxu0 %v170_v0 }
  0x16   :  { %113 = vmatpush1.bf16.msra.mxu0 %v166_v8 }
  0x17   :  { %114 = vmatprep.subr.bf16.mxu0 %v170_v0 }
  0x1a   :  { %115 = vmatpush1.bf16.msra.mxu0 %v167_v9 }
  0x1b   :  { %116 = vmatprep.subr.bf16.mxu0 %v170_v0 }
  0x1e   :  { %117 = vmatpush1.bf16.msra.mxu0 %v168_v10 }
  0x1f   :  { %132 = vmatprep.subr.bf16.mxu0 %v170_v0 }
  0x22   :  { %133 = vmatpush2.bf16.msra.mxu0 %v169_v11 }
  0x25   :  { %135 = vmatmul.mubr.bf16.vlgmr.msra.gmra.mxu0 %v17_v13 }
  0xe5   :  { %v136_v15 = vpop.f32.mrf.mxu0 }
  0xe6   :  { %v137_v16 = vadd.f32 %v149_v14, %v136_v15 }
  0xe7   :  { %v138_v17 = vpop.f32.mrf.mxu0 }
  0xe8   :  { %v142_v18 = vmax.f32 %v137_v16, 0.0 }
  0xe9   :  { %v139_v19 = vpop.f32.mrf.mxu0 }
  0xea   :  { %144 = vst.msk [vmem:[%s233_s3] sm:$0xff] %vm143_vm1, %v142_v18 }
  0xeb   :  { %v140_v20 = vpop.f32.mrf.mxu0 }

// kernel: _lambda_.130
= control target key start
LH: loop header
LB: loop body
LE: loop exit
PB: predicated region body
PF: predicated region fallthrough
CT: control target
= control target key end

     0   :  { %v180_v0 = vmov 0   ;;  %vm104_vm0 = vcmask 130048   ;;  %vm153_vm1 = vcmask 261120   ;;  %s256_s1 = inlined_call_operand.vmem [shape: bf16[144,32], index: 1, kind: input, shape index: {}]   ;;  %s257_s0 = inlined_call_operand.vmem [shape: f32[8,144], index: 0, kind: input, shape index: {}]   ;;  %s258_s2 = inlined_call_operand.vmem [shape: f32[1,32], index: 2, kind: input, shape index: {}]   ;;  %s259_s3 = inlined_call_operand.vmem [shape: f32[8,32], index: 3, kind: input, shape index: {}]   ;;  %s260_s4 = inlined_call_operand.vmem [shape: f32[8,32], index: 4, kind: input, shape index: {}]   ;;  %s261_s5 = inlined_call_operand.vmem [shape: f32[8,32], index: 5, kind: output, shape index: {}]  }
   0x1   :  { %108 = vmatprep.subr.bf16.mxu0 %v180_v0  ;;  %v171_v1 = vld [vmem:[%s256_s1 + $0x38] sm:$0xff]   ;;  %v172_v2 = vld [vmem:[%s256_s1 + $0x30] sm:$0xff]   ;;  %v173_v3 = vld [vmem:[%s256_s1 + $0x28] sm:$0xff]  }
   0x2   :  { %109 = vmatpush1.bf16.msra.mxu0 %v171_v1  ;;  %v22_v4 = vld [vmem:[%s257_s0 + $0x8] sm:$0xff]  ;;  %v174_v5 = vld [vmem:[%s256_s1 + $0x20] sm:$0xff]   ;;  %v175_v7 = vld [vmem:[%s256_s1 + $0x18] sm:$0xff]  }
   0x3   :  { %110 = vmatprep.subr.bf16.mxu0 %v180_v0  ;;  %v24_v6 = vpack.c.bf16 %v22_v4, %v22_v4  ;;  %v176_v8 = vld [vmem:[%s256_s1 + $0x10] sm:$0xff]   ;;  %v177_v9 = vld [vmem:[%s256_s1 + $0x8] sm:$0xff]   ;;  %v178_v10 = vld [vmem:[%s256_s1] sm:$0xff]  }
   0x4   :  { %v179_v11 = vld [vmem:[%s256_s1 + $0x40] sm:$0xff]  }
   0x5   :  { %169 = vmatprep.mubr.msk.bf16.mxu0 %vm104_vm0, %v24_v6  ;;  %v21_v12 = vld [vmem:[%s257_s0] sm:$0xff] }
   0x6   :  { %111 = vmatpush1.bf16.msra.mxu0 %v172_v2  ;;  %v23_v13 = vpack.c.bf16 %v21_v12, %v21_v12  ;;  %v159_v14 = vld [vmem:[%s258_s2] ss:$0 sm:$0xff] }
   0x7   :  { %112 = vmatprep.subr.bf16.mxu0 %v180_v0  ;;  %v148_v15 = vld [vmem:[%s259_s3] sm:$0xff] }
   0x8   :  { %v149_v16 = vld [vmem:[%s260_s4] sm:$0xff] }
   0x9   :  { %v150_v19 = vmul.f32 %v149_v16, %v148_v15 }
   0xa   :  { %113 = vmatpush1.bf16.msra.mxu0 %v173_v3 }
   0xb   :  { %114 = vmatprep.subr.bf16.mxu0 %v180_v0 }
   0xe   :  { %115 = vmatpush1.bf16.msra.mxu0 %v174_v5 }
   0xf   :  { %116 = vmatprep.subr.bf16.mxu0 %v180_v0 }
  0x12   :  { %117 = vmatpush1.bf16.msra.mxu0 %v175_v7 }
  0x13   :  { %118 = vmatprep.subr.bf16.mxu0 %v180_v0 }
  0x16   :  { %119 = vmatpush1.bf16.msra.mxu0 %v176_v8 }
  0x17   :  { %120 = vmatprep.subr.bf16.mxu0 %v180_v0 }
  0x1a   :  { %121 = vmatpush1.bf16.msra.mxu0 %v177_v9 }
  0x1b   :  { %122 = vmatprep.subr.bf16.mxu0 %v180_v0 }
  0x1e   :  { %123 = vmatpush1.bf16.msra.mxu0 %v178_v10 }
  0x1f   :  { %138 = vmatprep.subr.bf16.mxu0 %v180_v0 }
  0x22   :  { %139 = vmatpush2.bf16.msra.mxu0 %v179_v11 }
  0x25   :  { %141 = vmatmul.mubr.bf16.vlgmr.msra.gmra.mxu0 %v23_v13 }
  0xe5   :  { %v142_v17 = vpop.f32.mrf.mxu0 }
  0xe6   :  { %v143_v18 = vadd.f32 %v159_v14, %v142_v17 }
  0xe7   :  { %v144_v20 = vpop.f32.mrf.mxu0 }
  0xe8   :  { %v151_v21 = vmax.f32 %v143_v18, 0.0 }
  0xe9   :  { %v145_v22 = vpop.f32.mrf.mxu0 }
  0xea   :  { %v152_v23 = vadd.f32 %v151_v21, %v150_v19 }
  0xeb   :  { %v146_v24 = vpop.f32.mrf.mxu0 }
  0xec   :  { %154 = vst.msk [vmem:[%s261_s5] sm:$0xff] %vm153_vm1, %v152_v23 }

// kernel: _lambda_.145
= control target key start
LH: loop header
LB: loop body
LE: loop exit
PB: predicated region body
PF: predicated region fallthrough
CT: control target
= control target key end

     0   :  { %v339_v1 = vmov 0.0   ;;  %vm340_vm0 = vmmov 0   ;;  %vm174_vm1 = vcmask 261120   ;;  %vm259_vm2 = vcmask 519168   ;;  %s427_s1 = inlined_call_operand.vmem [shape: bf16[288,64], index: 1, kind: input, shape index: {}]   ;;  %s428_s0 = inlined_call_operand.vmem [shape: f32[4,288], index: 0, kind: input, shape index: {}]   ;;  %s429_s2 = inlined_call_operand.vmem [shape: f32[1,64], index: 2, kind: input, shape index: {}]   ;;  %s430_s3 = inlined_call_operand.vmem [shape: f32[4,64], index: 3, kind: output, shape index: {}]  }
   0x1   :  { %v320_v0 = vld [vmem:[%s427_s1 + $0x78] sm:$0xff]   ;;  %310 = vmatprep.subr.bf16.mxu1 %v339_v1  ;;  %314 = vmatprep.mubr.msk.bf16.mxu1 %vm340_vm0, %v339_v1  ;;  %v322_v3 = vld [vmem:[%s427_s1 + $0x70] sm:$0xff]   ;;  %v324_v5 = vld [vmem:[%s427_s1 + $0x68] sm:$0xff]  }
   0x2   :  { %v321_v2 = vld [vmem:[%s427_s1 + $0x38] sm:$0xff]   ;;  %285 = vmatprep.subr.bf16.mxu0 %v320_v0  ;;  %v323_v4 = vld [vmem:[%s427_s1 + $0x30] sm:$0xff]   ;;  %v325_v6 = vld [vmem:[%s427_s1 + $0x28] sm:$0xff]  }
   0x3   :  { %286 = vmatpush3.bf16.msra.mxu0 %v321_v2  ;;  %v326_v7 = vld [vmem:[%s427_s1 + $0x60] sm:$0xff]   ;;  %v328_v9 = vld [vmem:[%s427_s1 + $0x58] sm:$0xff]   ;;  %v333_v10 = vld [vmem:[%s427_s1 + $0x88] sm:$0xff]  }
   0x4   :  { %287 = vmatprep.subr.bf16.mxu0 %v322_v3  ;;  %v327_v8 = vld [vmem:[%s427_s1 + $0x20] sm:$0xff]   ;;  %v329_v11 = vld [vmem:[%s427_s1 + $0x18] sm:$0xff]   ;;  %v330_v12 = vld [vmem:[%s427_s1 + $0x50] sm:$0xff]   ;;  %311 = vmatpush3.bf16.msra.mxu1 %v333_v10 }
   0x5   :  { %312 = vmatprep.subr.bf16.mxu1 %v339_v1  ;;  %v336_v13 = vld [vmem:[%s427_s1 + $0x80] sm:$0xff]   ;;  %v16_v15 = vld [vmem:[%s428_s0 + $0x8] sm:$0xf]  ;;  %v331_v16 = vld [vmem:[%s427_s1 + $0x10] sm:$0xff]  }
   0x6   :  { %v15_v14 = vld [vmem:[%s428_s0] sm:$0xff]  ;;  %v22_v18 = vpack.c.bf16 %v16_v15, %v16_v15  ;;  %v332_v19 = vld [vmem:[%s427_s1 + $0x48] sm:$0xff]  }
   0x7   :  { %288 = vmatpush3.bf16.msra.mxu0 %v323_v4  ;;  %v18_v17 = vcombine.high %v15_v14, %v15_v14  ;;  %v334_v21 = vld [vmem:[%s427_s1 + $0x8] sm:$0xff]   ;;  %v335_v22 = vld [vmem:[%s427_s1 + $0x40] sm:$0xff]   ;;  %v20_v24 = vpack.c.bf16 %v15_v14, %v15_v14 }
   0x8   :  { %289 = vmatprep.subr.bf16.mxu0 %v324_v5  ;;  %313 = vmatpush3.bf16.msra.mxu1 %v336_v13  ;;  %v337_v23 = vld [vmem:[%s427_s1] sm:$0xff]  }
   0x9   :  { %v21_v20 = vpack.c.bf16 %v18_v17, %v18_v17  ;;  %v265_v30 = vld [vmem:[%s429_s2] ss:$0 sm:$0xff] }
   0xb   :  { %290 = vmatpush3.bf16.msra.mxu0 %v325_v6  ;;  %315 = vmatmul.mubr.msk.bf16.vlgmr.msra.gmra.mxu1 %vm174_vm1, %v22_v18 }
   0xc   :  { %291 = vmatprep.subr.bf16.mxu0 %v326_v7  ;;  %210 = vmatprep.mubr.bf16.mxu0 %v21_v20 }
   0xf   :  { %292 = vmatpush3.bf16.msra.mxu0 %v327_v8 }
  0x10   :  { %293 = vmatprep.subr.bf16.mxu0 %v328_v9 }
  0x13   :  { %294 = vmatpush3.bf16.msra.mxu0 %v329_v11 }
  0x14   :  { %295 = vmatprep.subr.bf16.mxu0 %v330_v12 }
  0x17   :  { %296 = vmatpush3.bf16.msra.mxu0 %v331_v16 }
  0x18   :  { %297 = vmatprep.subr.bf16.mxu0 %v332_v19 }
  0x1b   :  { %298 = vmatpush3.bf16.msra.mxu0 %v334_v21 }
  0x1c   :  { %299 = vmatprep.subr.bf16.mxu0 %v335_v22 }
  0x1f   :  { %300 = vmatpush3.bf16.msra.mxu0 %v337_v23 }
  0x22   :  { %211 = vmatmul.mubr.bf16.vlgmr.msra.gmra.mxu0 %v20_v24 }
  0xcb   :  { %v252_v25 = vpop.f32.mrf.mxu1 }
  0xcd   :  { %v316_v26 = vpop.f32.mrf.mxu1 }
  0xcf   :  { %v255_v27 = vpop.f32.mrf.mxu1 }
  0xd1   :  { %v317_v28 = vpop.f32.mrf.mxu1 }
  0xe2   :  { %v301_v29 = vpop.f32.mrf.mxu0 }
  0xe4   :  { %v302_v31 = vpop.f32.mrf.mxu0 }
  0xe5   :  { %v303_v32 = vadd.f32 %v302_v31, %v301_v29 }
  0xe6   :  { %v304_v33 = vpop.f32.mrf.mxu0 }
  0xe7   :  { %v213_v34 = vadd.f32 %v303_v32, %v265_v30 }
  0xe8   :  { %v305_v35 = vpop.f32.mrf.mxu0 }
  0xe9   :  { %v253_v36 = vadd.f32 %v252_v25, %v213_v34 }
  0xeb   :  { %v258_v37 = vmax.f32 %v253_v36, 0.0 }
  0xed   :  { %260 = vst.msk [vmem:[%s430_s3] sm:$0xf] %vm259_vm2, %v258_v37 }

// kernel: _lambda_.146
= control target key start
LH: loop header
LB: loop body
LE: loop exit
PB: predicated region body
PF: predicated region fallthrough
CT: control target
= control target key end

     0   :  { %v267_v0 = vmov 0.0   ;;  %vm268_vm0 = vmmov 0   ;;  %vm64_vm1 = vcmask 523264   ;;  %vm109_vm2 = vcmask 257024   ;;  %s343_s3 = inlined_call_operand.vmem [shape: bf16[64,64], index: 3, kind: input, shape index: {}]   ;;  %s344_s1 = inlined_call_operand.vmem [shape: bf16[64,32], index: 1, kind: input, shape index: {}]   ;;  %s345_s0 = inlined_call_operand.vmem [shape: f32[4,64], index: 0, kind: input, shape index: {}]   ;;  %s346_s4 = inlined_call_operand.vmem [shape: f32[1,64], index: 4, kind: input, shape index: {}]   ;;  %s347_s2 = inlined_call_operand.vmem [shape: f32[1,32], index: 2, kind: input, shape index: {}]   ;;  %s348_s5 = inlined_call_operand.vmem [shape: f32[4,32], index: 5, kind: output, shape index: {0}]   ;;  %s349_s6 = inlined_call_operand.vmem [shape: f32[4,64], index: 6, kind: output, shape index: {1}]  }
   0x1   :  { %241 = vmatprep.subr.bf16.mxu1 %v267_v0  ;;  %v255_v1 = vld [vmem:[%s343_s3 + $0x18] sm:$0xff]   ;;  %249 = vmatprep.mubr.msk.bf16.mxu1 %vm268_vm0, %v267_v0  ;;  %v256_v2 = vld [vmem:[%s343_s3 + $0x10] sm:$0xff]   ;;  %v257_v4 = vld [vmem:[%s343_s3 + $0x8] sm:$0xff]   ;;  %vm196_vm3 = vcmask 519168  }
   0x2   :  { %229 = vmatprep.subr.bf16.mxu0 %v267_v0  ;;  %237 = vmatprep.mubr.msk.bf16.mxu0 %vm268_vm0, %v267_v0  ;;  %v259_v3 = vld [vmem:[%s344_s1 + $0x18] sm:$0xff]   ;;  %v260_v5 = vld [vmem:[%s344_s1 + $0x10] sm:$0xff]   ;;  %v258_v6 = vld [vmem:[%s343_s3] sm:$0xff]  }
   0x3   :  { %242 = vmatpush3.bf16.msra.mxu1 %v255_v1  ;;  %230 = vmatpush3.bf16.msra.mxu0 %v259_v3  ;;  %v23_v7 = vld [vmem:[%s345_s0] sm:$0xf]  ;;  %v261_v8 = vld [vmem:[%s344_s1 + $0x8] sm:$0xff]  }
   0x4   :  { %243 = vmatprep.subr.bf16.mxu1 %v267_v0  ;;  %231 = vmatprep.subr.bf16.mxu0 %v267_v0  ;;  %v24_v9 = vpack.c.bf16 %v23_v7, %v23_v7  ;;  %v262_v10 = vld [vmem:[%s344_s1] sm:$0xff]  }
   0x5   :  { %v212_v11 = vld [vmem:[%s346_s4] ss:$0 sm:$0xff] }
   0x6   :  { %v206_v16 = vld [vmem:[%s347_s2] ss:$0 sm:$0xff] }
   0x7   :  { %244 = vmatpush3.bf16.msra.mxu1 %v256_v2  ;;  %232 = vmatpush3.bf16.msra.mxu0 %v260_v5 }
   0x8   :  { %245 = vmatprep.subr.bf16.mxu1 %v267_v0  ;;  %233 = vmatprep.subr.bf16.mxu0 %v267_v0 }
   0xb   :  { %246 = vmatpush3.bf16.msra.mxu1 %v257_v4  ;;  %234 = vmatpush3.bf16.msra.mxu0 %v261_v8 }
   0xc   :  { %247 = vmatprep.subr.bf16.mxu1 %v267_v0  ;;  %235 = vmatprep.subr.bf16.mxu0 %v267_v0 }
   0xf   :  { %248 = vmatpush3.bf16.msra.mxu1 %v258_v6  ;;  %236 = vmatpush3.bf16.msra.mxu0 %v262_v10 }
  0x12   :  { %250 = vmatmul.mubr.msk.bf16.vlgmr.msra.gmra.mxu1 %vm64_vm1, %v24_v9  ;;  %238 = vmatmul.mubr.msk.bf16.vlgmr.msra.gmra.mxu0 %vm64_vm1, %v24_v9 }
  0xd2   :  { %v184_v12 = vpop.f32.mrf.mxu1  ;;  %v102_v18 = vpop.f32.mrf.mxu0 }
  0xd3   :  { %v185_v13 = vadd.f32 %v212_v11, %v184_v12  ;;  %v103_v20 = vadd.f32 %v206_v16, %v102_v18 }
  0xd4   :  { %v251_v14 = vpop.f32.mrf.mxu1  ;;  %v239_v21 = vpop.f32.mrf.mxu0 }
  0xd5   :  { %v218_v15 = vmul.f32 -1.442695, %v185_v13  ;;  %v108_v22 = vmax.f32 %v103_v20, 0.0 }
  0xd6   :  { %v187_v17 = vpop.f32.mrf.mxu1  ;;  %v105_v23 = vpop.f32.mrf.mxu0 }
  0xd7   :  { %263 = vpow2.f32 %v218_v15  ;;  %110 = vst.msk [vmem:[%s348_s5] sm:$0xf] %vm109_vm2, %v108_v22 }
  0xd8   :  { %v252_v19 = vpop.f32.mrf.mxu1  ;;  %v240_v24 = vpop.f32.mrf.mxu0 }
  0xe4   :  { %v264_v25 = vpop.eup %263 }
  0xe5   :  { %v193_v26 = vadd.f32 1.0, %v264_v25 }
  0xe7   :  { %265 = vrcp.f32 %v193_v26 }
  0xf4   :  { %v266_v27 = vpop.eup %265 }
  0xf5   :  { %197 = vst.msk [vmem:[%s349_s6] sm:$0xf] %vm196_vm3, %v266_v27 }

// kernel: _lambda_.147
= control target key start
LH: loop header
LB: loop body
LE: loop exit
PB: predicated region body
PF: predicated region fallthrough
CT: control target
= control target key end

     0   :  { %v401_v1 = vmov 0.0   ;;  %vm402_vm0 = vmmov 0   ;;  %vm212_vm1 = vcmask 785408   ;;  %vm301_vm2 = vcmask 519168   ;;  %s517_s1 = inlined_call_operand.vmem [shape: bf16[352,64], index: 1, kind: input, shape index: {}]   ;;  %s518_s0 = inlined_call_operand.vmem [shape: f32[4,352], index: 0, kind: input, shape index: {}]   ;;  %s519_s2 = inlined_call_operand.vmem [shape: f32[1,64], index: 2, kind: input, shape index: {}]   ;;  %s520_s3 = inlined_call_operand.vmem [shape: f32[4,64], index: 3, kind: input, shape index: {}]   ;;  %s521_s4 = inlined_call_operand.vmem [shape: f32[4,64], index: 4, kind: input, shape index: {}]   ;;  %s522_s5 = inlined_call_operand.vmem [shape: f32[4,64], index: 5, kind: output, shape index: {}]  }
   0x1   :  { %v378_v0 = vld [vmem:[%s517_s1 + $0x78] sm:$0xff]   ;;  %360 = vmatprep.subr.bf16.mxu1 %v401_v1  ;;  %372 = vmatprep.mubr.msk.bf16.mxu1 %vm402_vm0, %v401_v1  ;;  %v380_v3 = vld [vmem:[%s517_s1 + $0x70] sm:$0xff]   ;;  %v382_v5 = vld [vmem:[%s517_s1 + $0x68] sm:$0xff]  }
   0x2   :  { %v379_v2 = vld [vmem:[%s517_s1 + $0x38] sm:$0xff]   ;;  %331 = vmatprep.subr.bf16.mxu0 %v378_v0  ;;  %v381_v4 = vld [vmem:[%s517_s1 + $0x30] sm:$0xff]   ;;  %v384_v6 = vld [vmem:[%s517_s1 + $0xa8] sm:$0xff]  }
   0x3   :  { %332 = vmatpush3.bf16.msra.mxu0 %v379_v2  ;;  %v383_v7 = vld [vmem:[%s517_s1 + $0x28] sm:$0xff]   ;;  %361 = vmatpush3.bf16.msra.mxu1 %v384_v6  ;;  %v385_v8 = vld [vmem:[%s517_s1 + $0x60] sm:$0xff]   ;;  %v388_v11 = vld [vmem:[%s517_s1 + $0x58] sm:$0xff]  }
   0x4   :  { %333 = vmatprep.subr.bf16.mxu0 %v380_v3  ;;  %362 = vmatprep.subr.bf16.mxu1 %v401_v1  ;;  %v387_v9 = vld [vmem:[%s517_s1 + $0xa0] sm:$0xff]   ;;  %v390_v12 = vld [vmem:[%s517_s1 + $0x98] sm:$0xff]   ;;  %v391_v14 = vld [vmem:[%s517_s1 + $0x50] sm:$0xff]  }
   0x5   :  { %v386_v10 = vld [vmem:[%s517_s1 + $0x20] sm:$0xff]   ;;  %v389_v13 = vld [vmem:[%s517_s1 + $0x18] sm:$0xff]   ;;  %v393_v15 = vld [vmem:[%s517_s1 + $0x90] sm:$0xff]  }
   0x6   :  { %v392_v16 = vld [vmem:[%s517_s1 + $0x10] sm:$0xff]   ;;  %v394_v17 = vld [vmem:[%s517_s1 + $0x48] sm:$0xff]   ;;  %v21_v19 = vld [vmem:[%s518_s0] sm:$0xff] }
   0x7   :  { %334 = vmatpush3.bf16.msra.mxu0 %v381_v4  ;;  %363 = vmatpush3.bf16.msra.mxu1 %v387_v9  ;;  %v396_v18 = vld [vmem:[%s517_s1 + $0x88] sm:$0xff]   ;;  %v24_v21 = vcombine.high %v21_v19, %v21_v19  ;;  %v397_v22 = vld [vmem:[%s517_s1 + $0x40] sm:$0xff]   ;;  %v26_v28 = vpack.c.bf16 %v21_v19, %v21_v19 }
   0x8   :  { %335 = vmatprep.subr.bf16.mxu0 %v382_v5  ;;  %364 = vmatprep.subr.bf16.mxu1 %v401_v1  ;;  %v395_v20 = vld [vmem:[%s517_s1 + $0x8] sm:$0xff]   ;;  %v399_v23 = vld [vmem:[%s517_s1 + $0x80] sm:$0xff]  }
   0x9   :  { %v22_v24 = vld [vmem:[%s518_s0 + $0x8] sm:$0xf]  ;;  %v27_v25 = vpack.c.bf16 %v24_v21, %v24_v21  ;;  %v398_v26 = vld [vmem:[%s517_s1] sm:$0xff]  }
   0xa   :  { %v28_v27 = vpack.c.bf16 %v22_v24, %v22_v24  ;;  %v307_v33 = vld [vmem:[%s519_s2] ss:$0 sm:$0xff] }
   0xb   :  { %336 = vmatpush3.bf16.msra.mxu0 %v383_v7  ;;  %365 = vmatpush3.bf16.msra.mxu1 %v390_v12  ;;  %v296_v37 = vld [vmem:[%s520_s3] sm:$0xf] }
   0xc   :  { %337 = vmatprep.subr.bf16.mxu0 %v385_v8  ;;  %366 = vmatprep.subr.bf16.mxu1 %v401_v1  ;;  %v297_v38 = vld [vmem:[%s521_s4] sm:$0xf] }
   0xd   :  { %248 = vmatprep.mubr.bf16.mxu0 %v27_v25  ;;  %v298_v43 = vmul.f32 %v297_v38, %v296_v37 }
   0xf   :  { %338 = vmatpush3.bf16.msra.mxu0 %v386_v10  ;;  %367 = vmatpush3.bf16.msra.mxu1 %v393_v15 }
  0x10   :  { %339 = vmatprep.subr.bf16.mxu0 %v388_v11  ;;  %368 = vmatprep.subr.bf16.mxu1 %v401_v1 }
  0x13   :  { %340 = vmatpush3.bf16.msra.mxu0 %v389_v13  ;;  %369 = vmatpush3.bf16.msra.mxu1 %v396_v18 }
  0x14   :  { %341 = vmatprep.subr.bf16.mxu0 %v391_v14  ;;  %370 = vmatprep.subr.bf16.mxu1 %v401_v1 }
  0x17   :  { %342 = vmatpush3.bf16.msra.mxu0 %v392_v16  ;;  %371 = vmatpush3.bf16.msra.mxu1 %v399_v23 }
  0x18   :  { %343 = vmatprep.subr.bf16.mxu0 %v394_v17 }
  0x1a   :  { %373 = vmatmul.mubr.msk.bf16.vlgmr.msra.gmra.mxu1 %vm212_vm1, %v28_v27 }
  0x1b   :  { %344 = vmatpush3.bf16.msra.mxu0 %v395_v20 }
  0x1c   :  { %345 = vmatprep.subr.bf16.mxu0 %v397_v22 }
  0x1f   :  { %346 = vmatpush3.bf16.msra.mxu0 %v398_v26 }
  0x22   :  { %249 = vmatmul.mubr.bf16.vlgmr.msra.gmra.mxu0 %v26_v28 }
  0xda   :  { %v290_v29 = vpop.f32.mrf.mxu1 }
  0xdc   :  { %v374_v30 = vpop.f32.mrf.mxu1 }
  0xde   :  { %v293_v32 = vpop.f32.mrf.mxu1 }
  0xe0   :  { %v375_v36 = vpop.f32.mrf.mxu1 }
  0xe2   :  { %v347_v31 = vpop.f32.mrf.mxu0 }
  0xe4   :  { %v348_v34 = vpop.f32.mrf.mxu0 }
  0xe5   :  { %v349_v35 = vadd.f32 %v348_v34, %v347_v31 }
  0xe6   :  { %v350_v39 = vpop.f32.mrf.mxu0 }
  0xe7   :  { %v251_v40 = vadd.f32 %v349_v35, %v307_v33 }
  0xe8   :  { %v351_v41 = vpop.f32.mrf.mxu0 }
  0xe9   :  { %v291_v42 = vadd.f32 %v290_v29, %v251_v40 }
  0xeb   :  { %v299_v44 = vmax.f32 %v291_v42, 0.0 }
  0xed   :  { %v300_v45 = vadd.f32 %v299_v44, %v298_v43 }
  0xef   :  { %302 = vst.msk [vmem:[%s522_s5] sm:$0xf] %vm301_vm2, %v300_v45 }

// kernel: _lambda_.158
= control target key start
LH: loop header
LB: loop body
LE: loop exit
PB: predicated region body
PF: predicated region fallthrough
CT: control target
= control target key end

     0   :  { %v135_v0 = vmov 0.0   ;;  %vm136_vm0 = vmmov 0   ;;  %vm56_vm1 = vcmask 523264   ;;  %vm100_vm2 = vcmask 27648   ;;  %s178_s1 = inlined_call_operand.vmem [shape: bf16[64,4], index: 1, kind: input, shape index: {}]   ;;  %s179_s0 = inlined_call_operand.vmem [shape: f32[4,64], index: 0, kind: input, shape index: {}]   ;;  %s180_s2 = inlined_call_operand.vmem [shape: f32[1,4], index: 2, kind: input, shape index: {}]   ;;  %s181_s3 = inlined_call_operand.vmem [shape: f32[4,4], index: 3, kind: output, shape index: {}]  }
   0x1   :  { %117 = vmatprep.subr.bf16.mxu0 %v135_v0  ;;  %v131_v1 = vld [vmem:[%s178_s1 + $0x18] sm:$0xff]   ;;  %125 = vmatprep.mubr.msk.bf16.mxu0 %vm136_vm0, %v135_v0  ;;  %v132_v2 = vld [vmem:[%s178_s1 + $0x10] sm:$0xff]   ;;  %v133_v3 = vld [vmem:[%s178_s1 + $0x8] sm:$0xff]  }
   0x2   :  { %118 = vmatpush3.bf16.msra.mxu0 %v131_v1  ;;  %v134_v4 = vld [vmem:[%s178_s1] sm:$0xff]  }
   0x3   :  { %119 = vmatprep.subr.bf16.mxu0 %v135_v0  ;;  %v15_v5 = vld [vmem:[%s179_s0] sm:$0xf] }
   0x4   :  { %v16_v6 = vpack.c.bf16 %v15_v5, %v15_v5  ;;  %v106_v7 = vld [vmem:[%s180_s2] ss:$0 sm:$0xff] }
   0x6   :  { %120 = vmatpush3.bf16.msra.mxu0 %v132_v2 }
   0x7   :  { %121 = vmatprep.subr.bf16.mxu0 %v135_v0 }
   0xa   :  { %122 = vmatpush3.bf16.msra.mxu0 %v133_v3 }
   0xb   :  { %123 = vmatprep.subr.bf16.mxu0 %v135_v0 }
   0xe   :  { %124 = vmatpush3.bf16.msra.mxu0 %v134_v4 }
  0x11   :  { %126 = vmatmul.mubr.msk.bf16.vlgmr.msra.gmra.mxu0 %vm56_vm1, %v16_v6 }
  0xd1   :  { %v94_v8 = vpop.f32.mrf.mxu0 }
  0xd2   :  { %v95_v9 = vadd.f32 %v106_v7, %v94_v8 }
  0xd3   :  { %v127_v10 = vpop.f32.mrf.mxu0 }
  0xd4   :  { %101 = vst.msk [vmem:[%s181_s3] sm:$0xf] %vm100_vm2, %v95_v9 }
  0xd5   :  { %v97_v11 = vpop.f32.mrf.mxu0 }
  0xd7   :  { %v128_v12 = vpop.f32.mrf.mxu0 }

// kernel: _lambda_.160
= control target key start
LH: loop header
LB: loop body
LE: loop exit
PB: predicated region body
PF: predicated region fallthrough
CT: control target
= control target key end

     0   :  { %vm29_vm0 = vcmask 1040384   ;;  %v91_v0 = vmov 0.0   ;;  %vm92_vm1 = vmmov 0   ;;  %vm25_vm2 = vcmask 15360   ;;  %s125_s1 = inlined_call_operand.vmem [shape: bf16[2,32], index: 1, kind: input, shape index: {}]   ;;  %s126_s0 = inlined_call_operand.vmem [shape: f32[8,2], index: 0, kind: input, shape index: {}]   ;;  %s127_s2 = inlined_call_operand.vmem [shape: f32[1,32], index: 2, kind: input, shape index: {}]   ;;  %s128_s3 = inlined_call_operand.vmem [shape: f32[8,32], index: 3, kind: output, shape index: {}]  }
   0x1   :  { %83 = vmatprep.subr.bf16.mxu0 %v91_v0  ;;  %v17_v1 = vld [vmem:[%s125_s1] sm:$0x1]  ;;  %85 = vmatprep.mubr.msk.bf16.mxu0 %vm92_vm1, %v91_v0  ;;  %vm73_vm3 = vcmask 261120  }
   0x2   :  { %v15_v2 = vld [vmem:[%s126_s0] sm:$0xff]  ;;  %v31_v3 = vsel %vm29_vm0, %v17_v1, 0 }
   0x3   :  { %v16_v4 = vpack.c.bf16 %v15_v2, %v15_v2  ;;  %84 = vmatpush3.bf16.msra.mxu0 %v31_v3  ;;  %v79_v5 = vld [vmem:[%s127_s2] ss:$0 sm:$0xff] }
   0x6   :  { %86 = vmatmul.mubr.msk.bf16.vlgmr.msra.gmra.mxu0 %vm25_vm2, %v16_v4 }
  0xc6   :  { %v67_v6 = vpop.f32.mrf.mxu0 }
  0xc7   :  { %v68_v7 = vadd.f32 %v79_v5, %v67_v6 }
  0xc8   :  { %v87_v8 = vpop.f32.mrf.mxu0 }
  0xc9   :  { %74 = vst.msk [vmem:[%s128_s3] sm:$0xff] %vm73_vm3, %v68_v7 }
  0xca   :  { %v70_v9 = vpop.f32.mrf.mxu0 }
  0xcc   :  { %v88_v10 = vpop.f32.mrf.mxu0 }

// kernel: _lambda_.159
= control target key start
LH: loop header
LB: loop body
LE: loop exit
PB: predicated region body
PF: predicated region fallthrough
CT: control target
= control target key end

     0   :  { %vm64_vm0 = vcmask 1040384   ;;  %vm65_vm1 = vcmask 1041408   ;;  %v152_v0 = vmov 0.0   ;;  %v153_v2 = vmov 65535   ;;  %s199_s1 = inlined_call_operand.vmem [shape: bf16[67,64], index: 1, kind: input, shape index: {}]   ;;  %s200_s0 = inlined_call_operand.vmem [shape: f32[2,67], index: 0, kind: input, shape index: {}]   ;;  %s201_s2 = inlined_call_operand.vmem [shape: f32[1,64], index: 2, kind: input, shape index: {}]   ;;  %s202_s3 = inlined_call_operand.vmem [shape: f32[2,64], index: 3, kind: output, shape index: {}]  }
   0x1   :  { %130 = vmatprep.subr.bf16.mxu0 %v152_v0  ;;  %v147_v1 = vld [vmem:[%s199_s1 + $0x20] ss:$0 sps:$4 sm:$0x33]   ;;  %v66_v3 = vsel %vm64_vm0, 4294967295, %v153_v2  ;;  %vm154_vm2 = vmmov 0   ;;  %v148_v6 = vld [vmem:[%s199_s1 + $0x18] sm:$0xff]  }
   0x2   :  { %v67_v4 = vsel %vm65_vm1, %v66_v3, 0  ;;  %140 = vmatprep.mubr.msk.bf16.mxu0 %vm154_vm2, %v152_v0  ;;  %v149_v7 = vld [vmem:[%s199_s1 + $0x10] sm:$0xff]   ;;  %v150_v8 = vld [vmem:[%s199_s1 + $0x8] sm:$0xff]   ;;  %v151_v9 = vld [vmem:[%s199_s1] sm:$0xff]   ;;  %vm60_vm3 = vcmask 547840   ;;  %vm111_vm4 = vcmask 517120  }
   0x3   :  { %v69_v5 = vand.u32 %v147_v1, %v67_v4  ;;  %v15_v10 = vld [vmem:[%s200_s0] sm:$0x3] }
   0x4   :  { %v16_v11 = vpack.c.bf16 %v15_v10, %v15_v10  ;;  %v117_v12 = vld [vmem:[%s201_s2] ss:$0 sm:$0xff] }
   0x5   :  { %131 = vmatpush3.bf16.msra.mxu0 %v69_v5 }
   0x6   :  { %132 = vmatprep.subr.bf16.mxu0 %v152_v0 }
   0x9   :  { %133 = vmatpush3.bf16.msra.mxu0 %v148_v6 }
   0xa   :  { %134 = vmatprep.subr.bf16.mxu0 %v152_v0 }
   0xd   :  { %135 = vmatpush3.bf16.msra.mxu0 %v149_v7 }
   0xe   :  { %136 = vmatprep.subr.bf16.mxu0 %v152_v0 }
  0x11   :  { %137 = vmatpush3.bf16.msra.mxu0 %v150_v8 }
  0x12   :  { %138 = vmatprep.subr.bf16.mxu0 %v152_v0 }
  0x15   :  { %139 = vmatpush3.bf16.msra.mxu0 %v151_v9 }
  0x18   :  { %141 = vmatmul.mubr.msk.bf16.vlgmr.msra.gmra.mxu0 %vm60_vm3, %v16_v11 }
  0xd8   :  { %v105_v13 = vpop.f32.mrf.mxu0 }
  0xd9   :  { %v106_v14 = vadd.f32 %v117_v12, %v105_v13 }
  0xda   :  { %v142_v15 = vpop.f32.mrf.mxu0 }
  0xdb   :  { %112 = vst.msk [vmem:[%s202_s3] sm:$0x3] %vm111_vm4, %v106_v14 }
  0xdc   :  { %v108_v16 = vpop.f32.mrf.mxu0 }
  0xde   :  { %v143_v17 = vpop.f32.mrf.mxu0 }

// kernel: _lambda_.162
= control target key start
LH: loop header
LB: loop body
LE: loop exit
PB: predicated region body
PF: predicated region fallthrough
CT: control target
= control target key end

     0   :  { %v108_v0 = vmov 0.0   ;;  %vm109_vm0 = vmmov 0   ;;  %vm40_vm1 = vcmask 261120   ;;  %s145_s1 = inlined_call_operand.vmem [shape: bf16[32,128], index: 1, kind: input, shape index: {}]   ;;  %s146_s0 = inlined_call_operand.vmem [shape: f32[8,32], index: 0, kind: input, shape index: {}]   ;;  %s147_s2 = inlined_call_operand.vmem [shape: f32[1,128], index: 2, kind: input, shape index: {}]   ;;  %s148_s3 = inlined_call_operand.vmem [shape: f32[8,128], index: 3, kind: output, shape index: {}]  }
   0x1   :  { %96 = vmatprep.subr.bf16.mxu0 %v108_v0  ;;  %v106_v1 = vld [vmem:[%s145_s1 + $0x8] sm:$0xff]   ;;  %100 = vmatprep.mubr.msk.bf16.mxu0 %vm109_vm0, %v108_v0  ;;  %v107_v2 = vld [vmem:[%s145_s1] sm:$0xff]  }
   0x2   :  { %97 = vmatpush3.bf16.msra.mxu0 %v106_v1  ;;  %v15_v3 = vld [vmem:[%s146_s0] sm:$0xff] }
   0x3   :  { %98 = vmatprep.subr.bf16.mxu0 %v108_v0  ;;  %v16_v4 = vpack.c.bf16 %v15_v3, %v15_v3  ;;  %v89_v5 = vld [vmem:[%s147_s2] ss:$0 sm:$0xff] }
   0x6   :  { %99 = vmatpush3.bf16.msra.mxu0 %v107_v2 }
   0x9   :  { %101 = vmatmul.mubr.msk.bf16.vlgmr.msra.gmra.mxu0 %vm40_vm1, %v16_v4 }
  0xc9   :  { %v78_v6 = vpop.f32.mrf.mxu0 }
  0xca   :  { %v79_v7 = vadd.f32 %v89_v5, %v78_v6 }
  0xcb   :  { %v102_v8 = vpop.f32.mrf.mxu0 }
  0xcc   :  { %84 = vst [vmem:[%s148_s3] sm:$0xff] %v79_v7 }
  0xcd   :  { %v81_v9 = vpop.f32.mrf.mxu0 }
  0xcf   :  { %v103_v10 = vpop.f32.mrf.mxu0 }

// kernel: _lambda_.161
= control target key start
LH: loop header
LB: loop body
LE: loop exit
PB: predicated region body
PF: predicated region fallthrough
CT: control target
= control target key end

     0   :  { %vm64_vm0 = vcmask 1040384   ;;  %vm65_vm1 = vcmask 1041408   ;;  %v151_v0 = vmov 0.0   ;;  %v152_v2 = vmov 65535   ;;  %s198_s1 = inlined_call_operand.vmem [shape: bf16[67,128], index: 1, kind: input, shape index: {}]   ;;  %s199_s0 = inlined_call_operand.vmem [shape: f32[2,67], index: 0, kind: input, shape index: {}]   ;;  %s200_s2 = inlined_call_operand.vmem [shape: f32[1,128], index: 2, kind: input, shape index: {}]   ;;  %s201_s3 = inlined_call_operand.vmem [shape: f32[2,128], index: 3, kind: output, shape index: {}]  }
   0x1   :  { %129 = vmatprep.subr.bf16.mxu0 %v151_v0  ;;  %v146_v1 = vld [vmem:[%s198_s1 + $0x20] ss:$0 sps:$4 sm:$0x33]   ;;  %v66_v3 = vsel %vm64_vm0, 4294967295, %v152_v2  ;;  %vm153_vm2 = vmmov 0   ;;  %v147_v6 = vld [vmem:[%s198_s1 + $0x18] sm:$0xff]  }
   0x2   :  { %v67_v4 = vsel %vm65_vm1, %v66_v3, 0  ;;  %139 = vmatprep.mubr.msk.bf16.mxu0 %vm153_vm2, %v151_v0  ;;  %v148_v7 = vld [vmem:[%s198_s1 + $0x10] sm:$0xff]   ;;  %v149_v8 = vld [vmem:[%s198_s1 + $0x8] sm:$0xff]   ;;  %v150_v9 = vld [vmem:[%s198_s1] sm:$0xff]   ;;  %vm60_vm3 = vcmask 547840  }
   0x3   :  { %v69_v5 = vand.u32 %v146_v1, %v67_v4  ;;  %v15_v10 = vld [vmem:[%s199_s0] sm:$0x3] }
   0x4   :  { %v16_v11 = vpack.c.bf16 %v15_v10, %v15_v10  ;;  %v116_v12 = vld [vmem:[%s200_s2] ss:$0 sm:$0xff] }
   0x5   :  { %130 = vmatpush3.bf16.msra.mxu0 %v69_v5 }
   0x6   :  { %131 = vmatprep.subr.bf16.mxu0 %v151_v0 }
   0x9   :  { %132 = vmatpush3.bf16.msra.mxu0 %v147_v6 }
   0xa   :  { %133 = vmatprep.subr.bf16.mxu0 %v151_v0 }
   0xd   :  { %134 = vmatpush3.bf16.msra.mxu0 %v148_v7 }
   0xe   :  { %135 = vmatprep.subr.bf16.mxu0 %v151_v0 }
  0x11   :  { %136 = vmatpush3.bf16.msra.mxu0 %v149_v8 }
  0x12   :  { %137 = vmatprep.subr.bf16.mxu0 %v151_v0 }
  0x15   :  { %138 = vmatpush3.bf16.msra.mxu0 %v150_v9 }
  0x18   :  { %140 = vmatmul.mubr.msk.bf16.vlgmr.msra.gmra.mxu0 %vm60_vm3, %v16_v11 }
  0xd8   :  { %v105_v13 = vpop.f32.mrf.mxu0 }
  0xd9   :  { %v106_v14 = vadd.f32 %v116_v12, %v105_v13 }
  0xda   :  { %v141_v15 = vpop.f32.mrf.mxu0 }
  0xdb   :  { %111 = vst [vmem:[%s201_s3] sm:$0x3] %v106_v14 }
  0xdc   :  { %v108_v16 = vpop.f32.mrf.mxu0 }
  0xde   :  { %v142_v17 = vpop.f32.mrf.mxu0 }

// kernel: _lambda_.163
= control target key start
LH: loop header
LB: loop body
LE: loop exit
PB: predicated region body
PF: predicated region fallthrough
CT: control target
= control target key end

     0   :  { %vm25_vm0 = vcmask 1041408   ;;  %v433_v4 = vmov 0.0   ;;  %v434_v29 = vmov 0   ;;  %vm435_vm1 = vmmov 0   ;;  %s592_s0 = inlined_call_operand.vmem [shape: f32[10,128], index: 0, kind: input, shape index: {}]   ;;  %s593_s3 = inlined_call_operand.vmem [shape: bf16[128,384], index: 3, kind: input, shape index: {}]   ;;  %s594_s1 = inlined_call_operand.vmem [shape: f32[1,128], index: 1, kind: input, shape index: {}]   ;;  %s595_s2 = inlined_call_operand.vmem [shape: f32[1,128], index: 2, kind: input, shape index: {}]   ;;  %s596_s4 = inlined_call_operand.vmem [shape: f32[1,384], index: 4, kind: input, shape index: {}]   ;;  %s597_s5 = inlined_call_operand.vmem [shape: f32[10,384], index: 5, kind: output, shape index: {}]  }
   0x1   :  { %v22_v0 = vld [vmem:[%s592_s0 + $0x8] sm:$0x3]  ;;  %v21_v2 = vld [vmem:[%s592_s0] sm:$0xff]  ;;  %v397_v3 = vld [vmem:[%s593_s3 + $0xac] ss:$12 sps:$4 sm:$0xff]   ;;  %374 = vmatprep.subr.bf16.mxu1 %v433_v4  ;;  %277 = vmatprep.mubr.bf16.mxu0 %v434_v29  ;;  %v102_v55 = vlaneseq }
   0x2   :  { %v26_v1 = vsel %vm25_vm0, %v22_v0, 0.0  ;;  %v399_v5 = vld [vmem:[%s593_s3 + $0xa8] ss:$12 sps:$4 sm:$0xff]   ;;  %245 = vmatprep.subr.bf16.mxu0 %v397_v3  ;;  %v400_v6 = vld [vmem:[%s593_s3 + $0xb0] ss:$12 sps:$4 sm:$0xff]   ;;  %390 = vmatprep.mubr.msk.bf16.mxu1 %vm435_vm1, %v433_v4 }
   0x3   :  { %27 = vadd.xlane.f32.xlu0 %v26_v1  ;;  %246 = vmatpush1.bf16.msra.mxu0 %v399_v5  ;;  %v401_v16 = vld [vmem:[%s593_s3 + $0x94] ss:$12 sps:$4 sm:$0xff]   ;;  %v403_v17 = vld [vmem:[%s593_s3 + $0x90] ss:$12 sps:$4 sm:$0xff]   ;;  %v404_v18 = vld [vmem:[%s593_s3 + $0x98] ss:$12 sps:$4 sm:$0xff]  }
   0x4   :  { %375 = vmatpush3.bf16.msra.mxu1 %v400_v6  ;;  %247 = vmatprep.subr.bf16.mxu0 %v401_v16  ;;  %v405_v19 = vld [vmem:[%s593_s3 + $0x7c] ss:$12 sps:$4 sm:$0xff]   ;;  %v407_v20 = vld [vmem:[%s593_s3 + $0x78] ss:$12 sps:$4 sm:$0xff]   ;;  %v408_v21 = vld [vmem:[%s593_s3 + $0x80] ss:$12 sps:$4 sm:$0xff]  }
   0x5   :  { %376 = vmatprep.subr.bf16.mxu1 %v433_v4  ;;  %v409_v22 = vld [vmem:[%s593_s3 + $0x64] ss:$12 sps:$4 sm:$0xff]   ;;  %v411_v23 = vld [vmem:[%s593_s3 + $0x60] ss:$12 sps:$4 sm:$0xff]   ;;  %v412_v24 = vld [vmem:[%s593_s3 + $0x68] ss:$12 sps:$4 sm:$0xff]  }
   0x6   :  { %v413_v25 = vld [vmem:[%s593_s3 + $0x4c] ss:$12 sps:$4 sm:$0xff]   ;;  %v415_v26 = vld [vmem:[%s593_s3 + $0x48] ss:$12 sps:$4 sm:$0xff]   ;;  %v416_v27 = vld [vmem:[%s593_s3 + $0x50] ss:$12 sps:$4 sm:$0xff]  }
   0x7   :  { %23 = vadd.xlane.f32.xlu0 %v21_v2  ;;  %248 = vmatpush1.bf16.msra.mxu0 %v403_v17  ;;  %v417_v28 = vld [vmem:[%s593_s3 + $0x34] ss:$12 sps:$4 sm:$0xff]   ;;  %v419_v30 = vld [vmem:[%s593_s3 + $0x30] ss:$12 sps:$4 sm:$0xff]   ;;  %v420_v31 = vld [vmem:[%s593_s3 + $0x38] ss:$12 sps:$4 sm:$0xff]  }
   0x8   :  { %377 = vmatpush3.bf16.msra.mxu1 %v404_v18  ;;  %249 = vmatprep.subr.bf16.mxu0 %v405_v19  ;;  %v421_v32 = vld [vmem:[%s593_s3 + $0x1c] ss:$12 sps:$4 sm:$0xff]   ;;  %v423_v33 = vld [vmem:[%s593_s3 + $0x18] ss:$12 sps:$4 sm:$0xff]   ;;  %v424_v34 = vld [vmem:[%s593_s3 + $0x20] ss:$12 sps:$4 sm:$0xff]  }
   0x9   :  { %378 = vmatprep.subr.bf16.mxu1 %v433_v4  ;;  %v425_v35 = vld [vmem:[%s593_s3 + $0x4] ss:$12 sps:$4 sm:$0xff]   ;;  %v427_v36 = vld [vmem:[%s593_s3] ss:$12 sps:$4 sm:$0xff]   ;;  %v428_v37 = vld [vmem:[%s593_s3 + $0x8] ss:$12 sps:$4 sm:$0xff]  }
   0xa   :  { %v339_v46 = vld [vmem:[%s594_s1] ss:$0 sm:$0xff]  ;;  %v103_v56 = vshrl.u32 %v102_v55, 7 }
   0xb   :  { %250 = vmatpush1.bf16.msra.mxu0 %v407_v20  ;;  %v340_v50 = vld [vmem:[%s595_s2] ss:$0 sm:$0xff] }
   0xc   :  { %379 = vmatpush3.bf16.msra.mxu1 %v408_v21  ;;  %251 = vmatprep.subr.bf16.mxu0 %v409_v22  ;;  %v104_v57 = vsub.s32 0, %v103_v56  ;;  %v112_v58 = vsub.s32 2, %v103_v56  ;;  %v100_v59 = vld [vmem:[%s596_s4] sm:$0x7]  ;;  %v108_v60 = vsub.s32 1, %v103_v56 }
   0xd   :  { %380 = vmatprep.subr.bf16.mxu1 %v433_v4 }
   0xe   :  { %v105_v61 = vrot.slane %v100_v59, %v104_v57  ;;  %v113_v62 = vrot.slane %v100_v59, %v112_v58  ;;  %v109_v63 = vrot.slane %v100_v59, %v108_v60 }
   0xf   :  { %252 = vmatpush1.bf16.msra.mxu0 %v411_v23 }
  0x10   :  { %381 = vmatpush3.bf16.msra.mxu1 %v412_v24  ;;  %253 = vmatprep.subr.bf16.mxu0 %v413_v25 }
  0x11   :  { %382 = vmatprep.subr.bf16.mxu1 %v433_v4 }
  0x13   :  { %254 = vmatpush1.bf16.msra.mxu0 %v415_v26 }
  0x14   :  { %383 = vmatpush3.bf16.msra.mxu1 %v416_v27  ;;  %255 = vmatprep.subr.bf16.mxu0 %v417_v28 }
  0x15   :  { %384 = vmatprep.subr.bf16.mxu1 %v433_v4 }
  0x17   :  { %256 = vmatpush1.bf16.msra.mxu0 %v419_v30 }
  0x18   :  { %385 = vmatpush3.bf16.msra.mxu1 %v420_v31  ;;  %257 = vmatprep.subr.bf16.mxu0 %v421_v32 }
  0x19   :  { %386 = vmatprep.subr.bf16.mxu1 %v433_v4 }
  0x1b   :  { %258 = vmatpush1.bf16.msra.mxu0 %v423_v33 }
  0x1c   :  { %387 = vmatpush3.bf16.msra.mxu1 %v424_v34  ;;  %259 = vmatprep.subr.bf16.mxu0 %v425_v35 }
  0x1d   :  { %388 = vmatprep.subr.bf16.mxu1 %v433_v4 }
  0x1f   :  { %260 = vmatpush1.bf16.msra.mxu0 %v427_v36 }
  0x20   :  { %389 = vmatpush3.bf16.msra.mxu1 %v428_v37 }
  0x8c   :  { %v28_v7 = vpop.xlane.xlu0 %27 }
  0x8d   :  { %v31_v8 = vmul.f32 0.0078125, %v28_v7 }
  0x8f   :  { %v484_v11 = vsub.f32 %v22_v0, %v31_v8 }
  0x90   :  { %v24_v9 = vpop.xlane.xlu0 %23 }
  0x91   :  { %v30_v10 = vmul.f32 0.0078125, %v24_v9  ;;  %v35_v14 = vmul.f32 %v484_v11, %v484_v11 }
  0x93   :  { %v486_v12 = vsub.f32 %v21_v2, %v30_v10  ;;  %v38_v15 = vsel %vm25_vm0, %v35_v14, 0.0 }
  0x95   :  { %v34_v13 = vmul.f32 %v486_v12, %v486_v12 }
  0x97   :  { %36 = vadd.xlane.f32.xlu1 %v34_v13 }
  0x9b   :  { %39 = vadd.xlane.f32.xlu1 %v38_v15 }
 0x120   :  { %v37_v38 = vpop.xlane.xlu1 %36 }
 0x121   :  { %v41_v39 = vmul.f32 0.0078125, %v37_v38 }
 0x123   :  { %v43_v40 = vadd.f32 1e-05, %v41_v39 }
 0x124   :  { %v40_v41 = vpop.xlane.xlu1 %39 }
 0x125   :  { %429 = vrsqrt.f32 %v43_v40  ;;  %v42_v42 = vmul.f32 0.0078125, %v40_v41 }
 0x127   :  { %v44_v43 = vadd.f32 1e-05, %v42_v42 }
 0x129   :  { %431 = vrsqrt.f32 %v44_v43 }
 0x132   :  { %v430_v44 = vpop.eup %429 }
 0x133   :  { %v47_v45 = vmul.f32 %v430_v44, %v486_v12 }
 0x135   :  { %v56_v49 = vmul.f32 %v339_v46, %v47_v45 }
 0x136   :  { %v432_v47 = vpop.eup %431 }
 0x137   :  { %v48_v48 = vmul.f32 %v432_v47, %v484_v11  ;;  %v65_v52 = vadd.f32 %v340_v50, %v56_v49 }
 0x139   :  { %v57_v51 = vmul.f32 %v339_v46, %v48_v48 }
 0x13b   :  { %v66_v53 = vadd.f32 %v340_v50, %v57_v51 }
 0x13d   :  { %v67_v54 = vpack.c.bf16 %v66_v53, %v65_v52 }
 0x13f   :  { %278 = vmatmul.mubr.bf16.vlgmr.msra.gmra.mxu0 %v67_v54  ;;  %391 = vmatmul.mubr.bf16.vlgmr.msra.gmra.mxu1 %v67_v54 }
 0x1ff   :  { %v279_v0 = vpop.f32.mrf.mxu0  ;;  %v322_v1 = vpop.f32.mrf.mxu1 }
 0x200   :  { %v280_v2 = vadd.f32 %v279_v0, %v105_v61  ;;  %v323_v3 = vadd.f32 %v322_v1, %v113_v62 }
 0x201   :  { %v281_v4 = vpop.f32.mrf.mxu0  ;;  %v392_v5 = vpop.f32.mrf.mxu1 }
 0x202   :  { %329 = vst [vmem:[%s597_s5] sm:$0xff] %v280_v2  ;;  %331 = vst [vmem:[%s597_s5 + $0x10] sm:$0xff] %v323_v3  ;;  %v282_v6 = vadd.f32 %v281_v4, %v109_v63 }
 0x203   :  { %v283_v7 = vpop.f32.mrf.mxu0  ;;  %v325_v8 = vpop.f32.mrf.mxu1 }
 0x204   :  { %330 = vst [vmem:[%s597_s5 + $0x8] sm:$0xff] %v282_v6  ;;  %v284_v9 = vadd.f32 %v283_v7, %v105_v61  ;;  %v326_v10 = vadd.f32 %v325_v8, %v113_v62 }
 0x205   :  { %v285_v11 = vpop.f32.mrf.mxu0  ;;  %v393_v12 = vpop.f32.mrf.mxu1 }
 0x206   :  { %332 = vst [vmem:[%s597_s5 + $0x18] sm:$0x3] %v284_v9  ;;  %334 = vst [vmem:[%s597_s5 + $0x28] sm:$0x3] %v326_v10  ;;  %v286_v13 = vadd.f32 %v285_v11, %v109_v63 }
 0x208   :  { %333 = vst [vmem:[%s597_s5 + $0x20] sm:$0x3] %v286_v13 }

// kernel: _lambda_.165
= control target key start
LH: loop header
LB: loop body
LE: loop exit
PB: predicated region body
PF: predicated region fallthrough
CT: control target
= control target key end

     0   :  { %v184_v0 = vmov 0.0   ;;  %vm185_vm0 = vmmov 0   ;;  %s245_s1 = inlined_call_operand.vmem [shape: bf16[128,128], index: 1, kind: input, shape index: {}]   ;;  %s246_s0 = inlined_call_operand.vmem [shape: f32[10,128], index: 0, kind: input, shape index: {}]   ;;  %s247_s2 = inlined_call_operand.vmem [shape: f32[1,128], index: 2, kind: input, shape index: {}]   ;;  %s248_s3 = inlined_call_operand.vmem [shape: f32[10,128], index: 3, kind: output, shape index: {}]  }
   0x1   :  { %154 = vmatprep.subr.bf16.mxu0 %v184_v0  ;;  %v176_v1 = vld [vmem:[%s245_s1 + $0x38] sm:$0xff]   ;;  %170 = vmatprep.mubr.msk.bf16.mxu0 %vm185_vm0, %v184_v0  ;;  %v177_v2 = vld [vmem:[%s245_s1 + $0x30] sm:$0xff]   ;;  %v178_v3 = vld [vmem:[%s245_s1 + $0x28] sm:$0xff]  }
   0x2   :  { %155 = vmatpush3.bf16.msra.mxu0 %v176_v1  ;;  %v179_v4 = vld [vmem:[%s245_s1 + $0x20] sm:$0xff]   ;;  %v180_v5 = vld [vmem:[%s245_s1 + $0x18] sm:$0xff]   ;;  %v181_v6 = vld [vmem:[%s245_s1 + $0x10] sm:$0xff]  }
   0x3   :  { %156 = vmatprep.subr.bf16.mxu0 %v184_v0  ;;  %v182_v7 = vld [vmem:[%s245_s1 + $0x8] sm:$0xff]   ;;  %v183_v8 = vld [vmem:[%s245_s1] sm:$0xff]  }
   0x4   :  { %v15_v9 = vld [vmem:[%s246_s0] sm:$0xff]  ;;  %v16_v10 = vld [vmem:[%s246_s0 + $0x8] sm:$0x3] }
   0x5   :  { %v17_v11 = vpack.c.bf16 %v16_v10, %v15_v9  ;;  %v136_v12 = vld [vmem:[%s247_s2] ss:$0 sm:$0xff] }
   0x6   :  { %157 = vmatpush3.bf16.msra.mxu0 %v177_v2 }
   0x7   :  { %158 = vmatprep.subr.bf16.mxu0 %v184_v0 }
   0xa   :  { %159 = vmatpush3.bf16.msra.mxu0 %v178_v3 }
   0xb   :  { %160 = vmatprep.subr.bf16.mxu0 %v184_v0 }
   0xe   :  { %161 = vmatpush3.bf16.msra.mxu0 %v179_v4 }
   0xf   :  { %162 = vmatprep.subr.bf16.mxu0 %v184_v0 }
  0x12   :  { %163 = vmatpush3.bf16.msra.mxu0 %v180_v5 }
  0x13   :  { %164 = vmatprep.subr.bf16.mxu0 %v184_v0 }
  0x16   :  { %165 = vmatpush3.bf16.msra.mxu0 %v181_v6 }
  0x17   :  { %166 = vmatprep.subr.bf16.mxu0 %v184_v0 }
  0x1a   :  { %167 = vmatpush3.bf16.msra.mxu0 %v182_v7 }
  0x1b   :  { %168 = vmatprep.subr.bf16.mxu0 %v184_v0 }
  0x1e   :  { %169 = vmatpush3.bf16.msra.mxu0 %v183_v8 }
  0x21   :  { %171 = vmatmul.mubr.bf16.vlgmr.msra.gmra.mxu0 %v17_v11 }
  0xe1   :  { %v123_v13 = vpop.f32.mrf.mxu0 }
  0xe2   :  { %v124_v14 = vadd.f32 %v136_v12, %v123_v13 }
  0xe3   :  { %v172_v15 = vpop.f32.mrf.mxu0 }
  0xe4   :  { %130 = vst [vmem:[%s248_s3] sm:$0xff] %v124_v14 }
  0xe5   :  { %v126_v16 = vpop.f32.mrf.mxu0 }
  0xe6   :  { %v127_v17 = vadd.f32 %v136_v12, %v126_v16 }
  0xe7   :  { %v173_v18 = vpop.f32.mrf.mxu0 }
  0xe8   :  { %131 = vst [vmem:[%s248_s3 + $0x8] sm:$0x3] %v127_v17 }

// kernel: _lambda_.164
= control target key start
LH: loop header
LB: loop body
LE: loop exit
PB: predicated region body
PF: predicated region fallthrough
CT: control target
= control target key end

     0   :  { %s1432_s12 = smov 0   ;;  %s1629_s0 = inlined_call_operand.vmem [shape: f32[2,8,5,16], index: 0, kind: input, shape index: {}]   ;;  %s1630_s1 = inlined_call_operand.vmem [shape: f32[2,8,5,16], index: 1, kind: input, shape index: {}]   ;;  %s1631_s2 = inlined_call_operand.vmem [shape: f32[2,8,5,16], index: 2, kind: input, shape index: {}]   ;;  %s1632_s3 = inlined_call_operand.vmem [shape: f32[2,8,5,16], index: 3, kind: output, shape index: {}]  }
   0x1 LB: > { %s1195_s13 = sadd.s32 4294967295, %s1407_s12   ;;  %p1199_p0 = scmp.ge.s32.totalorder %s1407_s12, 1  ;;  %s1407_s12 = sphi %s1432_s12, %s13_s12  }
   0x2   : > { %p157_p1 = scmp.lt.s32.totalorder %s1407_s12, 3 }
   0x4   : > { %p158_p2 = pnand %p1199_p0, %p157_p1 }
   0x5   : > { %p191_p3 = scmp.lt.s32.totalorder (!%p158_p2), %s1195_s13, 1 }
   0x6   : > { %161 = sbr.rel (%p158_p2) target bundleno = 761 (0x2f9), region = 32 }
   0xb   : > { %v1409_v0 = vmov 0.0   ;;  %s1634_s13 = smov (!%p191_p3, %s1195_s13), 1  ;;  %vm1410_vm0 = vmmov 0   ;;  %vm260_vm1 = vcmask 130048   ;;  %vm637_vm2 = vcmask 36864  }
   0xc   : > { %1262 = vmatprep.subr.bf16.mxu0 %v1409_v0  ;;  %1268 = vmatprep.subr.bf16.mxu1 %v1409_v0  ;;  %s1446_s14 = sshll.u32 %s1634_s13, 6  ;;  %vm738_vm3 = vcmask 1041408   ;;  %vm739_vm4 = vcmask 1042432   ;;  %vm734_vm5 = vcmask 39936   ;;  %vm1107_vm6 = vcmask 126976  }
   0xd   : > { %1264 = vmatprep.mubr.msk.bf16.mxu0 %vm1410_vm0, %v1409_v0  ;;  %1270 = vmatprep.mubr.msk.bf16.mxu1 %vm1410_vm0, %v1409_v0  ;;  %s1452_s17 = scalar_lea.vmem %s1630_s1, %s1446_s14  ;;  %s1460_s20 = scalar_lea.vmem %s1629_s0, %s1446_s14 }
   0xe   : > { %v228_v1 = vld [vmem:[%s1452_s17] sm:$0x1f]  ;;  %v229_v2 = vld [vmem:[%s1452_s17 + $0x8] sm:$0x1f]  ;;  %v230_v5 = vld [vmem:[%s1452_s17 + $0x10] sm:$0x1f]  ;;  %s1552_s23 = scalar_lea.vmem %s1631_s2, %s1446_s14  ;;  %s1608_s26 = scalar_lea.vmem %s1632_s3, %s1446_s14 }
   0xf   : > { %v236_v3 = vpack.c.bf16 %v228_v1, %v228_v1  ;;  %v237_v4 = vpack.c.bf16 %v229_v2, %v229_v2  ;;  %v231_v6 = vld [vmem:[%s1452_s17 + $0x18] sm:$0x1f]  ;;  %v212_v9 = vld [vmem:[%s1460_s20] sm:$0x1f]  ;;  %v213_v10 = vld [vmem:[%s1460_s20 + $0x8] sm:$0x1f]  ;;  %v238_v11 = vpack.c.bf16 %v230_v5, %v230_v5 }
  0x10   : > { %v239_v12 = vpack.c.bf16 %v231_v6, %v231_v6  ;;  %v220_v13 = vpack.c.bf16 %v212_v9, %v212_v9  ;;  %v221_v14 = vpack.c.bf16 %v213_v10, %v213_v10  ;;  %v232_v17 = vld [vmem:[%s1452_s17 + $0x20] sm:$0x1f]  ;;  %v233_v18 = vld [vmem:[%s1452_s17 + $0x28] sm:$0x1f]  ;;  %v214_v19 = vld [vmem:[%s1460_s20 + $0x10] sm:$0x1f] }
  0x11   : > { %v265_v7 = vsel %vm260_vm1, %v236_v3, 0  ;;  %v311_v8 = vsel %vm260_vm1, %v237_v4, 0  ;;  %v357_v15 = vsel %vm260_vm1, %v238_v11, 0  ;;  %v215_v20 = vld [vmem:[%s1460_s20 + $0x18] sm:$0x1f]  ;;  %v240_v21 = vpack.c.bf16 %v232_v17, %v232_v17 }
  0x12   : > { %1263 = vmatpush3.bf16.xpose.msra.mxu0 %v265_v7  ;;  %1269 = vmatpush3.bf16.xpose.msra.mxu1 %v311_v8  ;;  %v403_v16 = vsel %vm260_vm1, %v239_v12, 0  ;;  %v241_v22 = vpack.c.bf16 %v233_v18, %v233_v18  ;;  %v222_v23 = vpack.c.bf16 %v214_v19, %v214_v19  ;;  %v223_v24 = vpack.c.bf16 %v215_v20, %v215_v20  ;;  %v234_v27 = vld [vmem:[%s1452_s17 + $0x30] sm:$0x1f]  ;;  %v235_v28 = vld [vmem:[%s1452_s17 + $0x38] sm:$0x1f] }
  0x13   : > { %1274 = vmatprep.subr.bf16.mxu0 %v1409_v0  ;;  %1280 = vmatprep.subr.bf16.mxu1 %v1409_v0  ;;  %v449_v25 = vsel %vm260_vm1, %v240_v21, 0  ;;  %v216_v29 = vld [vmem:[%s1460_s20 + $0x20] sm:$0x1f]  ;;  %v217_v30 = vld [vmem:[%s1460_s20 + $0x28] sm:$0x1f]  ;;  %v242_v31 = vpack.c.bf16 %v234_v27, %v234_v27  ;;  %v243_v32 = vpack.c.bf16 %v235_v28, %v235_v28 }
  0x14   : > { %v495_v26 = vsel %vm260_vm1, %v241_v22, 0  ;;  %v224_v33 = vpack.c.bf16 %v216_v29, %v216_v29  ;;  %v225_v34 = vpack.c.bf16 %v217_v30, %v217_v30  ;;  %v218_v37 = vld [vmem:[%s1460_s20 + $0x30] sm:$0x1f]  ;;  %v219_v38 = vld [vmem:[%s1460_s20 + $0x38] sm:$0x1f] }
  0x15   : > { %v541_v35 = vsel %vm260_vm1, %v242_v31, 0  ;;  %v587_v36 = vsel %vm260_vm1, %v243_v32, 0  ;;  %v226_v39 = vpack.c.bf16 %v218_v37, %v218_v37  ;;  %v227_v40 = vpack.c.bf16 %v219_v38, %v219_v38 }
  0x19   : > { %1265 = vmatmul.mubr.msk.bf16.vlgmr.msra.gmra.mxu0 %vm260_vm1, %v220_v13  ;;  %1271 = vmatmul.mubr.msk.bf16.vlgmr.msra.gmra.mxu1 %vm260_vm1, %v221_v14 }
  0x1a   : > { %1275 = vmatpush3.bf16.xpose.msra.mxu0 %v357_v15  ;;  %1281 = vmatpush3.bf16.xpose.msra.mxu1 %v403_v16 }
  0x1b   : > { %1276 = vmatprep.mubr.msk.bf16.mxu0 %vm1410_vm0, %v1409_v0  ;;  %1282 = vmatprep.mubr.msk.bf16.mxu1 %vm1410_vm0, %v1409_v0 }
  0x1c   : > { %1286 = vmatprep.subr.bf16.mxu0 %v1409_v0  ;;  %1292 = vmatprep.subr.bf16.mxu1 %v1409_v0 }
  0x21   : > { %1277 = vmatmul.mubr.msk.bf16.vlgmr.msra.gmra.mxu0 %vm260_vm1, %v222_v23  ;;  %1283 = vmatmul.mubr.msk.bf16.vlgmr.msra.gmra.mxu1 %vm260_vm1, %v223_v24 }
  0x22   : > { %1287 = vmatpush3.bf16.xpose.msra.mxu0 %v449_v25  ;;  %1293 = vmatpush3.bf16.xpose.msra.mxu1 %v495_v26 }
  0x23   : > { %1288 = vmatprep.mubr.msk.bf16.mxu0 %vm1410_vm0, %v1409_v0  ;;  %1294 = vmatprep.mubr.msk.bf16.mxu1 %vm1410_vm0, %v1409_v0 }
  0x24   : > { %1298 = vmatprep.subr.bf16.mxu0 %v1409_v0  ;;  %1304 = vmatprep.subr.bf16.mxu1 %v1409_v0 }
  0x29   : > { %1289 = vmatmul.mubr.msk.bf16.vlgmr.msra.gmra.mxu0 %vm260_vm1, %v224_v33  ;;  %1295 = vmatmul.mubr.msk.bf16.vlgmr.msra.gmra.mxu1 %vm260_vm1, %v225_v34 }
  0x2a   : > { %1299 = vmatpush3.bf16.xpose.msra.mxu0 %v541_v35  ;;  %1305 = vmatpush3.bf16.xpose.msra.mxu1 %v587_v36 }
  0x2b   : > { %1300 = vmatprep.mubr.msk.bf16.mxu0 %vm1410_vm0, %v1409_v0  ;;  %1306 = vmatprep.mubr.msk.bf16.mxu1 %vm1410_vm0, %v1409_v0 }
  0x2c   : > { %1310 = vmatprep.subr.bf16.mxu0 %v1409_v0  ;;  %1316 = vmatprep.subr.bf16.mxu1 %v1409_v0 }
  0x31   : > { %1301 = vmatmul.mubr.msk.bf16.vlgmr.msra.gmra.mxu0 %vm260_vm1, %v226_v39  ;;  %1307 = vmatmul.mubr.msk.bf16.vlgmr.msra.gmra.mxu1 %vm260_vm1, %v227_v40 }
  0x32   : > { %1312 = vmatprep.mubr.msk.bf16.mxu0 %vm1410_vm0, %v1409_v0  ;;  %1318 = vmatprep.mubr.msk.bf16.mxu1 %vm1410_vm0, %v1409_v0 }
  0xd9   : > { %v301_v41 = vpop.f32.mrf.mxu0  ;;  %v347_v42 = vpop.f32.mrf.mxu1 }
  0xda   : > { %v629_v43 = vmul.f32 0.25, %v301_v41  ;;  %v630_v44 = vmul.f32 0.25, %v347_v42 }
  0xdb   : > { %v1266_v45 = vpop.f32.mrf.mxu0  ;;  %v1272_v46 = vpop.f32.mrf.mxu1 }
  0xdc   : > { %v638_v47 = vsel %vm637_vm2, %v629_v43, -inf  ;;  %v641_v50 = vsel %vm637_vm2, %v630_v44, -inf }
  0xdd   : > { %v350_v48 = vpop.f32.mrf.mxu1  ;;  %639 = vmax.xlane.f32.xlu0 %v638_v47  ;;  %v304_v49 = vpop.f32.mrf.mxu0 }
  0xdf   : > { %v1267_v51 = vpop.f32.mrf.mxu0  ;;  %v1273_v52 = vpop.f32.mrf.mxu1 }
  0xe1   : > { %v439_v53 = vpop.f32.mrf.mxu1  ;;  %642 = vmax.xlane.f32.xlu0 %v641_v50  ;;  %v393_v54 = vpop.f32.mrf.mxu0 }
  0xe2   : > { %v632_v55 = vmul.f32 0.25, %v439_v53  ;;  %v631_v56 = vmul.f32 0.25, %v393_v54 }
  0xe3   : > { %v1278_v57 = vpop.f32.mrf.mxu0  ;;  %v1284_v58 = vpop.f32.mrf.mxu1 }
  0xe4   : > { %v644_v59 = vsel %vm637_vm2, %v631_v56, -inf  ;;  %v647_v62 = vsel %vm637_vm2, %v632_v55, -inf }
  0xe5   : > { %v442_v60 = vpop.f32.mrf.mxu1  ;;  %645 = vmax.xlane.f32.xlu1 %v644_v59  ;;  %v396_v61 = vpop.f32.mrf.mxu0 }
  0xe7   : > { %v1279_v63 = vpop.f32.mrf.mxu0  ;;  %v1285_v1 = vpop.f32.mrf.mxu1 }
  0xe9   : > { %v531_v2 = vpop.f32.mrf.mxu1  ;;  %648 = vmax.xlane.f32.xlu1 %v647_v62  ;;  %v485_v3 = vpop.f32.mrf.mxu0  ;;  %v244_v62 = vld [vmem:[%s1552_s23] sm:$0x1f] }
  0xea   : > { %v634_v4 = vmul.f32 0.25, %v531_v2  ;;  %v633_v5 = vmul.f32 0.25, %v485_v3  ;;  %v252_v1 = vpack.c.bf16 %v244_v62, %v244_v62  ;;  %v1411_v2 = vmov 65535  }
  0xeb   : > { %v1290_v6 = vpop.f32.mrf.mxu0  ;;  %v1296_v7 = vpop.f32.mrf.mxu1  ;;  %v740_v3 = vsel %vm738_vm3, 4294967295, %v1411_v2 }
  0xec   : > { %v653_v8 = vsel %vm637_vm2, %v634_v4, -inf  ;;  %v650_v9 = vsel %vm637_vm2, %v633_v5, -inf  ;;  %v741_v7 = vsel %vm739_vm4, %v740_v3, 0 }
  0xed   : > { %v534_v10 = vpop.f32.mrf.mxu1  ;;  %654 = vmax.xlane.f32.xlu1 %v653_v8  ;;  %651 = vmax.xlane.f32.xlu0 %v650_v9  ;;  %v488_v11 = vpop.f32.mrf.mxu0 }
  0xee   : > { %v743_v10 = vand.u32 %v741_v7, %v252_v1 }
  0xef   : > { %v1291_v12 = vpop.f32.mrf.mxu0  ;;  %v1297_v13 = vpop.f32.mrf.mxu1 }
  0xf0   : > { %1311 = vmatpush3.bf16.msra.mxu0 %v743_v10  ;;  %v246_v12 = vld [vmem:[%s1552_s23 + $0x10] sm:$0x1f] }
  0xf1   : > { %v577_v14 = vpop.f32.mrf.mxu0  ;;  %v623_v15 = vpop.f32.mrf.mxu1  ;;  %1322 = vmatprep.subr.bf16.mxu0 %v1409_v0  ;;  %v254_v13 = vpack.c.bf16 %v246_v12, %v246_v12 }
  0xf2   : > { %v635_v16 = vmul.f32 0.25, %v577_v14  ;;  %v636_v17 = vmul.f32 0.25, %v623_v15  ;;  %v247_v14 = vld [vmem:[%s1552_s23 + $0x18] sm:$0x1f] }
  0xf3   : > { %v1302_v18 = vpop.f32.mrf.mxu0  ;;  %v1308_v19 = vpop.f32.mrf.mxu1  ;;  %v835_v15 = vand.u32 %v741_v7, %v254_v13 }
  0xf4   : > { %v659_v20 = vsel %vm637_vm2, %v636_v17, -inf  ;;  %v656_v21 = vsel %vm637_vm2, %v635_v16, -inf  ;;  %v248_v18 = vld [vmem:[%s1552_s23 + $0x20] sm:$0x1f] }
  0xf5   : > { %v626_v22 = vpop.f32.mrf.mxu1  ;;  %660 = vmax.xlane.f32.xlu1 %v659_v20  ;;  %657 = vmax.xlane.f32.xlu0 %v656_v21  ;;  %v580_v23 = vpop.f32.mrf.mxu0  ;;  %v256_v19 = vpack.c.bf16 %v248_v18, %v248_v18  ;;  %v249_v21 = vld [vmem:[%s1552_s23 + $0x28] sm:$0x1f] }
  0xf6   : > { %v257_v22 = vpack.c.bf16 %v249_v21, %v249_v21 }
  0xf7   : > { %v1303_v24 = vpop.f32.mrf.mxu0  ;;  %v1309_v25 = vpop.f32.mrf.mxu1  ;;  %v927_v20 = vand.u32 %v741_v7, %v256_v19 }
  0xf8   : > { %v973_v23 = vand.u32 %v741_v7, %v257_v22  ;;  %v250_v24 = vld [vmem:[%s1552_s23 + $0x30] sm:$0x1f] }
  0xf9   : > { %v258_v25 = vpack.c.bf16 %v250_v24, %v250_v24 }
 0x166   : > { %v640_v26 = vpop.xlane.xlu0 %639 }
 0x167   : > { %v662_v27 = vsub.f32 %v629_v43, %v640_v26  ;;  %v1019_v26 = vand.u32 %v741_v7, %v258_v25 }
 0x169   : > { %v670_v28 = vmul.f32 1.442695, %v662_v27  ;;  %v251_v27 = vld [vmem:[%s1552_s23 + $0x38] sm:$0x1f] }
 0x16a   : > { %v643_v29 = vpop.xlane.xlu0 %642 }
 0x16b   : > { %1369 = vpow2.f32 %v670_v28  ;;  %v663_v30 = vsub.f32 %v630_v44, %v643_v29  ;;  %v259_v28 = vpack.c.bf16 %v251_v27, %v251_v27 }
 0x16d   : > { %v672_v31 = vmul.f32 1.442695, %v663_v30  ;;  %v1065_v29 = vand.u32 %v741_v7, %v259_v28 }
 0x16e   : > { %v646_v32 = vpop.xlane.xlu1 %645 }
 0x16f   : > { %1371 = vpow2.f32 %v672_v31  ;;  %v664_v33 = vsub.f32 %v631_v56, %v646_v32 }
 0x171   : > { %v674_v34 = vmul.f32 1.442695, %v664_v33 }
 0x172   : > { %v649_v35 = vpop.xlane.xlu1 %648 }
 0x173   : > { %1373 = vpow2.f32 %v674_v34  ;;  %v665_v36 = vsub.f32 %v632_v55, %v649_v35 }
 0x175   : > { %v676_v37 = vmul.f32 1.442695, %v665_v36 }
 0x176   : > { %v655_v38 = vpop.xlane.xlu1 %654  ;;  %v652_v39 = vpop.xlane.xlu0 %651 }
 0x177   : > { %1375 = vpow2.f32 %v676_v37  ;;  %v667_v40 = vsub.f32 %v634_v4, %v655_v38  ;;  %v666_v41 = vsub.f32 %v633_v5, %v652_v39  ;;  %v245_v4 = vld [vmem:[%s1552_s23 + $0x8] sm:$0x1f] }
 0x178   : > { %v1524_v42 = vpop.eup %1369  ;;  %v253_v8 = vpack.c.bf16 %v245_v4, %v245_v4 }
 0x179   : > { %v680_v43 = vmul.f32 1.442695, %v667_v40  ;;  %v678_v45 = vmul.f32 1.442695, %v666_v41  ;;  %v686_v44 = vsel %vm637_vm2, %v1524_v42, 0.0 }
 0x17a   : > { %687 = vadd.xlane.f32.xlu0 %v686_v44  ;;  %v789_v11 = vand.u32 %v741_v7, %v253_v8 }
 0x17b   : > { %1377 = vpow2.f32 %v680_v43 }
 0x17c   : > { %v1528_v46 = vpop.eup %1371  ;;  %1379 = vpow2.f32 %v678_v45  ;;  %1317 = vmatpush3.bf16.msra.mxu1 %v789_v11 }
 0x17d   : > { %v689_v47 = vsel %vm637_vm2, %v1528_v46, 0.0  ;;  %1328 = vmatprep.subr.bf16.mxu1 %v1409_v0 }
 0x17e   : > { %690 = vadd.xlane.f32.xlu1 %v689_v47  ;;  %v661_v48 = vpop.xlane.xlu1 %660  ;;  %v658_v49 = vpop.xlane.xlu0 %657 }
 0x17f   : > { %v669_v50 = vsub.f32 %v636_v17, %v661_v48  ;;  %v668_v51 = vsub.f32 %v635_v16, %v658_v49  ;;  %v255_v16 = vpack.c.bf16 %v247_v14, %v247_v14 }
 0x180   : > { %v1532_v52 = vpop.eup %1373 }
 0x181   : > { %v684_v53 = vmul.f32 1.442695, %v669_v50  ;;  %v682_v54 = vmul.f32 1.442695, %v668_v51  ;;  %v692_v55 = vsel %vm637_vm2, %v1532_v52, 0.0  ;;  %v881_v17 = vand.u32 %v741_v7, %v255_v16 }
 0x182   : > { %693 = vadd.xlane.f32.xlu0 %v692_v55 }
 0x183   : > { %1381 = vpow2.f32 %v684_v53 }
 0x184   : > { %v1536_v56 = vpop.eup %1375  ;;  %1383 = vpow2.f32 %v682_v54 }
 0x185   : > { %v695_v57 = vsel %vm637_vm2, %v1536_v56, 0.0 }
 0x186   : > { %696 = vadd.xlane.f32.xlu1 %v695_v57 }
 0x188   : > { %v1540_v58 = vpop.eup %1377 }
 0x189   : > { %v1542_v59 = vpop.eup %1379  ;;  %v701_v60 = vsel %vm637_vm2, %v1540_v58, 0.0 }
 0x18a   : > { %702 = vadd.xlane.f32.xlu1 %v701_v60  ;;  %v698_v61 = vsel %vm637_vm2, %v1542_v59, 0.0 }
 0x18b   : > { %699 = vadd.xlane.f32.xlu0 %v698_v61 }
 0x190   : > { %v1555_v63 = vpop.eup %1381 }
 0x191   : > { %v1558_v5 = vpop.eup %1383  ;;  %v707_v6 = vsel %vm637_vm2, %v1555_v63, 0.0 }
 0x192   : > { %708 = vadd.xlane.f32.xlu1 %v707_v6  ;;  %v704_v9 = vsel %vm637_vm2, %v1558_v5, 0.0 }
 0x193   : > { %705 = vadd.xlane.f32.xlu0 %v704_v9 }
 0x203   : > { %v688_v30 = vpop.xlane.xlu0 %687 }
 0x204   : > { %1385 = vrcp.f32 %v688_v30 }
 0x207   : > { %v691_v31 = vpop.xlane.xlu1 %690 }
 0x208   : > { %1387 = vrcp.f32 %v691_v31 }
 0x20b   : > { %v694_v32 = vpop.xlane.xlu0 %693 }
 0x20c   : > { %1389 = vrcp.f32 %v694_v32 }
 0x20f   : > { %v697_v33 = vpop.xlane.xlu1 %696 }
 0x210   : > { %1391 = vrcp.f32 %v697_v33 }
 0x211   : > { %v1386_v34 = vpop.eup %1385 }
 0x212   : > { %v718_v35 = vmul.f32 %v1386_v34, %v1524_v42 }
 0x213   : > { %v703_v36 = vpop.xlane.xlu1 %702 }
 0x214   : > { %1393 = vrcp.f32 %v703_v36  ;;  %v700_v37 = vpop.xlane.xlu0 %699  ;;  %v726_v38 = vpack.c.bf16 %v718_v35, %v718_v35 }
 0x215   : > { %v1388_v39 = vpop.eup %1387  ;;  %1395 = vrcp.f32 %v700_v37 }
 0x216   : > { %1313 = vmatmul.mubr.msk.bf16.vlgmr.msra.gmra.mxu0 %vm734_vm5, %v726_v38  ;;  %v719_v40 = vmul.f32 %v1388_v39, %v1528_v46 }
 0x217   : > { %1323 = vmatpush3.bf16.msra.mxu0 %v835_v15  ;;  %1324 = vmatprep.mubr.msk.bf16.mxu0 %vm1410_vm0, %v1409_v0 }
 0x218   : > { %v727_v41 = vpack.c.bf16 %v719_v40, %v719_v40  ;;  %1334 = vmatprep.subr.bf16.mxu0 %v1409_v0 }
 0x219   : > { %v1390_v43 = vpop.eup %1389 }
 0x21a   : > { %1319 = vmatmul.mubr.msk.bf16.vlgmr.msra.gmra.mxu1 %vm734_vm5, %v727_v41  ;;  %v720_v42 = vmul.f32 %v1390_v43, %v1532_v52 }
 0x21b   : > { %1329 = vmatpush3.bf16.msra.mxu1 %v881_v17  ;;  %v709_v45 = vpop.xlane.xlu1 %708  ;;  %1330 = vmatprep.mubr.msk.bf16.mxu1 %vm1410_vm0, %v1409_v0 }
 0x21c   : > { %1397 = vrcp.f32 %v709_v45  ;;  %v706_v44 = vpop.xlane.xlu0 %705  ;;  %v728_v46 = vpack.c.bf16 %v720_v42, %v720_v42  ;;  %1340 = vmatprep.subr.bf16.mxu1 %v1409_v0 }
 0x21d   : > { %v1392_v47 = vpop.eup %1391  ;;  %1399 = vrcp.f32 %v706_v44 }
 0x21e   : > { %1325 = vmatmul.mubr.msk.bf16.vlgmr.msra.gmra.mxu0 %vm734_vm5, %v728_v46  ;;  %v721_v48 = vmul.f32 %v1392_v47, %v1536_v56 }
 0x21f   : > { %1335 = vmatpush3.bf16.msra.mxu0 %v927_v20  ;;  %1336 = vmatprep.mubr.msk.bf16.mxu0 %vm1410_vm0, %v1409_v0 }
 0x220   : > { %v729_v49 = vpack.c.bf16 %v721_v48, %v721_v48  ;;  %1346 = vmatprep.subr.bf16.mxu0 %v1409_v0 }
 0x221   : > { %v1394_v50 = vpop.eup %1393 }
 0x222   : > { %v1396_v51 = vpop.eup %1395  ;;  %1331 = vmatmul.mubr.msk.bf16.vlgmr.msra.gmra.mxu1 %vm734_vm5, %v729_v49  ;;  %v723_v53 = vmul.f32 %v1394_v50, %v1540_v58 }
 0x223   : > { %1341 = vmatpush3.bf16.msra.mxu1 %v973_v23  ;;  %v722_v52 = vmul.f32 %v1396_v51, %v1542_v59  ;;  %1342 = vmatprep.mubr.msk.bf16.mxu1 %vm1410_vm0, %v1409_v0 }
 0x224   : > { %1352 = vmatprep.subr.bf16.mxu1 %v1409_v0  ;;  %v731_v55 = vpack.c.bf16 %v723_v53, %v723_v53 }
 0x225   : > { %v730_v54 = vpack.c.bf16 %v722_v52, %v722_v52 }
 0x227   : > { %1337 = vmatmul.mubr.msk.bf16.vlgmr.msra.gmra.mxu0 %vm734_vm5, %v730_v54 }
 0x228   : > { %1347 = vmatpush3.bf16.msra.mxu0 %v1019_v26  ;;  %1348 = vmatprep.mubr.msk.bf16.mxu0 %vm1410_vm0, %v1409_v0 }
 0x229   : > { %v1398_v56 = vpop.eup %1397 }
 0x22a   : > { %v1400_v57 = vpop.eup %1399  ;;  %1343 = vmatmul.mubr.msk.bf16.vlgmr.msra.gmra.mxu1 %vm734_vm5, %v731_v55  ;;  %v725_v58 = vmul.f32 %v1398_v56, %v1555_v63 }
 0x22b   : > { %1353 = vmatpush3.bf16.msra.mxu1 %v1065_v29  ;;  %v724_v59 = vmul.f32 %v1400_v57, %v1558_v5  ;;  %1354 = vmatprep.mubr.msk.bf16.mxu1 %vm1410_vm0, %v1409_v0 }
 0x22c   : > { %v733_v61 = vpack.c.bf16 %v725_v58, %v725_v58 }
 0x22d   : > { %v732_v60 = vpack.c.bf16 %v724_v59, %v724_v59 }
 0x22f   : > { %1349 = vmatmul.mubr.msk.bf16.vlgmr.msra.gmra.mxu0 %vm734_vm5, %v732_v60 }
 0x232   : > { %1355 = vmatmul.mubr.msk.bf16.vlgmr.msra.gmra.mxu1 %vm734_vm5, %v733_v61 }
 0x2d6   : > { %v779_v62 = vpop.f32.mrf.mxu0 }
 0x2d7   : > { %1108 = vst.msk [vmem:[%s1608_s26] sm:$0x1f] %vm1107_vm6, %v779_v62 }
 0x2d8   : > { %v1314_v0 = vpop.f32.mrf.mxu0 }
 0x2da   : > { %v782_v63 = vpop.f32.mrf.mxu0  ;;  %v825_v1 = vpop.f32.mrf.mxu1 }
 0x2db   : > { %1109 = vst.msk [vmem:[%s1608_s26 + $0x8] sm:$0x1f] %vm1107_vm6, %v825_v1 }
 0x2dc   : > { %v1315_v2 = vpop.f32.mrf.mxu0  ;;  %v1320_v3 = vpop.f32.mrf.mxu1 }
 0x2de   : > { %v828_v4 = vpop.f32.mrf.mxu1  ;;  %v871_v5 = vpop.f32.mrf.mxu0 }
 0x2df   : > { %1110 = vst.msk [vmem:[%s1608_s26 + $0x10] sm:$0x1f] %vm1107_vm6, %v871_v5 }
 0x2e0   : > { %v1321_v6 = vpop.f32.mrf.mxu1  ;;  %v1326_v7 = vpop.f32.mrf.mxu0 }
 0x2e2   : > { %v874_v8 = vpop.f32.mrf.mxu0  ;;  %v917_v9 = vpop.f32.mrf.mxu1 }
 0x2e3   : > { %1111 = vst.msk [vmem:[%s1608_s26 + $0x18] sm:$0x1f] %vm1107_vm6, %v917_v9 }
 0x2e4   : > { %v1327_v10 = vpop.f32.mrf.mxu0  ;;  %v1332_v11 = vpop.f32.mrf.mxu1 }
 0x2e6   : > { %v920_v12 = vpop.f32.mrf.mxu1 }
 0x2e7   : > { %v963_v13 = vpop.f32.mrf.mxu0 }
 0x2e8   : > { %1112 = vst.msk [vmem:[%s1608_s26 + $0x20] sm:$0x1f] %vm1107_vm6, %v963_v13  ;;  %v1333_v14 = vpop.f32.mrf.mxu1 }
 0x2e9   : > { %v1338_v15 = vpop.f32.mrf.mxu0 }
 0x2ea   : > { %v1009_v16 = vpop.f32.mrf.mxu1 }
 0x2eb   : > { %v966_v17 = vpop.f32.mrf.mxu0  ;;  %1113 = vst.msk [vmem:[%s1608_s26 + $0x28] sm:$0x1f] %vm1107_vm6, %v1009_v16 }
 0x2ec   : > { %v1344_v18 = vpop.f32.mrf.mxu1 }
 0x2ed   : > { %v1339_v19 = vpop.f32.mrf.mxu0 }
 0x2ee   : > { %v1012_v20 = vpop.f32.mrf.mxu1 }
 0x2ef   : > { %v1055_v21 = vpop.f32.mrf.mxu0 }
 0x2f0   : > { %1114 = vst.msk [vmem:[%s1608_s26 + $0x30] sm:$0x1f] %vm1107_vm6, %v1055_v21  ;;  %v1345_v22 = vpop.f32.mrf.mxu1 }
 0x2f1   : > { %v1350_v23 = vpop.f32.mrf.mxu0 }
 0x2f2   : > { %v1101_v24 = vpop.f32.mrf.mxu1 }
 0x2f3   : > { %v1058_v25 = vpop.f32.mrf.mxu0  ;;  %1115 = vst.msk [vmem:[%s1608_s26 + $0x38] sm:$0x1f] %vm1107_vm6, %v1101_v24 }
 0x2f4   : > { %v1356_v26 = vpop.f32.mrf.mxu1 }
 0x2f5   : > { %v1351_v27 = vpop.f32.mrf.mxu0 }
 0x2f6   : > { %v1104_v28 = vpop.f32.mrf.mxu1 }
 0x2f8   : > { %v1357_v29 = vpop.f32.mrf.mxu1 }
 0x2f9 PF: > { %s13_s12 = sadd.s32 1, %s1407_s12  }
 0x2fa   : > { %p10_p4 = scmp.ge.s32.totalorder %s13_s12, 4  }
 0x2fc   :  { %12 = sbr.rel (!%p10_p4) target bundleno = 1 (0x1), region = 68 }

// kernel: _lambda_.166
= control target key start
LH: loop header
LB: loop body
LE: loop exit
PB: predicated region body
PF: predicated region fallthrough
CT: control target
= control target key end

     0   :  { %vm25_vm0 = vcmask 1041408   ;;  %v278_v23 = vmov 0   ;;  %v86_v46 = vlaneseq  ;;  %s386_s0 = inlined_call_operand.vmem [shape: f32[10,128], index: 0, kind: input, shape index: {}]   ;;  %s387_s3 = inlined_call_operand.vmem [shape: bf16[128,256], index: 3, kind: input, shape index: {}]   ;;  %s388_s1 = inlined_call_operand.vmem [shape: f32[1,128], index: 1, kind: input, shape index: {}]   ;;  %s389_s2 = inlined_call_operand.vmem [shape: f32[1,128], index: 2, kind: input, shape index: {}]   ;;  %s390_s4 = inlined_call_operand.vmem [shape: f32[1,256], index: 4, kind: input, shape index: {}]   ;;  %s391_s5 = inlined_call_operand.vmem [shape: f32[10,256], index: 5, kind: output, shape index: {}]  }
   0x1   :  { %v22_v0 = vld [vmem:[%s386_s0 + $0x8] sm:$0x3]  ;;  %v21_v2 = vld [vmem:[%s386_s0] sm:$0xff]  ;;  %v250_v3 = vld [vmem:[%s387_s3 + $0x74] ss:$8 sps:$4 sm:$0xff]   ;;  %208 = vmatprep.mubr.bf16.mxu0 %v278_v23 }
   0x2   :  { %v26_v1 = vsel %vm25_vm0, %v22_v0, 0.0  ;;  %v252_v4 = vld [vmem:[%s387_s3 + $0x70] ss:$8 sps:$4 sm:$0xff]   ;;  %176 = vmatprep.subr.bf16.mxu0 %v250_v3  ;;  %v253_v14 = vld [vmem:[%s387_s3 + $0x64] ss:$8 sps:$4 sm:$0xff]   ;;  %v87_v47 = vshrl.u32 %v86_v46, 7 }
   0x3   :  { %27 = vadd.xlane.f32.xlu0 %v26_v1  ;;  %177 = vmatpush1.bf16.msra.mxu0 %v252_v4  ;;  %v255_v15 = vld [vmem:[%s387_s3 + $0x60] ss:$8 sps:$4 sm:$0xff]   ;;  %v256_v16 = vld [vmem:[%s387_s3 + $0x54] ss:$8 sps:$4 sm:$0xff]   ;;  %v258_v17 = vld [vmem:[%s387_s3 + $0x50] ss:$8 sps:$4 sm:$0xff]  }
   0x4   :  { %178 = vmatprep.subr.bf16.mxu0 %v253_v14  ;;  %v259_v18 = vld [vmem:[%s387_s3 + $0x44] ss:$8 sps:$4 sm:$0xff]   ;;  %v261_v19 = vld [vmem:[%s387_s3 + $0x40] ss:$8 sps:$4 sm:$0xff]   ;;  %v262_v20 = vld [vmem:[%s387_s3 + $0x34] ss:$8 sps:$4 sm:$0xff]  }
   0x5   :  { %v264_v21 = vld [vmem:[%s387_s3 + $0x30] ss:$8 sps:$4 sm:$0xff]   ;;  %v265_v22 = vld [vmem:[%s387_s3 + $0x24] ss:$8 sps:$4 sm:$0xff]   ;;  %v267_v24 = vld [vmem:[%s387_s3 + $0x20] ss:$8 sps:$4 sm:$0xff]  }
   0x6   :  { %v268_v25 = vld [vmem:[%s387_s3 + $0x14] ss:$8 sps:$4 sm:$0xff]   ;;  %v270_v26 = vld [vmem:[%s387_s3 + $0x10] ss:$8 sps:$4 sm:$0xff]   ;;  %v271_v27 = vld [vmem:[%s387_s3 + $0x4] ss:$8 sps:$4 sm:$0xff]  }
   0x7   :  { %23 = vadd.xlane.f32.xlu0 %v21_v2  ;;  %179 = vmatpush1.bf16.msra.mxu0 %v255_v15  ;;  %v273_v28 = vld [vmem:[%s387_s3] ss:$8 sps:$4 sm:$0xff]   ;;  %v88_v48 = vsub.s32 0, %v87_v47  ;;  %v92_v50 = vsub.s32 1, %v87_v47 }
   0x8   :  { %180 = vmatprep.subr.bf16.mxu0 %v256_v16  ;;  %v231_v37 = vld [vmem:[%s388_s1] ss:$0 sm:$0xff] }
   0x9   :  { %v232_v41 = vld [vmem:[%s389_s2] ss:$0 sm:$0xff] }
   0xa   :  { %v84_v49 = vld [vmem:[%s390_s4] sm:$0x3] }
   0xb   :  { %181 = vmatpush1.bf16.msra.mxu0 %v258_v17  ;;  %v89_v51 = vrot.slane %v84_v49, %v88_v48  ;;  %v93_v52 = vrot.slane %v84_v49, %v92_v50 }
   0xc   :  { %182 = vmatprep.subr.bf16.mxu0 %v259_v18 }
   0xf   :  { %183 = vmatpush1.bf16.msra.mxu0 %v261_v19 }
  0x10   :  { %184 = vmatprep.subr.bf16.mxu0 %v262_v20 }
  0x13   :  { %185 = vmatpush1.bf16.msra.mxu0 %v264_v21 }
  0x14   :  { %186 = vmatprep.subr.bf16.mxu0 %v265_v22 }
  0x17   :  { %187 = vmatpush1.bf16.msra.mxu0 %v267_v24 }
  0x18   :  { %188 = vmatprep.subr.bf16.mxu0 %v268_v25 }
  0x1b   :  { %189 = vmatpush1.bf16.msra.mxu0 %v270_v26 }
  0x1c   :  { %190 = vmatprep.subr.bf16.mxu0 %v271_v27 }
  0x1f   :  { %191 = vmatpush1.bf16.msra.mxu0 %v273_v28 }
  0x8c   :  { %v28_v5 = vpop.xlane.xlu0 %27 }
  0x8d   :  { %v31_v6 = vmul.f32 0.0078125, %v28_v5 }
  0x8f   :  { %v33_v9 = vsub.f32 %v22_v0, %v31_v6 }
  0x90   :  { %v24_v7 = vpop.xlane.xlu0 %23 }
  0x91   :  { %v30_v8 = vmul.f32 0.0078125, %v24_v7  ;;  %v35_v12 = vmul.f32 %v33_v9, %v33_v9 }
  0x93   :  { %v32_v10 = vsub.f32 %v21_v2, %v30_v8  ;;  %v38_v13 = vsel %vm25_vm0, %v35_v12, 0.0 }
  0x95   :  { %v34_v11 = vmul.f32 %v32_v10, %v32_v10 }
  0x97   :  { %36 = vadd.xlane.f32.xlu1 %v34_v11 }
  0x9b   :  { %39 = vadd.xlane.f32.xlu1 %v38_v13 }
 0x120   :  { %v37_v29 = vpop.xlane.xlu1 %36 }
 0x121   :  { %v41_v30 = vmul.f32 0.0078125, %v37_v29 }
 0x123   :  { %v43_v31 = vadd.f32 1e-05, %v41_v30 }
 0x124   :  { %v40_v32 = vpop.xlane.xlu1 %39 }
 0x125   :  { %274 = vrsqrt.f32 %v43_v31  ;;  %v42_v33 = vmul.f32 0.0078125, %v40_v32 }
 0x127   :  { %v44_v34 = vadd.f32 1e-05, %v42_v33 }
 0x129   :  { %276 = vrsqrt.f32 %v44_v34 }
 0x132   :  { %v275_v35 = vpop.eup %274 }
 0x133   :  { %v47_v36 = vmul.f32 %v275_v35, %v32_v10 }
 0x135   :  { %v56_v40 = vmul.f32 %v231_v37, %v47_v36 }
 0x136   :  { %v277_v38 = vpop.eup %276 }
 0x137   :  { %v48_v39 = vmul.f32 %v277_v38, %v33_v9  ;;  %v65_v43 = vadd.f32 %v232_v41, %v56_v40 }
 0x139   :  { %v57_v42 = vmul.f32 %v231_v37, %v48_v39 }
 0x13b   :  { %v66_v44 = vadd.f32 %v232_v41, %v57_v42 }
 0x13d   :  { %v67_v45 = vpack.c.bf16 %v66_v44, %v65_v43 }
 0x13f   :  { %209 = vmatmul.mubr.bf16.vlgmr.msra.gmra.mxu0 %v67_v45 }
 0x1ff   :  { %v210_v53 = vpop.f32.mrf.mxu0 }
 0x200   :  { %v211_v54 = vadd.f32 %v210_v53, %v89_v51 }
 0x201   :  { %v212_v55 = vpop.f32.mrf.mxu0 }
 0x202   :  { %v219_v56 = vmax.f32 %v211_v54, 0.0  ;;  %v213_v57 = vadd.f32 %v212_v55, %v93_v52 }
 0x203   :  { %v214_v58 = vpop.f32.mrf.mxu0 }
 0x204   :  { %223 = vst [vmem:[%s391_s5] sm:$0xff] %v219_v56  ;;  %v220_v59 = vmax.f32 %v213_v57, 0.0  ;;  %v215_v60 = vadd.f32 %v214_v58, %v89_v51 }
 0x205   :  { %v216_v61 = vpop.f32.mrf.mxu0 }
 0x206   :  { %224 = vst [vmem:[%s391_s5 + $0x8] sm:$0xff] %v220_v59  ;;  %v221_v62 = vmax.f32 %v215_v60, 0.0  ;;  %v217_v63 = vadd.f32 %v216_v61, %v93_v52 }
 0x208   :  { %225 = vst [vmem:[%s391_s5 + $0x10] sm:$0x3] %v221_v62  ;;  %v222_v0 = vmax.f32 %v217_v63, 0.0 }
 0x20a   :  { %226 = vst [vmem:[%s391_s5 + $0x18] sm:$0x3] %v222_v0 }

// kernel: _lambda_.167
= control target key start
LH: loop header
LB: loop body
LE: loop exit
PB: predicated region body
PF: predicated region fallthrough
CT: control target
= control target key end

     0   :  { %s347_s1 = inlined_call_operand.vmem [shape: bf16[256,128], index: 1, kind: input, shape index: {}]   ;;  %s348_s0 = inlined_call_operand.vmem [shape: f32[10,256], index: 0, kind: input, shape index: {}]   ;;  %s349_s2 = inlined_call_operand.vmem [shape: f32[1,128], index: 2, kind: input, shape index: {}]   ;;  %s350_s3 = inlined_call_operand.vmem [shape: f32[10,128], index: 3, kind: output, shape index: {}]  }
   0x1   :  { %v242_v0 = vld [vmem:[%s347_s1 + $0x78] sm:$0xff]   ;;  %v244_v2 = vld [vmem:[%s347_s1 + $0x70] sm:$0xff]   ;;  %v246_v4 = vld [vmem:[%s347_s1 + $0x68] sm:$0xff]  }
   0x2   :  { %v243_v1 = vld [vmem:[%s347_s1 + $0x38] sm:$0xff]   ;;  %220 = vmatprep.subr.bf16.mxu0 %v242_v0  ;;  %v245_v3 = vld [vmem:[%s347_s1 + $0x30] sm:$0xff]   ;;  %v247_v5 = vld [vmem:[%s347_s1 + $0x28] sm:$0xff]  }
   0x3   :  { %221 = vmatpush3.bf16.msra.mxu0 %v243_v1  ;;  %v248_v6 = vld [vmem:[%s347_s1 + $0x60] sm:$0xff]   ;;  %v250_v8 = vld [vmem:[%s347_s1 + $0x58] sm:$0xff]   ;;  %v252_v10 = vld [vmem:[%s347_s1 + $0x50] sm:$0xff]  }
   0x4   :  { %222 = vmatprep.subr.bf16.mxu0 %v244_v2  ;;  %v249_v7 = vld [vmem:[%s347_s1 + $0x20] sm:$0xff]   ;;  %v251_v9 = vld [vmem:[%s347_s1 + $0x18] sm:$0xff]   ;;  %v16_v11 = vld [vmem:[%s348_s0 + $0x8] sm:$0xff] }
   0x5   :  { %v18_v12 = vld [vmem:[%s348_s0 + $0x18] sm:$0x3]  ;;  %v253_v14 = vld [vmem:[%s347_s1 + $0x10] sm:$0xff]   ;;  %v254_v15 = vld [vmem:[%s347_s1 + $0x48] sm:$0xff]  }
   0x6   :  { %v20_v13 = vpack.c.bf16 %v18_v12, %v16_v11  ;;  %v255_v16 = vld [vmem:[%s347_s1 + $0x8] sm:$0xff]   ;;  %v256_v17 = vld [vmem:[%s347_s1 + $0x40] sm:$0xff]   ;;  %v17_v20 = vld [vmem:[%s348_s0 + $0x10] sm:$0x3] }
   0x7   :  { %223 = vmatpush3.bf16.msra.mxu0 %v245_v3  ;;  %v257_v18 = vld [vmem:[%s347_s1] sm:$0xff]  }
   0x8   :  { %224 = vmatprep.subr.bf16.mxu0 %v246_v4  ;;  %188 = vmatprep.mubr.bf16.mxu0 %v20_v13  ;;  %v15_v19 = vld [vmem:[%s348_s0] sm:$0xff] }
   0x9   :  { %v19_v21 = vpack.c.bf16 %v17_v20, %v15_v19  ;;  %v203_v23 = vld [vmem:[%s349_s2] ss:$0 sm:$0xff] }
   0xb   :  { %225 = vmatpush3.bf16.msra.mxu0 %v247_v5 }
   0xc   :  { %226 = vmatprep.subr.bf16.mxu0 %v248_v6 }
   0xf   :  { %227 = vmatpush3.bf16.msra.mxu0 %v249_v7 }
  0x10   :  { %228 = vmatprep.subr.bf16.mxu0 %v250_v8 }
  0x13   :  { %229 = vmatpush3.bf16.msra.mxu0 %v251_v9 }
  0x14   :  { %230 = vmatprep.subr.bf16.mxu0 %v252_v10 }
  0x17   :  { %231 = vmatpush3.bf16.msra.mxu0 %v253_v14 }
  0x18   :  { %232 = vmatprep.subr.bf16.mxu0 %v254_v15 }
  0x1b   :  { %233 = vmatpush3.bf16.msra.mxu0 %v255_v16 }
  0x1c   :  { %234 = vmatprep.subr.bf16.mxu0 %v256_v17 }
  0x1f   :  { %235 = vmatpush3.bf16.msra.mxu0 %v257_v18 }
  0x22   :  { %189 = vmatmul.mubr.bf16.vlgmr.msra.gmra.mxu0 %v19_v21 }
  0xe2   :  { %v236_v22 = vpop.f32.mrf.mxu0 }
  0xe4   :  { %v237_v24 = vpop.f32.mrf.mxu0 }
  0xe5   :  { %v238_v25 = vadd.f32 %v237_v24, %v236_v22 }
  0xe6   :  { %v239_v26 = vpop.f32.mrf.mxu0 }
  0xe7   :  { %v191_v27 = vadd.f32 %v238_v25, %v203_v23 }
  0xe8   :  { %v240_v28 = vpop.f32.mrf.mxu0 }
  0xe9   :  { %197 = vst [vmem:[%s350_s3] sm:$0xff] %v191_v27  ;;  %v241_v29 = vadd.f32 %v240_v28, %v239_v26 }
  0xeb   :  { %v194_v30 = vadd.f32 %v241_v29, %v203_v23 }
  0xed   :  { %198 = vst [vmem:[%s350_s3 + $0x8] sm:$0x3] %v194_v30 }

// kernel: _lambda_.183
= control target key start
LH: loop header
LB: loop body
LE: loop exit
PB: predicated region body
PF: predicated region fallthrough
CT: control target
= control target key end

     0   :  { %v220_v1 = vmov 0.0   ;;  %vm221_vm0 = vmmov 0   ;;  %vm162_vm1 = vcmask 261120   ;;  %s291_s0 = inlined_call_operand.vmem [shape: f32[8,128], index: 0, kind: input, shape index: {}]   ;;  %s292_s3 = inlined_call_operand.vmem [shape: bf16[128,32], index: 3, kind: input, shape index: {}]   ;;  %s293_s1 = inlined_call_operand.vmem [shape: f32[1,128], index: 1, kind: input, shape index: {}]   ;;  %s294_s2 = inlined_call_operand.vmem [shape: f32[1,128], index: 2, kind: input, shape index: {}]   ;;  %s295_s4 = inlined_call_operand.vmem [shape: f32[1,32], index: 4, kind: input, shape index: {}]   ;;  %s296_s5 = inlined_call_operand.vmem [shape: f32[8,32], index: 5, kind: output, shape index: {}]  }
   0x1   :  { %v21_v0 = vld [vmem:[%s291_s0] sm:$0xff]  ;;  %188 = vmatprep.subr.bf16.mxu0 %v220_v1  ;;  %v210_v2 = vld [vmem:[%s292_s3 + $0x38] sm:$0xff]   ;;  %v211_v3 = vld [vmem:[%s292_s3 + $0x30] sm:$0xff]   ;;  %204 = vmatprep.mubr.msk.bf16.mxu0 %vm221_vm0, %v220_v1 }
   0x2   :  { %22 = vadd.xlane.f32.xlu0 %v21_v0  ;;  %189 = vmatpush3.bf16.msra.mxu0 %v210_v2  ;;  %v212_v8 = vld [vmem:[%s292_s3 + $0x28] sm:$0xff]   ;;  %v213_v9 = vld [vmem:[%s292_s3 + $0x20] sm:$0xff]   ;;  %v214_v10 = vld [vmem:[%s292_s3 + $0x18] sm:$0xff]  }
   0x3   :  { %190 = vmatprep.subr.bf16.mxu0 %v220_v1  ;;  %v215_v11 = vld [vmem:[%s292_s3 + $0x10] sm:$0xff]   ;;  %v216_v12 = vld [vmem:[%s292_s3 + $0x8] sm:$0xff]   ;;  %v217_v13 = vld [vmem:[%s292_s3] sm:$0xff]  }
   0x4   :  { %v168_v18 = vld [vmem:[%s293_s1] ss:$0 sm:$0xff] }
   0x5   :  { %v169_v20 = vld [vmem:[%s294_s2] ss:$0 sm:$0xff] }
   0x6   :  { %191 = vmatpush3.bf16.msra.mxu0 %v211_v3  ;;  %v170_v24 = vld [vmem:[%s295_s4] ss:$0 sm:$0xff] }
   0x7   :  { %192 = vmatprep.subr.bf16.mxu0 %v220_v1 }
   0xa   :  { %193 = vmatpush3.bf16.msra.mxu0 %v212_v8 }
   0xb   :  { %194 = vmatprep.subr.bf16.mxu0 %v220_v1 }
   0xe   :  { %195 = vmatpush3.bf16.msra.mxu0 %v213_v9 }
   0xf   :  { %196 = vmatprep.subr.bf16.mxu0 %v220_v1 }
  0x12   :  { %197 = vmatpush3.bf16.msra.mxu0 %v214_v10 }
  0x13   :  { %198 = vmatprep.subr.bf16.mxu0 %v220_v1 }
  0x16   :  { %199 = vmatpush3.bf16.msra.mxu0 %v215_v11 }
  0x17   :  { %200 = vmatprep.subr.bf16.mxu0 %v220_v1 }
  0x1a   :  { %201 = vmatpush3.bf16.msra.mxu0 %v216_v12 }
  0x1b   :  { %202 = vmatprep.subr.bf16.mxu0 %v220_v1 }
  0x1e   :  { %203 = vmatpush3.bf16.msra.mxu0 %v217_v13 }
  0x8b   :  { %v23_v4 = vpop.xlane.xlu0 %22 }
  0x8c   :  { %v25_v5 = vmul.f32 0.0078125, %v23_v4 }
  0x8e   :  { %v26_v6 = vsub.f32 %v21_v0, %v25_v5 }
  0x90   :  { %v27_v7 = vmul.f32 %v26_v6, %v26_v6 }
  0x92   :  { %28 = vadd.xlane.f32.xlu0 %v27_v7 }
 0x11b   :  { %v29_v14 = vpop.xlane.xlu0 %28 }
 0x11c   :  { %v30_v15 = vmul.f32 0.0078125, %v29_v14 }
 0x11e   :  { %v31_v16 = vadd.f32 1e-05, %v30_v15 }
 0x120   :  { %218 = vrsqrt.f32 %v31_v16 }
 0x12d   :  { %v219_v17 = vpop.eup %218 }
 0x12e   :  { %v33_v19 = vmul.f32 %v219_v17, %v26_v6 }
 0x130   :  { %v41_v21 = vmul.f32 %v168_v18, %v33_v19 }
 0x132   :  { %v49_v22 = vadd.f32 %v169_v20, %v41_v21 }
 0x134   :  { %v50_v23 = vpack.c.bf16 %v49_v22, %v49_v22 }
 0x136   :  { %205 = vmatmul.mubr.bf16.vlgmr.msra.gmra.mxu0 %v50_v23 }
 0x1f6   :  { %v156_v25 = vpop.f32.mrf.mxu0 }
 0x1f7   :  { %v157_v26 = vadd.f32 %v170_v24, %v156_v25 }
 0x1f8   :  { %v206_v27 = vpop.f32.mrf.mxu0 }
 0x1f9   :  { %163 = vst.msk [vmem:[%s296_s5] sm:$0xff] %vm162_vm1, %v157_v26 }
 0x1fa   :  { %v159_v28 = vpop.f32.mrf.mxu0 }
 0x1fc   :  { %v207_v29 = vpop.f32.mrf.mxu0 }

</bundles_post_ra>
